<compile_context>
chip_gen: v5e
topology: v5e:2x2
jax: 0.10.0
libtpu: 0.0.40
codegen_flags: <defaults>
</compile_context>

<pallas_src>
import functools

import jax
import jax.numpy as jnp
from jax import lax
from jax.experimental import pallas as pl
from jax.experimental.pallas import tpu as pltpu

_LANE = 128


def _volume_sdf_kernel(dist_ref, depth_ref, color_ref, out_ref, *, alpha, beta):
    dist = dist_ref[...]           # (T, P)
    depth = depth_ref[...]         # (T, P)
    T, P = dist.shape

    # --- sdf_to_density with a single EUP exp ---
    # s = -dist;  s <= 0 (dist >= 0): alpha * 0.5 * exp(s/beta)      = a*0.5*e
    #             s  > 0 (dist <  0): alpha * (1 - 0.5*exp(-s/beta)) = a*(1-0.5*e)
    # with e = exp(-|dist|/beta).  One exp instead of two, and no inf in the
    # discarded branch.
    e = jnp.exp(-jnp.abs(dist) * (1.0 / beta))
    density = alpha * jnp.where(dist >= 0.0, 0.5 * e, 1.0 - 0.5 * e)   # (T, P)

    # --- deltas: depth[i+1] - depth[i], last entry = 1e10 sentinel ---
    d_diff = depth[:, 1:] - depth[:, :P - 1]                           # (T, P-1)
    sentinel = jnp.full((T, 1), 1.0e10, dtype=depth.dtype)
    deltas = jnp.concatenate([d_diff, sentinel], axis=-1)              # (T, P)

    dd = density * deltas                                              # (T, P)

    # --- transmittance: exp(-exclusive_cumsum(dd)) via strictly-lower-tri
    # matmul.  tri[j, i] = 1 iff j < i, built in-kernel (no HBM input, no
    # double-buffered VMEM copy).  The sentinel lane of dd never reaches cum
    # because tri is strictly lower triangular.
    tri = (lax.broadcasted_iota(jnp.int32, (P, P), 0)
           < lax.broadcasted_iota(jnp.int32, (P, P), 1)).astype(jnp.float32)
    cum = jnp.dot(dd, tri,
                  preferred_element_type=jnp.float32,
                  precision=lax.Precision.HIGHEST)                     # (T, P)
    trans = jnp.exp(-cum)

    weights = (1.0 - jnp.exp(-dd)) * trans                             # (T, P)

    # --- aggregate: out[c, t] = sum_p weights[t, p] * color[c, t, p] ---
    # Channel-first color keeps n_pts on the lane axis, so this is three
    # lane-dense multiplies + lane reduces and a lane-dense (3, T) store.
    out_ref[...] = jnp.sum(color_ref[...] * weights[None, :, :], axis=-1)


def _pick_tile(n_rays, n_pts, *, tile_budget_bytes=10 << 20, min_grid=4):
    """Largest ray tile T such that the double-buffered input blocks fit the
    budget, T is lane-aligned (multiple of 128, required by the lane-dense
    (3, T) output block), T divides n_rays, and -- when possible -- the grid
    keeps at least `min_grid` steps (megacore split + pipelining depth)."""
    if n_rays % _LANE != 0:
        # Single step; every block equals the full array, always layout-legal.
        return n_rays
    per_ray_bytes = 5 * n_pts * 4          # dist + depth + 3-channel color, f32
    cap = (tile_budget_bytes // (2 * per_ray_bytes)) // _LANE * _LANE
    cap = max(_LANE, min(cap, n_rays))
    if n_rays >= min_grid * _LANE:
        cap = max(_LANE, min(cap, (n_rays // min_grid) // _LANE * _LANE))
    t = cap
    while n_rays % t:
        t -= _LANE
    return t


def volume_sdf_render(distance, depth_values, color, *, alpha, beta,
                      chunk_size=None, include_geometry=False):
    """Volume-SDF rendering (forward pass of the PyTorch VolumeSDFRenderer).

    Args:
      distance:     (N_rays, n_pts) f32 SDF values.
      depth_values: (N_rays, n_pts) f32 sample depths.
      color:        per-sample RGB, channel-first (3, N_rays, n_pts)
                    (fast path, no extra HBM traffic).  A module-style
                    (N_rays, n_pts, 3) array is accepted but transposed.
      chunk_size:   ray tile; None -> auto-sized for the TPU VMEM budget.
      include_geometry: if True also return the all-zeros `geometry` output.

    Returns dict with 'color': (N_rays, 3) [and 'geometry': (N_rays*n_pts, 3)].
    """
    distance = jnp.asarray(distance, jnp.float32)
    depth_values = jnp.asarray(depth_values, jnp.float32)
    color = jnp.asarray(color, jnp.float32)

    n_rays, n_pts = distance.shape

    # Accept either layout; the kernel wants n_pts on the lane (last) axis.
    if color.shape == (3, n_rays, n_pts):
        color_cnp = color
    elif color.shape == (n_rays, n_pts, 3):
        # TODO(synk): this legacy path re-reads/writes the full color tensor
        # in HBM; upstream color networks should emit channel-first (3, N, P).
        color_cnp = jnp.transpose(color, (2, 0, 1))
    else:
        raise ValueError(f"unexpected color shape {color.shape}")

    if chunk_size is None:
        T = _pick_tile(n_rays, n_pts)
    else:
        T = int(chunk_size)
        if n_rays % T != 0:
            raise ValueError("n_rays must be a multiple of chunk_size")
        if T != n_rays and T % _LANE != 0:
            raise ValueError("chunk_size must be a multiple of 128 "
                             "(lane-dense output tile) or equal n_rays")

    kernel = functools.partial(_volume_sdf_kernel,
                               alpha=float(alpha), beta=float(beta))

    cost = pl.CostEstimate(
        flops=int(2 * n_rays * n_pts * n_pts + 12 * n_rays * n_pts),
        transcendentals=int(3 * n_rays * n_pts),
        bytes_accessed=int(4 * (5 * n_rays * n_pts + 3 * n_rays)),
    )

    rendered_cn = pl.pallas_call(
        kernel,
        out_shape=jax.ShapeDtypeStruct((3, n_rays), jnp.float32),
        grid_spec=pltpu.PrefetchScalarGridSpec(
            num_scalar_prefetch=0,
            grid=(n_rays // T,),
            in_specs=[
                pl.BlockSpec((T, n_pts), lambda i: (i, 0)),        # distance
                pl.BlockSpec((T, n_pts), lambda i: (i, 0)),        # depth
                pl.BlockSpec((3, T, n_pts), lambda i: (0, i, 0)),  # color
            ],
            # Lane-dense output block (3, T); wrapper transposes back.
            out_specs=pl.BlockSpec((3, T), lambda i: (0, i)),
        ),
        compiler_params=pltpu.CompilerParams(
            dimension_semantics=("parallel",),       # shards rays on v7x 2 TCs
            vmem_limit_bytes=48 * 1024 * 1024,       # safe on v5e/v6e/v7x
        ),
        cost_estimate=cost,
    )(distance, depth_values, color_cnp)

    out = {"color": rendered_cn.T}                    # (N_rays, 3)
    if include_geometry:
        # PyTorch: geometry_color = torch.zeros_like(color) -> (N*P, 3).
        out["geometry"] = jnp.zeros((n_rays * n_pts, 3), jnp.float32)
    return out


def _reference(distance, depth_values, color_np3, alpha, beta):
    """Pure-jnp port of the PyTorch module (channel-last color)."""
    s = -distance
    density = jnp.where(
        s <= 0.0,
        alpha * (0.5 * jnp.exp(s / beta)),
        alpha * (1.0 - 0.5 * jnp.exp(-s / beta)),
    )
    deltas = jnp.concatenate(
        [depth_values[:, 1:] - depth_values[:, :-1],
         jnp.full_like(depth_values[:, :1], 1.0e10)],
        axis=-1,
    )
    dd = density * deltas
    cum = jnp.concatenate(
        [jnp.zeros_like(dd[:, :1]), jnp.cumsum(dd[:, :-1], axis=-1)], axis=-1)
    trans = jnp.exp(-cum)
    weights = (1.0 - jnp.exp(-dd)) * trans
    return jnp.sum(weights[:, :, None] * color_np3, axis=1)


if __name__ == "__main__":
    # Small but TPU-friendly shapes: n_pts on the lane axis (multiple of 128);
    # n_rays large enough that the auto-tiler produces a >= 4-step grid
    # (T = 256 here) exercising the pipelined / megacore path.
    n_rays, n_pts = 1024, 128
    alpha, beta = 10.0, 0.05

    key = jax.random.PRNGKey(0)
    k1, k2, k3 = jax.random.split(key, 3)

    # SDF values per sample (can be +/-).
    distance = jax.random.normal(k1, (n_rays, n_pts), jnp.float32) * 0.3
    # Monotonically increasing sample depths along each ray.
    step = jax.random.uniform(k2, (n_rays, n_pts), jnp.float32, 0.01, 0.2)
    depth_values = 1.0 + jnp.cumsum(step, axis=-1)
    # Per-sample RGB in [0, 1], produced channel-first (lane-dense) layout.
    color = jax.random.uniform(k3, (3, n_rays, n_pts), jnp.float32)

    out = volume_sdf_render(
        distance, depth_values, color,
        alpha=alpha, beta=beta, chunk_size=None, include_geometry=True)
    jax.block_until_ready(out)

    ref = _reference(distance, depth_values,
                     jnp.transpose(color, (1, 2, 0)), alpha, beta)

    assert out["color"].shape == (n_rays, 3)
    assert out["geometry"].shape == (n_rays * n_pts, 3)
    assert jnp.allclose(out["color"], ref, atol=1e-4, rtol=1e-4), (
        float(jnp.max(jnp.abs(out["color"] - ref))))

    print("KERNEL_OK")
</pallas_src>

<mosaic_0001>
module attributes {stable_mosaic.version = 11 : i64} {
  func.func @_volume_sdf_kernel(%arg0: i32, %arg1: memref<256x128xf32, #tpu.memory_space<vmem>>, %arg2: memref<256x128xf32, #tpu.memory_space<vmem>>, %arg3: memref<3x256x128xf32, #tpu.memory_space<vmem>>, %arg4: memref<3x256xf32, #tpu.memory_space<vmem>>) attributes {dimension_semantics = [#tpu.dimension_semantics<parallel>], iteration_bounds = array<i64: 4>, scalar_prefetch = 0 : i64, scratch_operands = 0 : i64, tpu.core_type = #tpu.core_type<tc>, window_params = [{transform_indices = @transform_0, window_bounds = array<i64: 256, 128>}, {transform_indices = @transform_1, window_bounds = array<i64: 256, 128>}, {transform_indices = @transform_2, window_bounds = array<i64: 3, 256, 128>}, {transform_indices = @transform_3, window_bounds = array<i64: 3, 256>}]} {
    %c0 = arith.constant 0 : index
    %c0_0 = arith.constant 0 : index
    %0 = vector.load %arg1[%c0, %c0_0] : memref<256x128xf32, #tpu.memory_space<vmem>>, vector<256x128xf32>
    %c0_1 = arith.constant 0 : index
    %c0_2 = arith.constant 0 : index
    %1 = vector.load %arg2[%c0_1, %c0_2] : memref<256x128xf32, #tpu.memory_space<vmem>>, vector<256x128xf32>
    %2 = math.absf %0 : vector<256x128xf32>
    %cst = arith.constant 0.000000e+00 : f32
    %3 = vector.broadcast %cst : f32 to vector<256x128xf32>
    %4 = arith.subf %3, %2 : vector<256x128xf32>
    %cst_3 = arith.constant 2.000000e+01 : f32
    %5 = vector.broadcast %cst_3 : f32 to vector<256x128xf32>
    %6 = arith.mulf %4, %5 : vector<256x128xf32>
    %7 = math.exp %6 : vector<256x128xf32>
    %cst_4 = arith.constant 0.000000e+00 : f32
    %8 = vector.broadcast %cst_4 : f32 to vector<256x128xf32>
    %9 = arith.cmpf oge, %0, %8 : vector<256x128xf32>
    %cst_5 = arith.constant 5.000000e-01 : f32
    %10 = vector.broadcast %cst_5 : f32 to vector<256x128xf32>
    %11 = arith.mulf %10, %7 : vector<256x128xf32>
    %cst_6 = arith.constant 5.000000e-01 : f32
    %12 = vector.broadcast %cst_6 : f32 to vector<256x128xf32>
    %13 = arith.mulf %12, %7 : vector<256x128xf32>
    %cst_7 = arith.constant 1.000000e+00 : f32
    %14 = vector.broadcast %cst_7 : f32 to vector<256x128xf32>
    %15 = arith.subf %14, %13 : vector<256x128xf32>
    %16 = arith.select %9, %11, %15 : vector<256x128xi1>, vector<256x128xf32>
    %cst_8 = arith.constant 1.000000e+01 : f32
    %17 = vector.broadcast %cst_8 : f32 to vector<256x128xf32>
    %18 = arith.mulf %17, %16 : vector<256x128xf32>
    %19 = vector.extract_strided_slice %1 {offsets = [0, 1], sizes = [256, 127], strides = [1, 1]} : vector<256x128xf32> to vector<256x127xf32>
    %20 = vector.extract_strided_slice %1 {offsets = [0, 0], sizes = [256, 127], strides = [1, 1]} : vector<256x128xf32> to vector<256x127xf32>
    %21 = arith.subf %19, %20 : vector<256x127xf32>
    %cst_9 = arith.constant 1.000000e+10 : f32
    %22 = vector.broadcast %cst_9 : f32 to vector<256x1xf32>
    %23 = tpu.concatenate %21, %22 in 1 : vector<256x127xf32>, vector<256x1xf32> -> vector<256x128xf32>
    %24 = arith.mulf %18, %23 : vector<256x128xf32>
    %25 = tpu.iota {dimensions = array<i32: 0>} : vector<128x128xi32>
    %26 = tpu.iota {dimensions = array<i32: 1>} : vector<128x128xi32>
    %27 = arith.cmpi slt, %25, %26 : vector<128x128xi32>
    %28 = arith.extui %27 : vector<128x128xi1> to vector<128x128xi32>
    %29 = arith.sitofp %28 : vector<128x128xi32> to vector<128x128xf32>
    %cst_10 = arith.constant dense<0.000000e+00> : vector<256x128xf32>
    %30 = tpu.matmul %24, %29, %cst_10 {dimension_numbers = #tpu.dot_dimension_numbers<[1], [0], [0], [1], [0, 0, 1, 1], [], []>, precision = #tpu.contract_precision<fp32>} : vector<256x128xf32>, vector<128x128xf32>, vector<256x128xf32> -> vector<256x128xf32>
    %cst_11 = arith.constant 0.000000e+00 : f32
    %31 = vector.broadcast %cst_11 : f32 to vector<256x128xf32>
    %32 = arith.subf %31, %30 : vector<256x128xf32>
    %33 = math.exp %32 : vector<256x128xf32>
    %cst_12 = arith.constant 0.000000e+00 : f32
    %34 = vector.broadcast %cst_12 : f32 to vector<256x128xf32>
    %35 = arith.subf %34, %24 : vector<256x128xf32>
    %36 = math.exp %35 : vector<256x128xf32>
    %cst_13 = arith.constant 1.000000e+00 : f32
    %37 = vector.broadcast %cst_13 : f32 to vector<256x128xf32>
    %38 = arith.subf %37, %36 : vector<256x128xf32>
    %39 = arith.mulf %38, %33 : vector<256x128xf32>
    %c0_14 = arith.constant 0 : index
    %c0_15 = arith.constant 0 : index
    %c0_16 = arith.constant 0 : index
    %40 = vector.load %arg3[%c0_14, %c0_15, %c0_16] : memref<3x256x128xf32, #tpu.memory_space<vmem>>, vector<3x256x128xf32>
    %41 = vector.shape_cast %39 : vector<256x128xf32> to vector<1x256x128xf32>
    %42 = vector.broadcast %41 : vector<1x256x128xf32> to vector<3x256x128xf32>
    %43 = arith.mulf %40, %42 : vector<3x256x128xf32>
    %cst_17 = arith.constant dense<0.000000e+00> : vector<3x256xf32>
    %44 = vector.multi_reduction <add>, %43, %cst_17 [2] : vector<3x256x128xf32> to vector<3x256xf32>
    %c0_18 = arith.constant 0 : index
    %c0_19 = arith.constant 0 : index
    %45 = vector.load %arg4[%c0_18, %c0_19] : memref<3x256xf32, #tpu.memory_space<vmem>>, vector<3x256xf32>
    tpu.vector_store %arg4[%c0_18, %c0_19], %44 {strides = array<i32>} : memref<3x256xf32, #tpu.memory_space<vmem>>, vector<3x256xf32>,
    return
  }
  func.func @transform_0(%arg0: i32) -> (i32, i32) {
    %c0_i32 = arith.constant 0 : i32
    %c0_i32_0 = arith.constant 0 : i32
    return %arg0, %c0_i32 : i32, i32
  }
  func.func @transform_1(%arg0: i32) -> (i32, i32) {
    %c0_i32 = arith.constant 0 : i32
    %c0_i32_0 = arith.constant 0 : i32
    return %arg0, %c0_i32 : i32, i32
  }
  func.func @transform_2(%arg0: i32) -> (i32, i32, i32) {
    %c0_i32 = arith.constant 0 : i32
    %c0_i32_0 = arith.constant 0 : i32
    %c0_i32_1 = arith.constant 0 : i32
    return %c0_i32, %arg0, %c0_i32_0 : i32, i32, i32
  }
  func.func @transform_3(%arg0: i32) -> (i32, i32) {
    %c0_i32 = arith.constant 0 : i32
    %c0_i32_0 = arith.constant 0 : i32
    return %c0_i32, %arg0 : i32, i32
  }
}

</mosaic_0001>

<bundles_post_ra>
// kernel: tpu_custom_call.1
= control target key start
LH: loop header
LB: loop body
LE: loop exit
PB: predicated region body
PF: predicated region fallthrough
CT: control target
= control target key end

     0   :  { %8 = vsyncpa [#allocation3], 0  ;;  %s8508_s0 = inlined_call_operand.hbm [shape: f32[1024,128], index: 0, kind: input, shape index: {}]   ;;  %s8509_s1 = inlined_call_operand.hbm [shape: f32[1024,128], index: 1, kind: input, shape index: {}]   ;;  %s8510_s2 = inlined_call_operand.hbm [shape: f32[3,1024,128], index: 2, kind: input, shape index: {}]   ;;  %s8511_s3 = inlined_call_operand.hbm [shape: f32[3,1024], index: 3, kind: output, shape index: {}]  }
   0x1   :  { %10 = vsyncpa [#allocation3 + $0x1], 0 }
   0x2   :  { %11 = vsyncpa [#allocation6], 0 }
   0x3   :  { %13 = vsyncpa [#allocation6 + $0x1], 0 }
   0x4   :  { %14 = vsyncpa [#allocation4], 0 }
   0x5   :  { %16 = vsyncpa [#allocation4 + $0x1], 0  ;;  %s5400_s12 = smov 0   ;;  %s5402_s13 = smov 0  }
   0x6   :  { %s5404_s14 = smov 0   ;;  %s5406_s15 = smov 0  }
   0x7 LB: > { %8650 = sst [smem:[#allocation15_spill]] %s5359_s14  ;;  %s5421_s16 = sadd.s32 4294967295, %s5363_s15   ;;  %s5363_s15 = sphi %s5406_s15, %s8942_s15   ;;  %s5359_s14 = sphi %s5404_s14, %s8939_s14   ;;  %s5355_s13 = sphi %s5402_s13, %s8941_s13   ;;  %s5351_s12 = sphi %s5400_s12, %s8940_s12  }
   0x8   : > { %s4851_s17 = sadd.s32 4294967294, %s5363_s15   ;;  %s5425_s18 = sadd.s32 1, %s5363_s15  }
   0x9   : > { %s29_s19 = sadd.s32 1, %s5359_s14  ;;  %s26_s20 = ssub.s32 %s5363_s15, %s5425_s18 }
   0xa   : > { %p36_p0 = scmp.ne.s32.totalorder %s5359_s14, %s5355_s13  ;;  %p27_p1 = scmp.eq.s32.totalorder %s26_s20, 0 }
   0xb   : > { %p37_p2 = scmp.eq.s32.totalorder %s5363_s15, 0  ;;  %p42_p3 = scmp.ne.s32.totalorder %s5355_s13, %s5351_s12 }
   0xc   : > { %p43_p4 = scmp.eq.s32.totalorder %s5421_s16, 0  ;;  %p118_p7 = scmp.eq.s32.totalorder %s5421_s16, 3 }
   0xd   : > { %s5437_s21 = scalar_select %p27_p1, %s5359_s14, %s29_s19  }
   0xe   : > { %p5439_p5 = por %p37_p2, %p36_p0  ;;  %p5443_p6 = por %p43_p4, %p42_p3 }
   0xf   : > { %8651 = sst [smem:[#allocation16_spill]] %s5437_s21  ;;  %p124_p8 = scmp.eq.s32.totalorder %s4851_s17, 3 }
  0x10   : > { %p5448_p9 = por %p118_p7, %p36_p0  ;;  %p4853_p11 = scmp.ge.s32.totalorder %s5363_s15, 4 }
  0x11   : > { %p5452_p10 = por %p124_p8, %p42_p3  ;;  %s5458_s26 = sand.u32 (!%p4853_p11), 1, %s5359_s14  }
  0x12   : > { %140 = sbr.rel (%p4853_p11) target bundleno = 62 (0x3e), region = 16  ;;  %s5461_s27 = sshll.u32 (!%p4853_p11), %s5363_s15, 8 }
  0x13   : > { %s4854_s28 = sshll.u32 (!%p4853_p11), %s5458_s26, 8  ;;  %s153_s4 = scalar_lea.hbm (!%p4853_p11), %s8508_s0, %s5461_s27 }
  0x14   : > { %s154_s5 = sshll.u32 (!%p4853_p11), %s153_s4, 4  ;;  %s148_s6 = scalar_lea.vmem (!%p4853_p11), [#allocation2], %s4854_s28  ;;  %s155_s5 = int_to_ptr.hbm [resolvable:$true] %s154_s5 }
  0x15   : > { %s156_s7 = sshll.u32 (!%p4853_p11), %s148_s6, 4  ;;  %s145_s8 = scalar_lea.sflag (!%p4853_p11), [#allocation3], %s5458_s26  ;;  %s157_s7 = int_to_ptr.vmem [resolvable:$true] %s156_s7 }
  0x16   : > { %s5237_s9 = sshra.s32 (!%p4853_p11), %s155_s5, 4  ;;  %s5243_s19 = scalar_lea.hbm (!%p4853_p11), %s8508_s0, 1024  ;;  %s5238_s9 = int_to_ptr.hbm [resolvable:$true] %s5237_s9 }
  0x17   : > { %s5239_s10 = scalar_lea.hbm %s5238_s9, 256  ;;  %p5244_p1 = scmp.lt.s32.totalorder %s5238_s9, %s8508_s0 }
  0x18   : > { %p5240_p12 = scmp.ne.s32.totalorder %s5238_s9, %s5239_s10  ;;  %p5245_p2 = scmp.lt.s32.totalorder %s5243_s19, %s5239_s10 }
  0x1a   : > { %p5241_p13 = pnand %p5240_p12, %p5439_p5  ;;  %p5246_p3 = por %p5245_p2, %p5244_p1 }
  0x1c   : > { %p5242_p0 = pneg %p5241_p13 }
  0x1e   : > { %p5247_p4 = pnand %p5246_p3, %p5242_p0 }
  0x20   : > { %5250 = shalt.err (!%p5247_p4)
}
  0x21   : > { %s5365_s30 = smov 128   ;;  %s5366_s4 = smov 8  }
  0x22   : > { %4975 = dma.hbm_to_vmem [thread:$0]  (%p5439_p5), %s155_s5, 4096, %s157_s7, %s145_s8, %s5365_s30, %s5365_s30, %s5366_s4  }
  0x23   : > { %s166_s6 = sand.u32 1, %s5363_s15   ;;  %s175_s17 = scalar_lea.hbm %s8509_s1, %s5461_s27 }
  0x24   : > { %s176_s14 = sshll.u32 %s175_s17, 4  ;;  %s170_s20 = scalar_lea.vmem [#allocation5], %s4854_s28  ;;  %s177_s14 = int_to_ptr.hbm [resolvable:$true] %s176_s14 }
  0x25   : > { %s178_s9 = sshll.u32 %s170_s20, 4  ;;  %s5484_s10 = scalar_lea.sflag [#allocation6], %s166_s6  ;;  %s179_s9 = int_to_ptr.vmem [resolvable:$true] %s178_s9 }
  0x26   : > { %s5265_s19 = sshra.s32 %s177_s14, 4  ;;  %s5271_s8 = scalar_lea.hbm %s8509_s1, 1024  ;;  %s5266_s19 = int_to_ptr.hbm [resolvable:$true] %s5265_s19 }
  0x27   : > { %s5267_s29 = scalar_lea.hbm %s5266_s19, 256  ;;  %p5272_p12 = scmp.lt.s32.totalorder %s5266_s19, %s8509_s1 }
  0x28   : > { %p5268_p7 = scmp.ne.s32.totalorder %s5266_s19, %s5267_s29  ;;  %p5273_p13 = scmp.lt.s32.totalorder %s5271_s8, %s5267_s29 }
  0x2a   : > { %p5269_p8 = pnand %p5268_p7, %p5439_p5  ;;  %p5274_p0 = por %p5273_p13, %p5272_p12 }
  0x2c   : > { %p5270_p11 = pneg %p5269_p8 }
  0x2e   : > { %p5275_p1 = pnand %p5274_p0, %p5270_p11 }
  0x30   : > { %5278 = shalt.err (!%p5275_p1)
}
  0x31   : > { %4976 = dma.hbm_to_vmem [thread:$0]  (%p5439_p5), %s177_s14, 4096, %s179_s9, %s5484_s10, %s5365_s30, %s5365_s30, %s5366_s4  }
  0x32   : > { %s4973_s28 = smul.u32 768, %s5458_s26  ;;  %s197_s20 = scalar_lea.hbm %s8510_s2, %s5461_s27 }
  0x33   : > { %s4977_s19 = scalar_select %p5439_p5, [#allocation0], [#allocation11] }
  0x34   : > { %s210_s29 = sshll.u32 %s197_s20, 4  ;;  %s192_s14 = scalar_lea.vmem [#allocation7], %s4973_s28  ;;  %s211_s29 = int_to_ptr.hbm [resolvable:$true] %s210_s29 }
  0x35   : > { %s202_s5 = sld [smem:[%s4977_s19]]   ;;  %s212_s30 = sshll.u32 %s192_s14, 4  ;;  %s213_s30 = int_to_ptr.vmem [resolvable:$true] %s212_s30 }
  0x36   : > { %s5367_s4 = smov 16384   ;;  %s5368_s26 = smov 4096  }
  0x37   : > { %4978 = sst [smem:[#allocation10]] (%p5439_p5), %s5367_s4  ;;  %s5369_s27 = smov 32  }
  0x38   : > { %4979 = sst [smem:[#allocation10 + $0x1]] (%p5439_p5), %s5368_s26  ;;  %s5370_s7 = smov 128  }
  0x39   : > { %4980 = sst [smem:[#allocation10 + $0x2]] (%p5439_p5), %s5369_s27  ;;  %s5371_s21 = smov 8  }
  0x3a   : > { %4981 = sst [smem:[#allocation10 + $0x3]] (%p5439_p5), %s5370_s7  ;;  %s5372_s11 = smov [#allocation9]  }
  0x3b   : > { %s4862_s9 = sshll.u32 %s202_s5, 26  ;;  %4982 = sst [smem:[#allocation10 + $0x4]] (%p5439_p5), %s5370_s7 }
  0x3c   : > { %s4863_s8 = sadd.s32 134217728, %s4862_s9  ;;  %4983 = sst [smem:[#allocation10 + $0x5]] (%p5439_p5), %s5371_s21 }
  0x3d   : > { %4984 = dma.general (%p5439_p5), %s211_s29, 12288, %s213_s30, %s5484_s10, %s5372_s11, [#allocation10], %s4863_s8, 0  }
  0x3e PF: > { %p4864_p2 = scmp.ge.s32.totalorder %s5363_s15, 1  ;;  %p233_p3 = scmp.lt.s32.totalorder %s5363_s15, 5 }
  0x40   : > { %p234_p4 = pnand %p4864_p2, %p233_p3 }
  0x42   : > { %237 = sbr.rel (%p234_p4) target bundleno = 1679 (0x68f), region = 32 }
  0x47   : > { %s5522_s28 = sand.u32 1, %s5355_s13  }
  0x48   : > { %s4865_s6 = sshll.u32 %s5522_s28, 8  ;;  %s240_s17 = scalar_lea.sflag [#allocation3], %s5522_s28 }
  0x49   : > { %s5526_s20 = scalar_lea.vmem [#allocation2], %s4865_s6 }
  0x4a   : > { %5338 = dma.done.wait (%p5443_p6), %s240_s17, 4096  }
  0x4b   : > { %5340 = vsyncadd (%p5443_p6), %s240_s17, 4294963200  ;;  %s249_s22 = sand.u32 1, %s5421_s16   ;;  %s5533_s19 = scalar_lea.vmem [#allocation5], %s4865_s6 }
  0x4c   : > { %s250_s10 = scalar_lea.sflag [#allocation6], %s249_s22 }
  0x4d   : > { %5342 = dma.done.wait (%p5443_p6), %s250_s10, 16384  }
  0x4e   : > { %5344 = vsyncadd (%p5443_p6), %s250_s10, 4294950912  ;;  %v5540_v0 = vld [vmem:[%s5533_s19] sm:$0xff]  ;;  %v5543_v1 = vld [vmem:[%s5533_s19 + $0x10] sm:$0xff]  ;;  %s5373_s29 = smov 1   ;;  %s5374_s23 = smov 127   ;;  %v1038_v50 = vlaneseq }
  0x4f   : > { %717 = vrot.lane.b32.xlu0 %v5540_v0, %s5373_s29  ;;  %721 = vrot.lane.b32.xlu1 %v5543_v1, %s5373_s29  ;;  %v5550_v2 = vld [vmem:[%s5533_s19 + $0x20] sm:$0xff]  ;;  %v5555_v3 = vld [vmem:[%s5533_s19 + $0x8] sm:$0xff]  ;;  %s4974_s5 = smul.u32 768, %s5522_s28  ;;  %s4867_s30 = sshll.u32 %s5522_s28, 3 }
  0x50   : > { %725 = vrot.lane.b32.xlu2 %v5550_v2, %s5373_s29  ;;  %v5558_v4 = vld [vmem:[%s5533_s19 + $0x18] sm:$0xff]  ;;  %v5561_v5 = vld [vmem:[%s5533_s19 + $0x28] sm:$0xff]  ;;  %v5573_v7 = vld [vmem:[%s5533_s19 + $0x30] sm:$0xff]  ;;  %v5717_v52 = vshrl.u32 %v1038_v50, 7  ;;  %v5719_v53 = vand.u32 127, %v1038_v50  ;;  %s4940_s4 = sshll.u32 %s5421_s16, 3 }
  0x51   : > { %v5570_v6 = vld [vmem:[%s5533_s19 + $0x38] sm:$0xff]  ;;  %v5576_v8 = vld [vmem:[%s5533_s19 + $0x40] sm:$0xff]  ;;  %v5585_v9 = vld [vmem:[%s5533_s19 + $0x50] sm:$0xff]  ;;  %s7228_s14 = scalar_lea.vmem [#allocation7], %s4974_s5  ;;  %s4733_s9 = scalar_lea.hbm %s8511_s3, %s4940_s4 }
  0x52   : > { %v5588_v10 = vld [vmem:[%s5533_s19 + $0x48] sm:$0xff]  ;;  %v5591_v11 = vld [vmem:[%s5533_s19 + $0x58] sm:$0xff]  ;;  %v5603_v13 = vld [vmem:[%s5533_s19 + $0x60] sm:$0xff]  ;;  %8656 = vst [vmem:[#allocation17_spill] sm:$0xff] %v5719_v53  ;;  %v1054_v55 = vadd.s32 120, %v5717_v52  ;;  %v1053_v56 = vadd.s32 112, %v5717_v52  ;;  %vm6066_vm15 = vcmp.lt.s32.totalorder %v5717_v52, %v5719_v53 }
  0x53   : > { %v5600_v12 = vld [vmem:[%s5533_s19 + $0x68] sm:$0xff]  ;;  %v5606_v14 = vld [vmem:[%s5533_s19 + $0x70] sm:$0xff]  ;;  %v5615_v15 = vld [vmem:[%s5533_s19 + $0x80] sm:$0xff]  ;;  %s296_s16 = scalar_lea.vmem [#allocation8], %s4867_s30  ;;  %s4737_s8 = sshll.u32 %s4733_s9, 4  ;;  %s4738_s8 = int_to_ptr.hbm [resolvable:$true] %s4737_s8 }
  0x54   : > { %v5618_v16 = vld [vmem:[%s5533_s19 + $0x78] sm:$0xff]  ;;  %v5621_v17 = vld [vmem:[%s5533_s19 + $0x88] sm:$0xff]  ;;  %v5633_v19 = vld [vmem:[%s5533_s19 + $0x90] sm:$0xff]  ;;  %vm5727_vm0 = vcmp.lt.s32.totalorder %v1054_v55, %v5719_v53  ;;  %vm5732_vm1 = vcmp.lt.s32.totalorder %v1053_v56, %v5719_v53  ;;  %s4735_s7 = sshll.u32 %s296_s16, 4  ;;  %s4722_s21 = scalar_lea.sflag [#allocation4], %s5522_s28  ;;  %s4736_s7 = int_to_ptr.vmem [resolvable:$true] %s4735_s7 }
  0x55   : > { %v5630_v18 = vld [vmem:[%s5533_s19 + $0x98] sm:$0xff]  ;;  %v5636_v20 = vld [vmem:[%s5533_s19 + $0xa0] sm:$0xff]  ;;  %v5645_v21 = vld [vmem:[%s5533_s19 + $0xb0] sm:$0xff]  ;;  %s5307_s11 = sshra.s32 %s4738_s8, 4  ;;  %s5313_s22 = scalar_lea.hbm %s8511_s3, 32  ;;  %s5308_s11 = int_to_ptr.hbm [resolvable:$true] %s5307_s11 }
  0x56   : > { %v5648_v22 = vld [vmem:[%s5533_s19 + $0xa8] sm:$0xff]  ;;  %v5651_v23 = vld [vmem:[%s5533_s19 + $0xb8] sm:$0xff]  ;;  %v5663_v25 = vld [vmem:[%s5533_s19 + $0xc0] sm:$0xff]  ;;  %s5309_s6 = scalar_lea.hbm %s5308_s11, 8  ;;  %p5314_p8 = scmp.lt.s32.totalorder %s5308_s11, %s8511_s3 }
  0x57   : > { %719 = vrot.lane.b32.xlu0 %v5555_v3, %s5373_s29  ;;  %723 = vrot.lane.b32.xlu1 %v5558_v4, %s5373_s29  ;;  %v5660_v24 = vld [vmem:[%s5533_s19 + $0xc8] sm:$0xff]  ;;  %v5666_v26 = vld [vmem:[%s5533_s19 + $0xd0] sm:$0xff]  ;;  %p5310_p5 = scmp.ne.s32.totalorder %s5308_s11, %s5309_s6  ;;  %p5315_p11 = scmp.lt.s32.totalorder %s5313_s22, %s5309_s6 }
  0x58   : > { %727 = vrot.lane.b32.xlu2 %v5561_v5, %s5373_s29  ;;  %v5675_v27 = vld [vmem:[%s5533_s19 + $0xe0] sm:$0xff]  ;;  %v5678_v28 = vld [vmem:[%s5533_s19 + $0xd8] sm:$0xff]  ;;  %v5681_v29 = vld [vmem:[%s5533_s19 + $0xe8] sm:$0xff] }
  0x59   : > { %v5690_v30 = vld [vmem:[%s5533_s19 + $0xf8] sm:$0xff]  ;;  %v5693_v31 = vld [vmem:[%s5533_s19 + $0xf0] sm:$0xff]  ;;  %p5311_p6 = pnand %p5310_p5, %p5448_p9  ;;  %p5316_p12 = por %p5315_p11, %p5314_p8 }
  0x5b   : > { %p5312_p7 = pneg %p5311_p6 }
  0x5d   : > { %p5317_p13 = pnand %p5316_p12, %p5312_p7 }
  0x5f   : > { %731 = vrot.lane.b32.xlu1 %v5570_v6, %s5373_s29  ;;  %729 = vrot.lane.b32.xlu0 %v5573_v7, %s5373_s29 }
  0x60   : > { %733 = vrot.lane.b32.xlu2 %v5576_v8, %s5373_s29 }
  0x67   : > { %737 = vrot.lane.b32.xlu1 %v5585_v9, %s5373_s29  ;;  %735 = vrot.lane.b32.xlu0 %v5588_v10, %s5373_s29 }
  0x68   : > { %739 = vrot.lane.b32.xlu2 %v5591_v11, %s5373_s29 }
  0x6f   : > { %743 = vrot.lane.b32.xlu1 %v5600_v12, %s5373_s29  ;;  %741 = vrot.lane.b32.xlu0 %v5603_v13, %s5373_s29 }
  0x70   : > { %745 = vrot.lane.b32.xlu2 %v5606_v14, %s5373_s29 }
  0x77   : > { %749 = vrot.lane.b32.xlu1 %v5615_v15, %s5373_s29  ;;  %747 = vrot.lane.b32.xlu0 %v5618_v16, %s5373_s29 }
  0x78   : > { %751 = vrot.lane.b32.xlu2 %v5621_v17, %s5373_s29 }
  0x7f   : > { %755 = vrot.lane.b32.xlu1 %v5630_v18, %s5373_s29  ;;  %753 = vrot.lane.b32.xlu0 %v5633_v19, %s5373_s29 }
  0x80   : > { %757 = vrot.lane.b32.xlu2 %v5636_v20, %s5373_s29 }
  0x87   : > { %761 = vrot.lane.b32.xlu1 %v5645_v21, %s5373_s29  ;;  %759 = vrot.lane.b32.xlu0 %v5648_v22, %s5373_s29 }
  0x88   : > { %763 = vrot.lane.b32.xlu2 %v5651_v23, %s5373_s29 }
  0x8f   : > { %767 = vrot.lane.b32.xlu1 %v5660_v24, %s5373_s29  ;;  %765 = vrot.lane.b32.xlu0 %v5663_v25, %s5373_s29 }
  0x90   : > { %769 = vrot.lane.b32.xlu2 %v5666_v26, %s5373_s29 }
  0x97   : > { %773 = vrot.lane.b32.xlu1 %v5675_v27, %s5373_s29  ;;  %771 = vrot.lane.b32.xlu0 %v5678_v28, %s5373_s29 }
  0x98   : > { %775 = vrot.lane.b32.xlu2 %v5681_v29, %s5373_s29 }
  0x9f   : > { %779 = vrot.lane.b32.xlu1 %v5690_v30, %s5373_s29  ;;  %777 = vrot.lane.b32.xlu0 %v5693_v31, %s5373_s29 }
  0xaa   : > { %v726_v32 = vpop.permute.xlu2 %725 }
  0xab   : > { %v817_v45 = vsub.f32 %v5550_v2, %v726_v32  ;;  %v6189_v32 = vld [vmem:[%s5526_s20 + $0x8] sm:$0xff] }
  0xb2   : > { %v728_v33 = vpop.permute.xlu2 %727 }
  0xb3   : > { %v818_v41 = vsub.f32 %v5561_v5, %v728_v33  ;;  %v1052_v5 = vadd.s32 104, %v5717_v52 }
  0xb5   : > { %vm5759_vm2 = vcmp.lt.s32.totalorder %v1052_v5, %v5719_v53 }
  0xba   : > { %v734_v34 = vpop.permute.xlu2 %733 }
  0xbb   : > { %v821_v47 = vsub.f32 %v5576_v8, %v734_v34  ;;  %v1050_v8 = vadd.s32 88, %v5717_v52 }
  0xbd   : > { %vm5783_vm4 = vcmp.lt.s32.totalorder %v1050_v8, %v5719_v53 }
  0xc1   : > { %v718_v35 = vpop.permute.xlu0 %717  ;;  %v722_v36 = vpop.permute.xlu1 %721 }
  0xc2   : > { %v813_v37 = vsub.f32 %v5540_v0, %v718_v35  ;;  %v815_v38 = vsub.f32 %v5543_v1, %v722_v36  ;;  %v740_v44 = vpop.permute.xlu2 %739  ;;  %v5375_v0 = vmov 0.0  }
  0xc3   : > { %v824_v58 = vsub.f32 %v5591_v11, %v740_v44  ;;  %v4883_v1 = vsel %vm5727_vm0, 1.0, %v5375_v0  ;;  %v4882_v2 = vsel %vm5732_vm1, 1.0, %v5375_v0  ;;  %v4881_v35 = vsel %vm5759_vm2, 1.0, %v5375_v0 }
  0xc4   : > { %877 = vrot.lane.b32.xlu2 %v813_v37, %s5374_s23  ;;  %881 = vrot.lane.b32.xlu1 %v815_v38, %s5374_s23 }
  0xc9   : > { %v720_v39 = vpop.permute.xlu0 %719  ;;  %v724_v40 = vpop.permute.xlu1 %723 }
  0xca   : > { %v814_v42 = vsub.f32 %v5555_v3, %v720_v39  ;;  %v816_v43 = vsub.f32 %v5558_v4, %v724_v40  ;;  %v5715_v51 = vpop.permute.xlu2 %745  ;;  %v5746_v3 = vsub.f32 %v4883_v1, %v4883_v1  ;;  %v5748_v4 = vsub.f32 %v4882_v2, %v4882_v2 }
  0xcb   : > { %v827_v63 = vsub.f32 %v5606_v14, %v5715_v51  ;;  %v1045_v1 = vadd.s32 48, %v5717_v52 }
  0xcc   : > { %879 = vrot.lane.b32.xlu0 %v814_v42, %s5374_s23  ;;  %883 = vrot.lane.b32.xlu2 %v816_v43, %s5374_s23  ;;  %v1396_v11 = vand.u32 4294901760, %v5746_v3  ;;  %v1402_v14 = vand.u32 4294901760, %v5748_v4 }
  0xcd   : > { %887 = vrot.lane.b32.xlu1 %v818_v41, %s5374_s23  ;;  %v5798_v41 = vsub.f32 %v4881_v35, %v4881_v35  ;;  %vm5894_vm9 = vcmp.lt.s32.totalorder %v1045_v1, %v5719_v53 }
  0xce   : > { %v1397_v39 = vsub.f32 %v5746_v3, %v1396_v11  ;;  %v1403_v40 = vsub.f32 %v5748_v4, %v1402_v14 }
  0xcf   : > { %v8523_v55 = vand.u32 4294901760, %v5798_v41 }
  0xd0   : > { %v1398_v51 = vand.u32 4294901760, %v1397_v39 }
  0xd1   : > { %v732_v46 = vpop.permute.xlu1 %731  ;;  %v730_v48 = vpop.permute.xlu0 %729  ;;  %v1409_v5 = vsub.f32 %v5798_v41, %v8523_v55 }
  0xd2   : > { %v819_v49 = vsub.f32 %v5573_v7, %v730_v48  ;;  %v820_v54 = vsub.f32 %v5570_v6, %v732_v46  ;;  %v1051_v6 = vadd.s32 96, %v5717_v52  ;;  %v5774_v34 = vpop.permute.xlu2 %751  ;;  %v1047_v48 = vadd.s32 64, %v5717_v52  ;;  %1399 = vmatpush.msra.mxu1 %v1398_v51  ;;  %4957 = vmatpush.msra.mxu3 %v1398_v51 }
  0xd3   : > { %v1410_v35 = vand.u32 4294901760, %v1409_v5  ;;  %v4874_v5 = vsel %vm5894_vm9, 1.0, %v5375_v0 }
  0xd4   : > { %885 = vrot.lane.b32.xlu0 %v817_v45, %s5374_s23  ;;  %889 = vrot.lane.b32.xlu2 %v819_v49, %s5374_s23  ;;  %vm5764_vm3 = vcmp.lt.s32.totalorder %v1051_v6, %v5719_v53  ;;  %v4879_v45 = vsel %vm5783_vm4, 1.0, %v5375_v0  ;;  %v830_v49 = vsub.f32 %v5621_v17, %v5774_v34  ;;  %vm5840_vm7 = vcmp.lt.s32.totalorder %v1047_v48, %v5719_v53 }
  0xd5   : > { %893 = vrot.lane.b32.xlu1 %v821_v47, %s5374_s23  ;;  %v4880_v36 = vsel %vm5764_vm3, 1.0, %v5375_v0  ;;  %v1048_v47 = vadd.s32 72, %v5717_v52 }
  0xd6   : > { %v5800_v42 = vsub.f32 %v4880_v36, %v4880_v36 }
  0xd7   : > { %vm5835_vm6 = vcmp.lt.s32.totalorder %v1048_v47, %v5719_v53 }
  0xd8   : > { %v8522_v56 = vand.u32 4294901760, %v5800_v42 }
  0xd9   : > { %v738_v57 = vpop.permute.xlu1 %737  ;;  %v736_v59 = vpop.permute.xlu0 %735 }
  0xda   : > { %v822_v60 = vsub.f32 %v5588_v10, %v736_v59  ;;  %v823_v7 = vsub.f32 %v5585_v9, %v738_v57  ;;  %v1049_v10 = vadd.s32 80, %v5717_v52  ;;  %v5376_v9 = vmov 1.0  }
  0xdb   : > { %4884 = vmatpush.msk.msra.mxu0 %vm5727_vm0, %v5376_v9  ;;  %4941 = vmatpush.msk.msra.mxu2 %vm5727_vm0, %v5376_v9  ;;  %v5826_v57 = vsub.f32 %v4879_v45, %v4879_v45  ;;  %v1415_v6 = vsub.f32 %v5800_v42, %v8522_v56 }
  0xdc   : > { %891 = vrot.lane.b32.xlu0 %v820_v54, %s5374_s23  ;;  %895 = vrot.lane.b32.xlu2 %v822_v60, %s5374_s23  ;;  %vm5788_vm5 = vcmp.lt.s32.totalorder %v1049_v10, %v5719_v53  ;;  %v1404_v54 = vand.u32 4294901760, %v1403_v40  ;;  %v1046_v60 = vadd.s32 56, %v5717_v52 }
  0xdd   : > { %899 = vrot.lane.b32.xlu1 %v824_v58, %s5374_s23  ;;  %4885 = vmatpush.msk.msra.mxu0 %vm5732_vm1, %v5376_v9  ;;  %v4878_v46 = vsel %vm5788_vm5, 1.0, %v5375_v0  ;;  %v1416_v36 = vand.u32 4294901760, %v1415_v6  ;;  %v758_v6 = vpop.permute.xlu2 %757  ;;  %v8691_v61 = vand.u32 4294901760, %v5826_v57 }
  0xde   : > { %4942 = vmatpush.msk.msra.mxu2 %vm5732_vm1, %v5376_v9  ;;  %v5828_v58 = vsub.f32 %v4878_v46, %v4878_v46  ;;  %1405 = vmatpush.msra.mxu1 %v1404_v54  ;;  %vm5868_vm8 = vcmp.lt.s32.totalorder %v1046_v60, %v5719_v53 }
  0xdf   : > { %4886 = vmatpush.msk.msra.mxu0 %vm5759_vm2, %v5376_v9  ;;  %v4875_v45 = vsel %vm5868_vm8, 1.0, %v5375_v0  ;;  %4958 = vmatpush.msra.mxu3 %v1404_v54 }
  0xe0   : > { %4943 = vmatpush.msk.msra.mxu2 %vm5759_vm2, %v5376_v9  ;;  %v8517_v8 = vand.u32 4294901760, %v5828_v58  ;;  %1411 = vmatpush.msra.mxu1 %v1410_v35  ;;  %v5901_v60 = vsub.f32 %v4875_v45, %v4875_v45 }
  0xe1   : > { %v5805_v43 = vpop.permute.xlu1 %743  ;;  %v742_v44 = vpop.permute.xlu0 %741  ;;  %4887 = vmatpush.msk.msra.mxu0 %vm5764_vm3, %v5376_v9  ;;  %4959 = vmatpush.msra.mxu3 %v1410_v35 }
  0xe2   : > { %v825_v50 = vsub.f32 %v5603_v13, %v742_v44  ;;  %v826_v2 = vsub.f32 %v5600_v12, %v5805_v43  ;;  %v4877_v12 = vsel %vm5835_vm6, 1.0, %v5375_v0  ;;  %4944 = vmatpush.msk.msra.mxu2 %vm5764_vm3, %v5376_v9  ;;  %v5883_v43 = vsub.f32 %v5828_v58, %v8517_v8  ;;  %1417 = vmatpush.msra.mxu1 %v1416_v36 }
  0xe3   : > { %v5875_v40 = vsub.f32 %v4877_v12, %v4877_v12  ;;  %4888 = vmatpush.msk.msra.mxu0 %vm5783_vm4, %v5376_v9  ;;  %4960 = vmatpush.msra.mxu3 %v1416_v36  ;;  %v833_v36 = vsub.f32 %v5636_v20, %v758_v6 }
  0xe4   : > { %897 = vrot.lane.b32.xlu0 %v823_v7, %s5374_s23  ;;  %901 = vrot.lane.b32.xlu2 %v825_v50, %s5374_s23  ;;  %v8518_v7 = vand.u32 4294901760, %v5826_v57  ;;  %v1428_v12 = vand.u32 4294901760, %v5883_v43  ;;  %v1044_v43 = vadd.s32 40, %v5717_v52 }
  0xe5   : > { %905 = vrot.lane.b32.xlu1 %v827_v63, %s5374_s23  ;;  %v4876_v63 = vsel %vm5840_vm7, 1.0, %v5375_v0  ;;  %v8513_v51 = vand.u32 4294901760, %v5875_v40  ;;  %4889 = vmatpush.msk.msra.mxu0 %vm5788_vm5, %v5376_v9  ;;  %v764_v6 = vpop.permute.xlu2 %763 }
  0xe6   : > { %v1421_v39 = vsub.f32 %v5826_v57, %v8518_v7  ;;  %v5885_v44 = vsub.f32 %v4876_v63, %v4876_v63  ;;  %4945 = vmatpush.msk.msra.mxu2 %vm5783_vm4, %v5376_v9  ;;  %vm5948_vm10 = vcmp.lt.s32.totalorder %v1044_v43, %v5719_v53 }
  0xe7   : > { %v5918_v54 = vsub.f32 %v5875_v40, %v8513_v51  ;;  %4890 = vmatpush.msk.msra.mxu0 %vm5835_vm6, %v5376_v9  ;;  %v1042_v51 = vadd.s32 24, %v5717_v52 }
  0xe8   : > { %v1422_v50 = vand.u32 4294901760, %v1421_v39  ;;  %v8514_v63 = vand.u32 4294901760, %v5885_v44  ;;  %v5921_v39 = vsub.f32 %v4874_v5, %v4874_v5  ;;  %4946 = vmatpush.msk.msra.mxu2 %vm5788_vm5, %v5376_v9 }
  0xe9   : > { %v5898_v47 = vpop.permute.xlu1 %749  ;;  %v748_v48 = vpop.permute.xlu0 %747  ;;  %4891 = vmatpush.msk.msra.mxu0 %vm5840_vm7, %v5376_v9  ;;  %vm5961_vm12 = vcmp.lt.s32.totalorder %v1042_v51, %v5719_v53 }
  0xea   : > { %v828_v1 = vsub.f32 %v5618_v16, %v748_v48  ;;  %v8516_v16 = vand.u32 4294901760, %v5901_v60  ;;  %v5928_v45 = vsub.f32 %v5885_v44, %v8514_v63  ;;  %v1043_v48 = vadd.s32 32, %v5717_v52  ;;  %1423 = vmatpush.msra.mxu1 %v1422_v50  ;;  %4961 = vmatpush.msra.mxu3 %v1422_v50 }
  0xeb   : > { %v8515_v5 = vand.u32 4294901760, %v5921_v39  ;;  %v829_v51 = vsub.f32 %v5615_v15, %v5898_v47  ;;  %4892 = vmatpush.msk.msra.mxu0 %vm5868_vm8, %v5376_v9  ;;  %4947 = vmatpush.msk.msra.mxu2 %vm5835_vm6, %v5376_v9 }
  0xec   : > { %903 = vrot.lane.b32.xlu0 %v826_v2, %s5374_s23  ;;  %v1434_v2 = vand.u32 4294901760, %v5918_v54  ;;  %v5943_v35 = vsub.f32 %v5901_v60, %v8516_v16  ;;  %907 = vrot.lane.b32.xlu2 %v828_v1, %s5374_s23  ;;  %vm5956_vm11 = vcmp.lt.s32.totalorder %v1043_v48, %v5719_v53  ;;  %v4873_v54 = vsel %vm5948_vm10, 1.0, %v5375_v0 }
  0xed   : > { %911 = vrot.lane.b32.xlu1 %v830_v49, %s5374_s23  ;;  %1429 = vmatpush.msra.mxu1 %v1428_v12  ;;  %v1440_v49 = vand.u32 4294901760, %v5928_v45  ;;  %v5969_v1 = vsub.f32 %v5921_v39, %v8515_v5  ;;  %v4872_v43 = vsel %vm5956_vm11, 1.0, %v5375_v0  ;;  %v5979_v48 = vsub.f32 %v4873_v54, %v4873_v54  ;;  %v770_v55 = vpop.permute.xlu2 %769 }
  0xee   : > { %v5981_v45 = vsub.f32 %v4872_v43, %v4872_v43  ;;  %v4871_v5 = vsel %vm5961_vm12, 1.0, %v5375_v0  ;;  %v1446_v47 = vand.u32 4294901760, %v5943_v35  ;;  %4893 = vmatpush.msk.msra.mxu0 %vm5894_vm9, %v5376_v9  ;;  %4962 = vmatpush.msra.mxu3 %v1428_v12 }
  0xef   : > { %1435 = vmatpush.msra.mxu1 %v1434_v2  ;;  %v5994_v54 = vsub.f32 %v4871_v5, %v4871_v5  ;;  %v8521_v8 = vand.u32 4294901760, %v5979_v48  ;;  %v1452_v20 = vand.u32 4294901760, %v5969_v1  ;;  %v6027_v1 = vld [vmem:[%s5526_s20] sm:$0xff]  ;;  %4948 = vmatpush.msk.msra.mxu2 %vm5840_vm7, %v5376_v9  ;;  %v8698_v10 = vand.u32 4294901760, %v5979_v48 }
  0xf0   : > { %v8519_v7 = vand.u32 4294901760, %v5981_v45  ;;  %4894 = vmatpush.msk.msra.mxu0 %vm5948_vm10, %v5376_v9  ;;  %4963 = vmatpush.msra.mxu3 %v1434_v2  ;;  %v8699_v46 = vand.u32 4294901760, %v5981_v45 }
  0xf1   : > { %v756_v16 = vpop.permute.xlu1 %755  ;;  %v754_v15 = vpop.permute.xlu0 %753  ;;  %1441 = vmatpush.msra.mxu1 %v1440_v49  ;;  %v8520_v50 = vand.u32 4294901760, %v5994_v54  ;;  %v1457_v35 = vsub.f32 %v5979_v48, %v8521_v8  ;;  %4949 = vmatpush.msk.msra.mxu2 %vm5868_vm8, %v5376_v9 }
  0xf2   : > { %v831_v43 = vsub.f32 %v5633_v19, %v754_v15  ;;  %v1041_v19 = vadd.s32 16, %v5717_v52  ;;  %v6015_v5 = vsub.f32 %v5981_v45, %v8519_v7  ;;  %v1040_v7 = vadd.s32 8, %v5717_v52  ;;  %4895 = vmatpush.msk.msra.mxu0 %vm5956_vm11, %v5376_v9  ;;  %4964 = vmatpush.msra.mxu3 %v1440_v49 }
  0xf3   : > { %1447 = vmatpush.msra.mxu1 %v1446_v47  ;;  %v6024_v12 = vsub.f32 %v5994_v54, %v8520_v50  ;;  %v1458_v15 = vand.u32 4294901760, %v1457_v35  ;;  %v832_v8 = vsub.f32 %v5630_v18, %v756_v16  ;;  %v365_v35 = vand.u32 2147483647, %v6027_v1  ;;  %4950 = vmatpush.msk.msra.mxu2 %vm5894_vm9, %v5376_v9 }
  0xf4   : > { %909 = vrot.lane.b32.xlu0 %v829_v51, %s5374_s23  ;;  %vm6030_vm13 = vcmp.lt.s32.totalorder %v1041_v19, %v5719_v53  ;;  %913 = vrot.lane.b32.xlu2 %v831_v43, %s5374_s23  ;;  %v1464_v50 = vand.u32 4294901760, %v6015_v5  ;;  %v836_v43 = vsub.f32 %v5651_v23, %v764_v6  ;;  %vm6049_vm14 = vcmp.lt.s32.totalorder %v1040_v7, %v5719_v53 }
  0xf5   : > { %917 = vrot.lane.b32.xlu1 %v833_v36, %s5374_s23  ;;  %v4870_v36 = vsel %vm6030_vm13, 1.0, %v5375_v0  ;;  %1453 = vmatpush.msra.mxu1 %v1452_v20  ;;  %v1470_v23 = vand.u32 4294901760, %v6024_v12  ;;  %v4869_v7 = vsel %vm6049_vm14, 1.0, %v5375_v0  ;;  %v4868_v12 = vsel %vm6066_vm15, 1.0, %v5375_v0 }
  0xf6   : > { %v6043_v19 = vsub.f32 %v4870_v36, %v4870_v36  ;;  %4896 = vmatpush.msk.msra.mxu0 %vm5961_vm12, %v5376_v9  ;;  %v6071_v36 = vsub.f32 %v4869_v7, %v4869_v7  ;;  %4965 = vmatpush.msra.mxu3 %v1446_v47  ;;  %v397_v49 = vsub.f32 0.0, %v365_v35 }
  0xf7   : > { %1459 = vmatpush.msra.mxu1 %v1458_v15  ;;  %4951 = vmatpush.msk.msra.mxu2 %vm5948_vm10, %v5376_v9 }
  0xf8   : > { %v1474_v16 = vand.u32 4294901760, %v6043_v19  ;;  %4897 = vmatpush.msk.msra.mxu0 %vm6030_vm13, %v5376_v9  ;;  %v8524_v0 = vand.u32 4294901760, %v6071_v36  ;;  %4966 = vmatpush.msra.mxu3 %v1452_v20 }
  0xf9   : > { %v762_v2 = vpop.permute.xlu1 %761  ;;  %v760_v18 = vpop.permute.xlu0 %759  ;;  %1465 = vmatpush.msra.mxu1 %v1464_v50  ;;  %4952 = vmatpush.msk.msra.mxu2 %vm5956_vm11, %v5376_v9 }
  0xfa   : > { %v834_v5 = vsub.f32 %v5648_v22, %v760_v18  ;;  %v1475_v52 = vsub.f32 %v6043_v19, %v1474_v16  ;;  %v6085_v22 = vsub.f32 %v4868_v12, %v4868_v12  ;;  %4898 = vmatpush.msk.msra.mxu0 %vm6049_vm14, %v5376_v9  ;;  %v835_v35 = vsub.f32 %v5645_v21, %v762_v2 }
  0xfb   : > { %1471 = vmatpush.msra.mxu1 %v1470_v23  ;;  %4967 = vmatpush.msra.mxu3 %v1458_v15 }
  0xfc   : > { %915 = vrot.lane.b32.xlu0 %v832_v8, %s5374_s23  ;;  %v1476_v18 = vand.u32 4294901760, %v1475_v52  ;;  %v1486_v7 = vand.u32 4294901760, %v6085_v22  ;;  %919 = vrot.lane.b32.xlu2 %v834_v5, %s5374_s23  ;;  %v1481_v8 = vsub.f32 %v6071_v36, %v8524_v0  ;;  %v839_v5 = vsub.f32 %v5666_v26, %v770_v55 }
  0xfd   : > { %923 = vrot.lane.b32.xlu1 %v836_v43, %s5374_s23  ;;  %4899 = vmatpush.msk.msra.mxu0 %vm6066_vm15, %v5376_v9  ;;  %v429_v43 = vmul.f32 20.0, %v397_v49  ;;  %v6178_v49 = vld [vmem:[%s5526_s20 + $0x10] sm:$0xff] }
  0xfe   : > { %1477 = vmatpush.msra.mxu1 %v1476_v18  ;;  %v1487_v47 = vsub.f32 %v6085_v22, %v1486_v7  ;;  %v1482_v12 = vand.u32 4294901760, %v1481_v8  ;;  %4968 = vmatpush.msra.mxu3 %v1464_v50 }
  0xff   : > { %2056 = vmatpush.msrb.mxu0 %v1396_v11  ;;  %v461_v2 = vmul.f32 1.442695, %v429_v43  ;;  %4953 = vmatpush.msk.msra.mxu2 %vm5961_vm12, %v5376_v9  ;;  %v8689_v11 = vand.u32 4294901760, %v5798_v41 }
 0x100   : > { %v1488_v52 = vand.u32 4294901760, %v1487_v47  ;;  %1483 = vmatpush.msra.mxu1 %v1482_v12  ;;  %4969 = vmatpush.msra.mxu3 %v1470_v23 }
 0x101   : > { %v766_v0 = vpop.permute.xlu0 %765  ;;  %v768_v21 = vpop.permute.xlu1 %767  ;;  %2060 = vmatpush.msrb.mxu0 %v1402_v14  ;;  %5045 = vpow2.f32 %v461_v2  ;;  %4954 = vmatpush.msk.msra.mxu2 %vm6030_vm13, %v5376_v9 }
 0x102   : > { %v837_v20 = vsub.f32 %v5663_v25, %v766_v0  ;;  %1489 = vmatpush.msra.mxu1 %v1488_v52  ;;  %4970 = vmatpush.msra.mxu3 %v1476_v18  ;;  %v776_v25 = vpop.permute.xlu2 %775  ;;  %v838_v26 = vsub.f32 %v5660_v24, %v768_v21  ;;  %v8690_v24 = vand.u32 4294901760, %v5800_v42  ;;  %v8695_v0 = vand.u32 4294901760, %v5901_v60 }
 0x103   : > { %2064 = vmatpush.msrb.mxu0 %v8689_v11  ;;  %v842_v14 = vsub.f32 %v5681_v29, %v776_v25  ;;  %4955 = vmatpush.msk.msra.mxu2 %vm6049_vm14, %v5376_v9 }
 0x104   : > { %921 = vrot.lane.b32.xlu0 %v835_v35, %s5374_s23  ;;  %925 = vrot.lane.b32.xlu2 %v837_v20, %s5374_s23 }
 0x105   : > { %929 = vrot.lane.b32.xlu1 %v839_v5, %s5374_s23  ;;  %4916 = vmatpush.msk.msrb.mxu1 %vm5727_vm0, %v5376_v9  ;;  %v6261_v5 = vld [vmem:[%s5526_s20 + $0x20] sm:$0xff] }
 0x106   : > { %4971 = vmatpush.msra.mxu3 %v1482_v12  ;;  %2068 = vmatpush.msrb.mxu0 %v8690_v24  ;;  %v369_v63 = vand.u32 2147483647, %v6261_v5  ;;  %v6327_v24 = vld [vmem:[%s5526_s20 + $0x38] sm:$0xff] }
 0x107   : > { %4917 = vmatpush.msk.msrb.mxu1 %vm5732_vm1, %v5376_v9  ;;  %4956 = vmatpush.msk.msra.mxu2 %vm6066_vm15, %v5376_v9  ;;  %v372_v6 = vand.u32 2147483647, %v6327_v24 }
 0x108   : > { %4972 = vmatpush.msra.mxu3 %v1488_v52  ;;  %2072 = vmatpush.msrb.mxu0 %v8691_v61  ;;  %v401_v34 = vsub.f32 0.0, %v369_v63 }
 0x109   : > { %v772_v55 = vpop.permute.xlu0 %771  ;;  %4918 = vmatpush.msk.msrb.mxu1 %vm5759_vm2, %v5376_v9  ;;  %v774_v29 = vpop.permute.xlu1 %773  ;;  %1621 = vmatpush.msrb.mxu2 %v5746_v3 }
 0x10a   : > { %v840_v50 = vsub.f32 %v5678_v28, %v772_v55  ;;  %4900 = vmatpush.msk.msrb.mxu3 %vm5727_vm0, %v5376_v9  ;;  %v5046_v28 = vpop.eup %5045  ;;  %v841_v15 = vsub.f32 %v5675_v27, %v774_v29  ;;  %v8692_v27 = vand.u32 4294901760, %v5828_v58  ;;  %vm525_vm0 = vcmp.ge.f32.partialorder %v6027_v1, 0.0 }
 0x10b   : > { %4919 = vmatpush.msk.msrb.mxu1 %vm5764_vm3, %v5376_v9  ;;  %v557_v23 = vmul.f32 0.5, %v5046_v28  ;;  %1624 = vmatpush.msrb.mxu2 %v5748_v4 }
 0x10c   : > { %927 = vrot.lane.b32.xlu0 %v838_v26, %s5374_s23  ;;  %931 = vrot.lane.b32.xlu2 %v840_v50, %s5374_s23  ;;  %v433_v26 = vmul.f32 20.0, %v401_v34 }
 0x10d   : > { %935 = vrot.lane.b32.xlu1 %v842_v14, %s5374_s23  ;;  %4901 = vmatpush.msk.msrb.mxu3 %vm5732_vm1, %v5376_v9  ;;  %v589_v4 = vsub.f32 1.0, %v557_v23  ;;  %vm973_vm1 = vcmask 1039360   ;;  %v6324_v14 = vld [vmem:[%s5526_s20 + $0x30] sm:$0xff] }
 0x10e   : > { %4920 = vmatpush.msk.msrb.mxu1 %vm5783_vm4, %v5376_v9  ;;  %2076 = vmatpush.msrb.mxu0 %v8692_v27  ;;  %v469_v55 = vmul.f32 1.442695, %v433_v26 }
 0x10f   : > { %4902 = vmatpush.msk.msrb.mxu3 %vm5759_vm2, %v5376_v9  ;;  %1627 = vmatpush.msrb.mxu2 %v5798_v41  ;;  %v366_v41 = vand.u32 2147483647, %v6189_v32  ;;  %v621_v1 = vsel %vm525_vm0, %v557_v23, %v589_v4  ;;  %vm527_vm2 = vcmp.ge.f32.partialorder %v6178_v49, 0.0  ;;  %v404_v4 = vsub.f32 0.0, %v372_v6 }
 0x110   : > { %4921 = vmatpush.msk.msrb.mxu1 %vm5788_vm5, %v5376_v9 }
 0x111   : > { %v778_v3 = vpop.permute.xlu0 %777  ;;  %4903 = vmatpush.msk.msrb.mxu3 %vm5764_vm3, %v5376_v9  ;;  %1630 = vmatpush.msrb.mxu2 %v5800_v42  ;;  %v780_v33 = vpop.permute.xlu1 %779  ;;  %v8693_v42 = vand.u32 4294901760, %v5875_v40  ;;  %v398_v13 = vsub.f32 0.0, %v366_v41  ;;  %vm526_vm3 = vcmp.ge.f32.partialorder %v6189_v32, 0.0 }
 0x112   : > { %v843_v62 = vsub.f32 %v5693_v31, %v778_v3  ;;  %v367_v31 = vand.u32 2147483647, %v6178_v49  ;;  %4922 = vmatpush.msk.msrb.mxu1 %vm5835_vm6, %v5376_v9  ;;  %v844_v37 = vsub.f32 %v5690_v30, %v780_v33  ;;  %v8694_v30 = vand.u32 4294901760, %v5885_v44 }
 0x113   : > { %4904 = vmatpush.msk.msrb.mxu3 %vm5783_vm4, %v5376_v9  ;;  %1633 = vmatpush.msrb.mxu2 %v5826_v57  ;;  %v6222_v57 = vld [vmem:[%s5526_s20 + $0x18] sm:$0xff]  ;;  %v430_v35 = vmul.f32 20.0, %v398_v13 }
 0x114   : > { %933 = vrot.lane.b32.xlu0 %v841_v15, %s5374_s23  ;;  %937 = vrot.lane.b32.xlu2 %v843_v62, %s5374_s23  ;;  %v399_v38 = vsub.f32 0.0, %v367_v31  ;;  %vm528_vm4 = vcmp.ge.f32.partialorder %v6222_v57, 0.0 }
 0x115   : > { %4905 = vmatpush.msk.msrb.mxu3 %vm5788_vm5, %v5376_v9  ;;  %4923 = vmatpush.msk.msrb.mxu1 %vm5840_vm7, %v5376_v9  ;;  %v463_v52 = vmul.f32 1.442695, %v430_v35  ;;  %vm529_vm5 = vcmp.ge.f32.partialorder %v6261_v5, 0.0 }
 0x116   : > { %2080 = vmatpush.msrb.mxu0 %v8693_v42  ;;  %1636 = vmatpush.msrb.mxu2 %v5828_v58  ;;  %v653_v58 = vmul.f32 10.0, %v621_v1  ;;  %v431_v59 = vmul.f32 20.0, %v399_v38  ;;  %v436_v38 = vmul.f32 20.0, %v404_v4 }
 0x117   : > { %4906 = vmatpush.msk.msrb.mxu3 %vm5835_vm6, %v5376_v9  ;;  %4924 = vmatpush.msk.msrb.mxu1 %vm5868_vm8, %v5376_v9 }
 0x118   : > { %2084 = vmatpush.msrb.mxu0 %v8694_v30  ;;  %1639 = vmatpush.msrb.mxu2 %v5875_v40  ;;  %v368_v40 = vand.u32 2147483647, %v6222_v57  ;;  %v465_v12 = vmul.f32 1.442695, %v431_v59  ;;  %v475_v35 = vmul.f32 1.442695, %v436_v38 }
 0x119   : > { %4907 = vmatpush.msk.msrb.mxu3 %vm5840_vm7, %v5376_v9  ;;  %4925 = vmatpush.msk.msrb.mxu1 %vm5894_vm9, %v5376_v9  ;;  %vm531_vm7 = vcmp.ge.f32.partialorder %v6324_v14, 0.0 }
 0x11a   : > { %1642 = vmatpush.msrb.mxu2 %v5885_v44  ;;  %2088 = vmatpush.msrb.mxu0 %v8695_v0  ;;  %v8696_v44 = vand.u32 4294901760, %v5921_v39  ;;  %v400_v43 = vsub.f32 0.0, %v368_v40  ;;  %5047 = vpow2.f32 %v465_v12  ;;  %v6352_v12 = vld [vmem:[%s5526_s20 + $0x50] sm:$0xff] }
 0x11b   : > { %4926 = vmatpush.msk.msrb.mxu1 %vm5948_vm10, %v5376_v9  ;;  %4908 = vmatpush.msk.msrb.mxu3 %vm5868_vm8, %v5376_v9  ;;  %5049 = vpow2.f32 %v463_v52  ;;  %vm532_vm8 = vcmp.ge.f32.partialorder %v6327_v24, 0.0 }
 0x11c   : > { %939 = vrot.lane.b32.xlu0 %v844_v37, %s5374_s23  ;;  %1645 = vmatpush.msrb.mxu2 %v5901_v60  ;;  %v432_v21 = vmul.f32 20.0, %v400_v43 }
 0x11d   : > { %2092 = vmatpush.msrb.mxu0 %v8696_v44  ;;  %4927 = vmatpush.msk.msrb.mxu1 %vm5956_vm11, %v5376_v9 }
 0x11e   : > { %v878_v18 = vpop.permute.xlu2 %877  ;;  %4909 = vmatpush.msk.msrb.mxu3 %vm5894_vm9, %v5376_v9  ;;  %1648 = vmatpush.msrb.mxu2 %v5921_v39  ;;  %v467_v2 = vmul.f32 1.442695, %v432_v21 }
 0x11f   : > { %v974_v8 = vsel %vm973_vm1, %v878_v18, 1e+10  ;;  %2096 = vmatpush.msrb.mxu0 %v8698_v10  ;;  %4928 = vmatpush.msk.msrb.mxu1 %vm5961_vm12, %v5376_v9 }
 0x120   : > { %v6246_v47 = vmul.f32 %v974_v8, %v653_v58  ;;  %4910 = vmatpush.msk.msrb.mxu3 %vm5948_vm10, %v5376_v9  ;;  %1651 = vmatpush.msrb.mxu2 %v5979_v48  ;;  %v8700_v48 = vand.u32 4294901760, %v5994_v54  ;;  %5051 = vpow2.f32 %v467_v2  ;;  %v6340_v58 = vld [vmem:[%s5526_s20 + $0x80] sm:$0xff] }
 0x121   : > { %2100 = vmatpush.msrb.mxu0 %v8699_v46  ;;  %4929 = vmatpush.msk.msrb.mxu1 %vm6030_vm13, %v5376_v9  ;;  %5053 = vpow2.f32 %v469_v55  ;;  %v381_v46 = vand.u32 2147483647, %v6340_v58  ;;  %vm541_vm10 = vcmp.ge.f32.partialorder %v6340_v58, 0.0 }
 0x122   : > { %8697 = vst [vmem:[#allocation18_spill] sm:$0xff] %v6246_v47  ;;  %v6258_v60 = vand.u32 4294901760, %v6246_v47  ;;  %4911 = vmatpush.msk.msrb.mxu3 %vm5956_vm11, %v5376_v9  ;;  %1654 = vmatpush.msrb.mxu2 %v5981_v45  ;;  %v6304_v45 = vld [vmem:[%s5526_s20 + $0x28] sm:$0xff] }
 0x123   : > { %2104 = vmatpush.msrb.mxu0 %v8700_v48  ;;  %4930 = vmatpush.msk.msrb.mxu1 %vm6049_vm14, %v5376_v9  ;;  %v370_v51 = vand.u32 2147483647, %v6304_v45  ;;  %vm530_vm6 = vcmp.ge.f32.partialorder %v6304_v45, 0.0 }
 0x124   : > { %1491 = vmatmul.f32.vlgmr.msra.gmra.mxu1 %v6258_v60  ;;  %v6275_v39 = vsub.f32 %v6246_v47, %v6258_v60  ;;  %4912 = vmatpush.msk.msrb.mxu3 %vm5961_vm12, %v5376_v9 }
 0x125   : > { %2108 = vmatpush.msrb.mxu0 %v1474_v16  ;;  %1657 = vmatpush.msrb.mxu2 %v5994_v54  ;;  %v8701_v16 = vand.u32 4294901760, %v6071_v36  ;;  %v5048_v54 = vpop.eup %5047  ;;  %v402_v11 = vsub.f32 0.0, %v370_v51  ;;  %v413_v51 = vsub.f32 0.0, %v381_v46 }
 0x126   : > { %v8529_v20 = vand.u32 4294901760, %v6275_v39  ;;  %4913 = vmatpush.msk.msrb.mxu3 %vm6030_vm13, %v5376_v9  ;;  %4931 = vmatpush.msk.msrb.mxu1 %vm6066_vm15, %v5376_v9  ;;  %v559_v56 = vmul.f32 0.5, %v5048_v54  ;;  %v884_v27 = vpop.permute.xlu2 %883  ;;  %v6370_v54 = vld [vmem:[%s5526_s20 + $0x48] sm:$0xff]  ;;  %vm535_vm13 = vcmp.ge.f32.partialorder %v6352_v12, 0.0 }
 0x127   : > { %2112 = vmatpush.msrb.mxu0 %v8701_v16  ;;  %1660 = vmatpush.msrb.mxu2 %v6043_v19  ;;  %v5050_v19 = vpop.eup %5049  ;;  %v977_v34 = vsel %vm973_vm1, %v884_v27, 1e+10  ;;  %v375_v16 = vand.u32 2147483647, %v6352_v12  ;;  %vm534_vm12 = vcmp.ge.f32.partialorder %v6370_v54, 0.0 }
 0x128   : > { %v1140_v17 = vsub.f32 %v6275_v39, %v8529_v20  ;;  %4914 = vmatpush.msk.msrb.mxu3 %vm6049_vm14, %v5376_v9  ;;  %v591_v50 = vsub.f32 1.0, %v559_v56  ;;  %v5052_v29 = vpop.eup %5051 }
 0x129   : > { %2116 = vmatpush.msrb.mxu0 %v1486_v7  ;;  %1663 = vmatpush.msrb.mxu2 %v6071_v36  ;;  %v558_v7 = vmul.f32 0.5, %v5050_v19  ;;  %v371_v36 = vand.u32 2147483647, %v6324_v14  ;;  %v560_v15 = vmul.f32 0.5, %v5052_v29  ;;  %v5054_v37 = vpop.eup %5053 }
 0x12a   : > { %v1141_v25 = vand.u32 4294901760, %v1140_v17  ;;  %4915 = vmatpush.msk.msrb.mxu3 %vm6066_vm15, %v5376_v9  ;;  %v434_v9 = vmul.f32 20.0, %v402_v11  ;;  %v623_v23 = vsel %vm527_vm2, %v559_v56, %v591_v50  ;;  %v561_v18 = vmul.f32 0.5, %v5054_v37  ;;  %v6397_v37 = vld [vmem:[%s5526_s20 + $0x88] sm:$0xff] }
 0x12b   : > { %1666 = vmatpush.msrb.mxu2 %v6085_v22  ;;  %v590_v28 = vsub.f32 1.0, %v558_v7  ;;  %v6333_v22 = vld [vmem:[%s5526_s20 + $0x40] sm:$0xff]  ;;  %v403_v3 = vsub.f32 0.0, %v371_v36  ;;  %v655_v33 = vmul.f32 10.0, %v623_v23  ;;  %v592_v41 = vsub.f32 1.0, %v560_v15 }
 0x12c   : > { %1142 = vmatmul.f32.vlgmr.msra.gmra.mxu0 %v1141_v25  ;;  %v471_v62 = vmul.f32 1.442695, %v434_v9  ;;  %v373_v31 = vand.u32 2147483647, %v6333_v22  ;;  %v593_v17 = vsub.f32 1.0, %v561_v18  ;;  %v407_v50 = vsub.f32 0.0, %v375_v16 }
 0x12d   : > { %v622_v49 = vsel %vm526_vm3, %v558_v7, %v590_v28  ;;  %v435_v1 = vmul.f32 20.0, %v403_v3  ;;  %v624_v40 = vsel %vm528_vm4, %v560_v15, %v592_v41  ;;  %v374_v36 = vand.u32 2147483647, %v6370_v54  ;;  %v6417_v16 = vld [vmem:[%s5526_s20 + $0x90] sm:$0xff] }
 0x12e   : > { %v654_v32 = vmul.f32 10.0, %v622_v49  ;;  %5055 = vpow2.f32 %v471_v62  ;;  %v405_v30 = vsub.f32 0.0, %v373_v31  ;;  %v6349_v10 = vpop.permute.xlu2 %889  ;;  %v656_v63 = vmul.f32 10.0, %v624_v40 }
 0x12f   : > { %v473_v57 = vmul.f32 1.442695, %v435_v1  ;;  %v625_v5 = vsel %vm529_vm5, %v561_v18, %v593_v17  ;;  %v445_v9 = vmul.f32 20.0, %v413_v51  ;;  %v439_v49 = vmul.f32 20.0, %v407_v50 }
 0x130   : > { %v437_v43 = vmul.f32 20.0, %v405_v30  ;;  %v6372_v19 = vmul.f32 %v977_v34, %v656_v63  ;;  %v657_v28 = vmul.f32 10.0, %v625_v5  ;;  %v6424_v5 = vld [vmem:[%s5526_s20 + $0x68] sm:$0xff]  ;;  %vm533_vm9 = vcmp.ge.f32.partialorder %v6333_v22, 0.0 }
 0x131   : > { %5057 = vpow2.f32 %v473_v57  ;;  %v493_v1 = vmul.f32 1.442695, %v445_v9  ;;  %v481_v57 = vmul.f32 1.442695, %v439_v49  ;;  %vm542_vm11 = vcmp.ge.f32.partialorder %v6397_v37, 0.0 }
 0x132   : > { %5059 = vpow2.f32 %v475_v35  ;;  %v477_v25 = vmul.f32 1.442695, %v437_v43  ;;  %8704 = vst [vmem:[#allocation21_spill] sm:$0xff] %v6372_v19  ;;  %v6389_v3 = vand.u32 4294901760, %v6372_v19  ;;  %vm543_vm14 = vcmp.ge.f32.partialorder %v6417_v16, 0.0 }
 0x133   : > { %vm538_vm4 = vcmp.ge.f32.partialorder %v6424_v5, 0.0 }
 0x134   : > { %v5056_v52 = vpop.eup %5055  ;;  %5061 = vpow2.f32 %v477_v25  ;;  %v6410_v40 = vsub.f32 %v6372_v19, %v6389_v3 }
 0x135   : > { %v562_v26 = vmul.f32 0.5, %v5056_v52  ;;  %5063 = vpow2.f32 %v493_v1 }
 0x136   : > { %v882_v61 = vpop.permute.xlu1 %881  ;;  %v6393_v4 = vpop.permute.xlu2 %895  ;;  %5065 = vpow2.f32 %v481_v57  ;;  %v980_v57 = vsel %vm973_vm1, %v6349_v10, 1e+10  ;;  %v6469_v10 = vld [vmem:[%s5526_s20 + $0x98] sm:$0xff] }
 0x137   : > { %v976_v42 = vsel %vm973_vm1, %v882_v61, 1e+10  ;;  %v5058_v6 = vpop.eup %5057  ;;  %v594_v15 = vsub.f32 1.0, %v562_v26  ;;  %v6386_v61 = vld [vmem:[%s5526_s20 + $0x58] sm:$0xff]  ;;  %vm544_vm15 = vcmp.ge.f32.partialorder %v6469_v10, 0.0 }
 0x138   : > { %v6342_v13 = vmul.f32 %v976_v42, %v655_v33  ;;  %v5060_v23 = vpop.eup %5059  ;;  %v406_v33 = vsub.f32 0.0, %v374_v36  ;;  %v563_v41 = vmul.f32 0.5, %v5058_v6  ;;  %v376_v42 = vand.u32 2147483647, %v6386_v61 }
 0x139   : > { %v564_v45 = vmul.f32 0.5, %v5060_v23  ;;  %vm536_vm0 = vcmp.ge.f32.partialorder %v6386_v61, 0.0 }
 0x13a   : > { %8702 = vst [vmem:[#allocation19_spill] sm:$0xff] %v6342_v13  ;;  %v6356_v48 = vand.u32 4294901760, %v6342_v13  ;;  %v5062_v38 = vpop.eup %5061  ;;  %v438_v35 = vmul.f32 20.0, %v406_v33  ;;  %v595_v46 = vsub.f32 1.0, %v563_v41  ;;  %v408_v52 = vsub.f32 0.0, %v376_v42 }
 0x13b   : > { %v565_v17 = vmul.f32 0.5, %v5062_v38  ;;  %v596_v51 = vsub.f32 1.0, %v564_v45 }
 0x13c   : > { %v6377_v7 = vsub.f32 %v6342_v13, %v6356_v48  ;;  %v479_v36 = vmul.f32 1.442695, %v438_v35  ;;  %v440_v9 = vmul.f32 20.0, %v408_v52 }
 0x13d   : > { %v597_v23 = vsub.f32 1.0, %v565_v17 }
 0x13e   : > { %v880_v0 = vpop.permute.xlu0 %879  ;;  %v8527_v62 = vand.u32 4294901760, %v6377_v7  ;;  %v6430_v6 = vpop.permute.xlu2 %901  ;;  %5067 = vpow2.f32 %v479_v36  ;;  %v483_v35 = vmul.f32 1.442695, %v440_v9 }
 0x13f   : > { %v975_v59 = vsel %vm973_vm1, %v880_v0, 1e+10  ;;  %v6345_v8 = vpop.permute.xlu1 %887  ;;  %v629_v52 = vsel %vm533_vm9, %v565_v17, %v597_v23 }
 0x140   : > { %v6347_v44 = vmul.f32 %v975_v59, %v654_v32  ;;  %v626_v32 = vsel %vm530_vm6, %v562_v26, %v594_v15  ;;  %v1156_v18 = vsub.f32 %v6377_v7, %v8527_v62  ;;  %v382_v59 = vand.u32 2147483647, %v6397_v37 }
 0x141   : > { %v658_v63 = vmul.f32 10.0, %v626_v32  ;;  %v979_v50 = vsel %vm973_vm1, %v6345_v8, 1e+10  ;;  %v383_v15 = vand.u32 2147483647, %v6417_v16  ;;  %v6473_v9 = vmul.f32 10.0, %v629_v52 }
 0x142   : > { %8703 = vst [vmem:[#allocation20_spill] sm:$0xff] %v6347_v44  ;;  %v6359_v21 = vand.u32 4294901760, %v6347_v44  ;;  %v414_v34 = vsub.f32 0.0, %v382_v59  ;;  %v1157_v26 = vand.u32 4294901760, %v1156_v18  ;;  %v378_v8 = vand.u32 2147483647, %v6424_v5 }
 0x143   : > { %v6438_v49 = vmul.f32 %v979_v50, %v658_v63  ;;  %v415_v1 = vsub.f32 0.0, %v383_v15  ;;  %v628_v59 = vsel %vm532_vm8, %v564_v45, %v596_v51  ;;  %v6459_v63 = vld [vmem:[%s5526_s20 + $0x70] sm:$0xff]  ;;  %v6466_v45 = vld [vmem:[%s5526_s20 + $0xa8] sm:$0xff] }
 0x144   : > { %1495 = vmatmul.f32.gmra.mxu1 %v6359_v21  ;;  %v6367_v2 = vsub.f32 %v6347_v44, %v6359_v21  ;;  %v446_v14 = vmul.f32 20.0, %v414_v34  ;;  %v660_v51 = vmul.f32 10.0, %v628_v59  ;;  %v379_v23 = vand.u32 2147483647, %v6459_v63 }
 0x145   : > { %8706 = vst [vmem:[#allocation23_spill] sm:$0xff] %v6438_v49  ;;  %v6462_v50 = vand.u32 4294901760, %v6438_v49  ;;  %vm546_vm3 = vcmp.ge.f32.partialorder %v6466_v45, 0.0  ;;  %vm539_vm6 = vcmp.ge.f32.partialorder %v6459_v63, 0.0 }
 0x146   : > { %v886_v56 = vpop.permute.xlu0 %885  ;;  %v8528_v11 = vand.u32 4294901760, %v6367_v2 }
 0x147   : > { %v6379_v55 = vpop.permute.xlu1 %893  ;;  %v978_v31 = vsel %vm973_vm1, %v886_v56, 1e+10  ;;  %v8526_v56 = vand.u32 4294901760, %v6410_v40 }
 0x148   : > { %v1148_v29 = vsub.f32 %v6367_v2, %v8528_v11  ;;  %v6401_v30 = vmul.f32 %v978_v31, %v657_v28  ;;  %v6433_v28 = vld [vmem:[%s5526_s20 + $0x60] sm:$0xff]  ;;  %v5064_v31 = vpop.eup %5063 }
 0x149   : > { %v377_v38 = vand.u32 2147483647, %v6433_v28  ;;  %v573_v34 = vmul.f32 0.5, %v5064_v31  ;;  %v386_v31 = vand.u32 2147483647, %v6466_v45  ;;  %vm537_vm5 = vcmp.ge.f32.partialorder %v6433_v28, 0.0 }
 0x14a   : > { %v1149_v27 = vand.u32 4294901760, %v1148_v29  ;;  %8705 = vst [vmem:[#allocation22_spill] sm:$0xff] %v6401_v30  ;;  %v6420_v25 = vand.u32 4294901760, %v6401_v30  ;;  %v627_v29 = vsel %vm531_vm7, %v563_v41, %v595_v46  ;;  %v1164_v41 = vsub.f32 %v6410_v40, %v8526_v56  ;;  %v5066_v46 = vpop.eup %5065 }
 0x14b   : > { %v659_v32 = vmul.f32 10.0, %v627_v29  ;;  %v409_v22 = vsub.f32 0.0, %v377_v38  ;;  %v6475_v15 = vmul.f32 0.5, %v5066_v46  ;;  %v418_v11 = vsub.f32 0.0, %v386_v31 }
 0x14c   : > { %1150 = vmatmul.f32.gmra.mxu0 %v1149_v27  ;;  %1499 = vmatmul.f32.gmra.mxu1 %v6356_v48  ;;  %v495_v27 = vmul.f32 1.442695, %v446_v14  ;;  %v6447_v42 = vsub.f32 %v6401_v30, %v6420_v25  ;;  %v1165_v36 = vand.u32 4294901760, %v1164_v41  ;;  %v410_v14 = vsub.f32 0.0, %v378_v8  ;;  %v5068_v8 = vpop.eup %5067 }
 0x14d   : > { %v6471_v29 = vmul.f32 %v980_v57, %v659_v32  ;;  %v384_v41 = vand.u32 2147483647, %v6469_v10  ;;  %v6487_v57 = vpop.permute.xlu2 %907  ;;  %v441_v52 = vmul.f32 20.0, %v409_v22 }
 0x14e   : > { %v6403_v0 = vpop.permute.xlu0 %891  ;;  %5069 = vpow2.f32 %v495_v27  ;;  %v8525_v24 = vand.u32 4294901760, %v6447_v42  ;;  %v605_v27 = vsub.f32 1.0, %v573_v34  ;;  %v442_v38 = vmul.f32 20.0, %v410_v14 }
 0x14f   : > { %v6413_v43 = vpop.permute.xlu1 %899  ;;  %8707 = vst [vmem:[#allocation24_spill] sm:$0xff] %v6471_v29  ;;  %5071 = vpow2.f32 %v483_v35  ;;  %v6491_v35 = vsub.f32 %v6438_v49, %v6462_v50  ;;  %v6494_v46 = vand.u32 4294901760, %v6471_v29  ;;  %v981_v14 = vsel %vm973_vm1, %v6403_v0, 1e+10  ;;  %v6505_v49 = vld [vmem:[%s5526_s20 + $0xa0] sm:$0xff] }
 0x150   : > { %v1172_v59 = vsub.f32 %v6447_v42, %v8525_v24  ;;  %v566_v24 = vmul.f32 0.5, %v5068_v8  ;;  %v637_v56 = vsel %vm541_vm10, %v573_v34, %v605_v27  ;;  %v487_v22 = vmul.f32 1.442695, %v442_v38 }
 0x151   : > { %v669_v27 = vmul.f32 10.0, %v637_v56  ;;  %vm545_vm2 = vcmp.ge.f32.partialorder %v6505_v49, 0.0 }
 0x154   : > { %1158 = vmatmul.f32.gmra.mxu0 %v1157_v26  ;;  %1503 = vmatmul.f32.gmra.mxu1 %v6389_v3  ;;  %v447_v26 = vmul.f32 20.0, %v415_v1  ;;  %v5070_v1 = vpop.eup %5069 }
 0x155   : > { %v6500_v53 = vpop.eup %5071 }
 0x156   : > { %v6440_v33 = vpop.permute.xlu0 %897  ;;  %v497_v17 = vmul.f32 1.442695, %v447_v26  ;;  %v574_v26 = vmul.f32 0.5, %v5070_v1  ;;  %v1173_v1 = vand.u32 4294901760, %v1172_v59  ;;  %v6515_v59 = vsub.f32 %v6471_v29, %v6494_v46 }
 0x157   : > { %v6450_v18 = vpop.permute.xlu1 %905 }
 0x158   : > { %5073 = vpow2.f32 %v497_v17  ;;  %v606_v62 = vsub.f32 1.0, %v574_v26  ;;  %v6507_v17 = vmul.f32 %v981_v14, %v660_v51  ;;  %v450_v51 = vmul.f32 20.0, %v418_v11 }
 0x159   : > { %v982_v11 = vsel %vm973_vm1, %v6379_v55, 1e+10 }
 0x15a   : > { %8708 = vst [vmem:[#allocation25_spill] sm:$0xff] %v6507_v17  ;;  %v638_v8 = vsel %vm542_vm11, %v574_v26, %v606_v62  ;;  %v385_v62 = vand.u32 2147483647, %v6505_v49  ;;  %v485_v26 = vmul.f32 1.442695, %v441_v52  ;;  %v914_v52 = vpop.permute.xlu2 %913 }
 0x15b   : > { %v670_v31 = vmul.f32 10.0, %v638_v8  ;;  %v503_v29 = vmul.f32 1.442695, %v450_v51  ;;  %v992_v16 = vsel %vm973_vm1, %v914_v52, 1e+10 }
 0x15c   : > { %1166 = vmatmul.f32.gmra.mxu0 %v1165_v36  ;;  %1507 = vmatmul.f32.gmra.mxu1 %v6420_v25  ;;  %v416_v36 = vsub.f32 0.0, %v384_v41  ;;  %v8533_v41 = vand.u32 4294901760, %v6491_v35  ;;  %v417_v8 = vsub.f32 0.0, %v385_v62 }
 0x15e   : > { %v6481_v32 = vpop.permute.xlu0 %903  ;;  %v448_v20 = vmul.f32 20.0, %v416_v36  ;;  %v5074_v0 = vpop.eup %5073  ;;  %v1180_v56 = vsub.f32 %v6491_v35, %v8533_v41  ;;  %v8535_v41 = vand.u32 4294901760, %v6515_v59 }
 0x15f   : > { %v912_v58 = vpop.permute.xlu1 %911  ;;  %v575_v38 = vmul.f32 0.5, %v5074_v0 }
 0x160   : > { %v991_v37 = vsel %vm973_vm1, %v912_v58, 1e+10  ;;  %v499_v34 = vmul.f32 1.442695, %v448_v20  ;;  %v598_v58 = vsub.f32 1.0, %v566_v24  ;;  %v1181_v55 = vand.u32 4294901760, %v1180_v56 }
 0x161   : > { %v6518_v36 = vmul.f32 %v991_v37, %v670_v31  ;;  %v607_v14 = vsub.f32 1.0, %v575_v38  ;;  %v6531_v31 = vand.u32 4294901760, %v6507_v17 }
 0x162   : > { %5075 = vpow2.f32 %v499_v34  ;;  %v630_v51 = vsel %vm534_vm12, %v566_v24, %v598_v58 }
 0x163   : > { %8709 = vst [vmem:[#allocation26_spill] sm:$0xff] %v6518_v36  ;;  %5077 = vpow2.f32 %v487_v22  ;;  %v639_v37 = vsel %vm543_vm14, %v575_v38, %v607_v14  ;;  %v6538_v62 = vand.u32 4294901760, %v6518_v36  ;;  %v6542_v14 = vmul.f32 %v982_v11, %v6473_v9 }
 0x164   : > { %1174 = vmatmul.f32.gmra.mxu0 %v1173_v1  ;;  %1511 = vmatmul.f32.gmra.mxu1 %v6462_v50  ;;  %v411_v1 = vsub.f32 0.0, %v379_v23  ;;  %v449_v23 = vmul.f32 20.0, %v417_v8  ;;  %v671_v22 = vmul.f32 10.0, %v639_v37  ;;  %5079 = vpow2.f32 %v485_v26 }
 0x165   : > { %8712 = vst [vmem:[#allocation29_spill] sm:$0xff] %v6538_v62  ;;  %v1188_v26 = vsub.f32 %v6515_v59, %v8535_v41  ;;  %5081 = vpow2.f32 %v503_v29  ;;  %v6558_v54 = vsub.f32 %v6507_v17, %v6531_v31  ;;  %v6565_v11 = vsub.f32 %v6518_v36, %v6538_v62  ;;  %v6579_v41 = vld [vmem:[%s5526_s20 + $0xc0] sm:$0xff] }
 0x166   : > { %v910_v20 = vpop.permute.xlu0 %909  ;;  %v501_v38 = vmul.f32 1.442695, %v449_v23  ;;  %8713 = vst [vmem:[#allocation30_spill] sm:$0xff] %v6542_v14  ;;  %v6560_v9 = vmul.f32 %v992_v16, %v671_v22  ;;  %v8717_v29 = vsub.f32 1.0, %v6475_v15  ;;  %v662_v52 = vmul.f32 10.0, %v630_v51 }
 0x167   : > { %v990_v0 = vsel %vm973_vm1, %v910_v20, 1e+10  ;;  %8716 = vst [vmem:[#allocation33_spill] sm:$0xff] %v6565_v11  ;;  %v568_v37 = vmul.f32 0.5, %v6500_v53  ;;  %v6582_v12 = vand.u32 4294901760, %v6542_v14  ;;  %v1189_v53 = vand.u32 4294901760, %v1188_v26 }
 0x168   : > { %v6526_v34 = vmul.f32 %v990_v0, %v669_v27  ;;  %v5076_v27 = vpop.eup %5075  ;;  %v443_v0 = vmul.f32 20.0, %v411_v1  ;;  %8715 = vst [vmem:[#allocation32_spill] sm:$0xff] %v6560_v9  ;;  %v631_v10 = vsel %vm535_vm13, %v6475_v15, %v8717_v29  ;;  %5083 = vpow2.f32 %v501_v38  ;;  %v6585_v15 = vld [vmem:[%s5526_s20 + $0x78] sm:$0xff] }
 0x169   : > { %v576_v56 = vmul.f32 0.5, %v5076_v27  ;;  %v5078_v24 = vpop.eup %5077  ;;  %v389_v17 = vand.u32 2147483647, %v6579_v41  ;;  %v663_v30 = vmul.f32 10.0, %v631_v10  ;;  %v6607_v10 = vsub.f32 %v6542_v14, %v6582_v12 }
 0x16a   : > { %8710 = vst [vmem:[#allocation27_spill] sm:$0xff] %v6526_v34  ;;  %v6535_v20 = vand.u32 4294901760, %v6526_v34  ;;  %v489_v22 = vmul.f32 1.442695, %v443_v0  ;;  %v5080_v36 = vpop.eup %5079  ;;  %vm549_vm8 = vcmp.ge.f32.partialorder %v6579_v41, 0.0  ;;  %vm540_vm10 = vcmp.ge.f32.partialorder %v6585_v15, 0.0 }
 0x16b   : > { %v608_v1 = vsub.f32 1.0, %v576_v56  ;;  %v569_v26 = vmul.f32 0.5, %v5080_v36  ;;  %v8550_v61 = vand.u32 4294901760, %v6607_v10 }
 0x16c   : > { %8711 = vst [vmem:[#allocation28_spill] sm:$0xff] %v6535_v20  ;;  %1182 = vmatmul.f32.gmra.mxu0 %v1181_v55  ;;  %1515 = vmatmul.f32.gmra.mxu1 %v6494_v46  ;;  %v6549_v8 = vsub.f32 %v6526_v34, %v6535_v20  ;;  %v983_v55 = vsel %vm973_vm1, %v6393_v4, 1e+10  ;;  %v6589_v4 = vand.u32 4294901760, %v6560_v9  ;;  %v600_v34 = vsub.f32 1.0, %v568_v37 }
 0x16d   : > { %1555 = vmatmul.f32.vlgmr.msra.gmra.mxu3 %v6535_v20  ;;  %v640_v16 = vsel %vm544_vm15, %v576_v56, %v608_v1  ;;  %v8542_v56 = vand.u32 4294901760, %v6565_v11  ;;  %v5082_v1 = vpop.eup %5081  ;;  %5085 = vpow2.f32 %v489_v22 }
 0x16e   : > { %8714 = vst [vmem:[#allocation31_spill] sm:$0xff] %v6549_v8  ;;  %v8537_v58 = vand.u32 4294901760, %v6549_v8  ;;  %v916_v23 = vpop.permute.xlu0 %915  ;;  %v672_v51 = vmul.f32 10.0, %v640_v16  ;;  %v380_v16 = vand.u32 2147483647, %v6585_v15  ;;  %v5084_v38 = vpop.eup %5083  ;;  %v578_v36 = vmul.f32 0.5, %v5082_v1 }
 0x16f   : > { %8718 = vst [vmem:[#allocation34_spill] sm:$0xff] %v6589_v4  ;;  %v993_v29 = vsel %vm973_vm1, %v916_v23, 1e+10  ;;  %v577_v22 = vmul.f32 0.5, %v5084_v38  ;;  %v601_v1 = vsub.f32 1.0, %v569_v26 }
 0x170   : > { %v1268_v27 = vsub.f32 %v6549_v8, %v8537_v58  ;;  %v6593_v58 = vmul.f32 %v983_v55, %v662_v52  ;;  %v6600_v23 = vmul.f32 %v993_v29, %v672_v51  ;;  %v8721_v52 = vand.u32 4294901760, %v6558_v54 }
 0x171   : > { %v421_v29 = vsub.f32 0.0, %v389_v17  ;;  %v412_v14 = vsub.f32 0.0, %v380_v16  ;;  %v609_v38 = vsub.f32 1.0, %v577_v22 }
 0x172   : > { %v1269_v0 = vand.u32 4294901760, %v1268_v27  ;;  %8719 = vst [vmem:[#allocation35_spill] sm:$0xff] %v6593_v58  ;;  %v1196_v55 = vsub.f32 %v6558_v54, %v8721_v52  ;;  %v1276_v27 = vsub.f32 %v6565_v11, %v8542_v56  ;;  %v6617_v51 = vand.u32 4294901760, %v6593_v58  ;;  %v918_v56 = vpop.permute.xlu1 %917 }
 0x173   : > { %8720 = vst [vmem:[#allocation36_spill] sm:$0xff] %v6600_v23  ;;  %v6622_v52 = vmul.f32 0.5, %v5078_v24  ;;  %v6627_v19 = vand.u32 4294901760, %v6600_v23  ;;  %v5086_v24 = vpop.eup %5085  ;;  %v453_v16 = vmul.f32 20.0, %v421_v29  ;;  %v994_v47 = vsel %vm973_vm1, %v918_v56, 1e+10 }
 0x174   : > { %1190 = vmatmul.f32.gmra.mxu0 %v1189_v53  ;;  %1270 = vmatmul.f32.vlgmr.msra.gmra.mxu2 %v1269_v0  ;;  %v6614_v53 = vsub.f32 %v6560_v9, %v6589_v4  ;;  %v632_v0 = vsel %vm536_vm0, %v568_v37, %v600_v34  ;;  %v984_v9 = vsel %vm973_vm1, %v6440_v33, 1e+10  ;;  %v1197_v13 = vand.u32 4294901760, %v1196_v55  ;;  %v6634_v33 = vld [vmem:[%s5526_s20 + $0xb0] sm:$0xff] }
 0x175   : > { %1519 = vmatmul.f32.gmra.mxu1 %v6531_v31  ;;  %1559 = vmatmul.f32.gmra.mxu3 %v6538_v62  ;;  %8723 = vst [vmem:[#allocation38_spill] sm:$0xff] %v6627_v19  ;;  %v610_v34 = vsub.f32 1.0, %v578_v36  ;;  %v1277_v17 = vand.u32 4294901760, %v1276_v27  ;;  %v641_v37 = vsel %vm545_vm2, %v577_v22, %v609_v38  ;;  %v6636_v11 = vmul.f32 %v984_v9, %v663_v30  ;;  %v920_v22 = vpop.permute.xlu2 %919 }
 0x176   : > { %8722 = vst [vmem:[#allocation37_spill] sm:$0xff] %v6614_v53  ;;  %v8553_v49 = vand.u32 4294901760, %v6614_v53  ;;  %v673_v44 = vmul.f32 10.0, %v641_v37  ;;  %v664_v55 = vmul.f32 10.0, %v632_v0  ;;  %v602_v27 = vsub.f32 1.0, %v6622_v52 }
 0x177   : > { %8724 = vst [vmem:[#allocation39_spill] sm:$0xff] %v6636_v11  ;;  %v1204_v56 = vsub.f32 %v6607_v10, %v8550_v61  ;;  %v6648_v30 = vsub.f32 %v6593_v58, %v6617_v51  ;;  %v6652_v9 = vsub.f32 %v6600_v23, %v6627_v19  ;;  %v642_v0 = vsel %vm546_vm3, %v578_v36, %v610_v34 }
 0x178   : > { %v6659_v29 = vmul.f32 %v994_v47, %v673_v44  ;;  %v1284_v38 = vsub.f32 %v6614_v53, %v8553_v49  ;;  %v985_v37 = vsel %vm973_vm1, %v6413_v43, 1e+10  ;;  %v633_v61 = vsel %vm537_vm5, %v569_v26, %v601_v1 }
 0x179   : > { %8725 = vst [vmem:[#allocation40_spill] sm:$0xff] %v6648_v30  ;;  %v444_v23 = vmul.f32 20.0, %v412_v14  ;;  %v509_v58 = vmul.f32 1.442695, %v453_v16  ;;  %v6670_v45 = vand.u32 4294901760, %v6636_v11  ;;  %v674_v34 = vmul.f32 10.0, %v642_v0 }
 0x17a   : > { %8726 = vst [vmem:[#allocation41_spill] sm:$0xff] %v6652_v9  ;;  %v995_v47 = vsel %vm973_vm1, %v920_v22, 1e+10  ;;  %v1205_v49 = vand.u32 4294901760, %v1204_v56  ;;  %v6677_v28 = vand.u32 4294901760, %v6659_v29  ;;  %v1285_v26 = vand.u32 4294901760, %v1284_v38 }
 0x17b   : > { %8727 = vst [vmem:[#allocation42_spill] sm:$0xff] %v6659_v29  ;;  %v6680_v16 = vld [vmem:[%s5526_s20 + $0xc8] sm:$0xff]  ;;  %v986_v22 = vsel %vm973_vm1, %v6430_v6, 1e+10  ;;  %v491_v8 = vmul.f32 1.442695, %v444_v23  ;;  %5087 = vpow2.f32 %v509_v58  ;;  %v6684_v0 = vmul.f32 %v985_v37, %v664_v55 }
 0x17c   : > { %1198 = vmatmul.f32.gmra.mxu0 %v1197_v13  ;;  %1278 = vmatmul.f32.gmra.mxu2 %v1277_v17  ;;  %v6655_v13 = vld [vmem:[%s5526_s20 + $0xb8] sm:$0xff]  ;;  %v387_v17 = vand.u32 2147483647, %v6634_v33  ;;  %8728 = vst [vmem:[#allocation43_spill] sm:$0xff] %v6677_v28  ;;  %v665_v56 = vmul.f32 10.0, %v633_v61  ;;  %v8731_v6 = vand.u32 4294901760, %v6648_v30  ;;  %v6703_v55 = vsub.f32 %v6659_v29, %v6677_v28 }
 0x17d   : > { %1523 = vmatmul.f32.gmra.mxu1 %v6582_v12  ;;  %1563 = vmatmul.f32.gmra.mxu3 %v6589_v4  ;;  %v388_v36 = vand.u32 2147483647, %v6655_v13  ;;  %8729 = vst [vmem:[#allocation44_spill] sm:$0xff] %v6684_v0  ;;  %v6686_v4 = vmul.f32 %v995_v47, %v674_v34  ;;  %v8732_v58 = vand.u32 4294901760, %v6652_v9  ;;  %v634_v37 = vsel %vm538_vm4, %v6622_v52, %v602_v27 }
 0x17e   : > { %v419_v44 = vsub.f32 0.0, %v387_v17  ;;  %v571_v17 = vmul.f32 0.5, %v5086_v24  ;;  %v1212_v23 = vsub.f32 %v6648_v30, %v8731_v6  ;;  %v6699_v24 = vsub.f32 %v6636_v11, %v6670_v45  ;;  %8734 = vst [vmem:[#allocation47_spill] sm:$0xff] %v6703_v55 }
 0x17f   : > { %v420_v1 = vsub.f32 0.0, %v388_v36  ;;  %8730 = vst [vmem:[#allocation45_spill] sm:$0xff] %v6686_v4  ;;  %v1292_v61 = vsub.f32 %v6652_v9, %v8732_v58  ;;  %v6711_v36 = vmul.f32 %v986_v22, %v665_v56  ;;  %v666_v56 = vmul.f32 10.0, %v634_v37  ;;  %v922_v37 = vpop.permute.xlu0 %921  ;;  %v924_v9 = vpop.permute.xlu1 %923 }
 0x180   : > { %v451_v14 = vmul.f32 20.0, %v419_v44  ;;  %8733 = vst [vmem:[#allocation46_spill] sm:$0xff] %v6699_v24  ;;  %v6709_v44 = vld [vmem:[%s5526_s20 + $0xd0] sm:$0xff]  ;;  %v603_v34 = vsub.f32 1.0, %v571_v17  ;;  %v1213_v5 = vand.u32 4294901760, %v1212_v23  ;;  %v8563_v27 = vand.u32 4294901760, %v6699_v24 }
 0x181   : > { %v452_v53 = vmul.f32 20.0, %v420_v1  ;;  %8735 = vst [vmem:[#allocation48_spill] sm:$0xff] %v6711_v36  ;;  %v1293_v52 = vand.u32 4294901760, %v1292_v61  ;;  %v391_v22 = vand.u32 2147483647, %v6709_v44  ;;  %vm547_vm7 = vcmp.ge.f32.partialorder %v6634_v33, 0.0 }
 0x182   : > { %v505_v43 = vmul.f32 1.442695, %v451_v14  ;;  %v6718_v14 = vand.u32 4294901760, %v6684_v0  ;;  %v635_v29 = vsel %vm539_vm6, %v571_v17, %v603_v34  ;;  %v1220_v17 = vsub.f32 %v6699_v24, %v8563_v27 }
 0x183   : > { %v507_v38 = vmul.f32 1.442695, %v452_v53  ;;  %v6721_v53 = vand.u32 4294901760, %v6686_v4  ;;  %v423_v61 = vsub.f32 0.0, %v391_v22  ;;  %v8736_v34 = vand.u32 4294901760, %v6703_v55 }
 0x184   : > { %1206 = vmatmul.f32.gmra.mxu0 %v1205_v49  ;;  %1286 = vmatmul.f32.gmra.mxu2 %v1285_v26  ;;  %v390_v49 = vand.u32 2147483647, %v6680_v16  ;;  %5089 = vpow2.f32 %v505_v43  ;;  %v6715_v43 = vld [vmem:[%s5526_s20 + $0xd8] sm:$0xff]  ;;  %v5088_v26 = vpop.eup %5087  ;;  %v6737_v1 = vsub.f32 %v6684_v0, %v6718_v14  ;;  %v987_v22 = vsel %vm973_vm1, %v6481_v32, 1e+10 }
 0x185   : > { %1527 = vmatmul.f32.gmra.mxu1 %v6617_v51  ;;  %1567 = vmatmul.f32.gmra.mxu3 %v6627_v19  ;;  %5091 = vpow2.f32 %v491_v8  ;;  %v392_v6 = vand.u32 2147483647, %v6715_v43  ;;  %v581_v23 = vmul.f32 0.5, %v5088_v26  ;;  %v1300_v26 = vsub.f32 %v6703_v55, %v8736_v34  ;;  %v6759_v19 = vld [vmem:[%s5526_s20 + $0xe0] sm:$0xff] }
 0x186   : > { %v422_v47 = vsub.f32 0.0, %v390_v49  ;;  %5093 = vpow2.f32 %v507_v38  ;;  %v6728_v38 = vand.u32 4294901760, %v6711_v36  ;;  %v996_v27 = vsel %vm973_vm1, %v922_v37, 1e+10 }
 0x187   : > { %v613_v11 = vsub.f32 1.0, %v581_v23  ;;  %vm548_vm9 = vcmp.ge.f32.partialorder %v6655_v13, 0.0  ;;  %v997_v13 = vsel %vm973_vm1, %v924_v9, 1e+10  ;;  %v6762_v30 = vmul.f32 %v987_v22, %v666_v56 }
 0x188   : > { %v454_v8 = vmul.f32 20.0, %v422_v47  ;;  %v6775_v9 = vsub.f32 %v6711_v36, %v6728_v38  ;;  %v393_v41 = vand.u32 2147483647, %v6759_v19  ;;  %v667_v56 = vmul.f32 10.0, %v635_v29 }
 0x189   : > { %8737 = vst [vmem:[#allocation49_spill] sm:$0xff] %v6762_v30  ;;  %v645_v33 = vsel %vm549_vm8, %v581_v23, %v613_v11  ;;  %v926_v11 = vpop.permute.xlu2 %925  ;;  %vm550_vm11 = vcmp.ge.f32.partialorder %v6680_v16, 0.0  ;;  %vm551_vm12 = vcmp.ge.f32.partialorder %v6709_v44, 0.0  ;;  %v930_v44 = vpop.permute.xlu1 %929  ;;  %vm552_vm13 = vcmp.ge.f32.partialorder %v6715_v43, 0.0 }
 0x18a   : > { %v511_v58 = vmul.f32 1.442695, %v454_v8  ;;  %v5090_v49 = vpop.eup %5089  ;;  %v998_v22 = vsel %vm973_vm1, %v926_v11, 1e+10  ;;  %v425_v29 = vsub.f32 0.0, %v393_v41  ;;  %vm553_vm14 = vcmp.ge.f32.partialorder %v6759_v19, 0.0 }
 0x18b   : > { %v5092_v47 = vpop.eup %5091  ;;  %v579_v8 = vmul.f32 0.5, %v5090_v49  ;;  %v424_v49 = vsub.f32 0.0, %v392_v6  ;;  %v1221_v6 = vand.u32 4294901760, %v1220_v17  ;;  %vm4501_vm3 = vcmask 195712  }
 0x18c   : > { %1214 = vmatmul.f32.gmra.mxu0 %v1213_v5  ;;  %1294 = vmatmul.f32.gmra.mxu2 %v1293_v52  ;;  %5095 = vpow2.f32 %v511_v58  ;;  %v5094_v63 = vpop.eup %5093  ;;  %v6747_v5 = vsub.f32 %v6686_v4, %v6721_v53  ;;  %v455_v52 = vmul.f32 20.0, %v423_v61  ;;  %v8584_v61 = vand.u32 4294901760, %v6737_v1 }
 0x18d   : > { %1531 = vmatmul.f32.gmra.mxu1 %v6670_v45  ;;  %1571 = vmatmul.f32.gmra.mxu3 %v6677_v28  ;;  %v611_v58 = vsub.f32 1.0, %v579_v8  ;;  %v580_v0 = vmul.f32 0.5, %v5094_v63  ;;  %v1301_v28 = vand.u32 4294901760, %v1300_v26  ;;  %v572_v20 = vmul.f32 0.5, %v5092_v47 }
 0x18e   : > { %v513_v55 = vmul.f32 1.442695, %v455_v52  ;;  %v8582_v63 = vand.u32 4294901760, %v6747_v5  ;;  %v456_v37 = vmul.f32 20.0, %v424_v49  ;;  %v988_v47 = vsel %vm973_vm1, %v6450_v18, 1e+10 }
 0x18f   : > { %v643_v34 = vsel %vm547_vm7, %v579_v8, %v611_v58  ;;  %v612_v4 = vsub.f32 1.0, %v580_v0  ;;  %v604_v26 = vsub.f32 1.0, %v572_v20  ;;  %v677_v52 = vmul.f32 10.0, %v645_v33 }
 0x190   : > { %v675_v32 = vmul.f32 10.0, %v643_v34  ;;  %5097 = vpow2.f32 %v513_v55  ;;  %v515_v23 = vmul.f32 1.442695, %v456_v37  ;;  %v6788_v55 = vand.u32 4294901760, %v6762_v30  ;;  %v6802_v37 = vld [vmem:[%s5526_s20 + $0xe8] sm:$0xff] }
 0x191   : > { %v644_v24 = vsel %vm548_vm9, %v580_v0, %v612_v4  ;;  %v1228_v4 = vsub.f32 %v6737_v1, %v8584_v61  ;;  %v8583_v49 = vand.u32 4294901760, %v6775_v9  ;;  %v6806_v33 = vmul.f32 %v988_v47, %v667_v56 }
 0x192   : > { %v5096_v62 = vpop.eup %5095  ;;  %v6766_v8 = vmul.f32 %v996_v27, %v675_v32  ;;  %v676_v17 = vmul.f32 10.0, %v644_v24  ;;  %v1308_v24 = vsub.f32 %v6747_v5, %v8582_v63  ;;  %5099 = vpow2.f32 %v515_v23 }
 0x193   : > { %v582_v27 = vmul.f32 0.5, %v5096_v62  ;;  %v1229_v34 = vand.u32 4294901760, %v1228_v4  ;;  %8740 = vst [vmem:[#allocation52_spill] sm:$0xff] %v6806_v33  ;;  %v6810_v41 = vmul.f32 %v998_v22, %v677_v52  ;;  %v928_v4 = vpop.permute.xlu0 %927  ;;  %v1236_v16 = vsub.f32 %v6775_v9, %v8583_v49 }
 0x194   : > { %8738 = vst [vmem:[#allocation50_spill] sm:$0xff] %v6766_v8  ;;  %1222 = vmatmul.f32.gmra.mxu0 %v1221_v6  ;;  %1302 = vmatmul.f32.gmra.mxu2 %v1301_v28  ;;  %v6779_v0 = vand.u32 4294901760, %v6766_v8  ;;  %v6781_v28 = vmul.f32 %v997_v13, %v676_v17  ;;  %v1309_v32 = vand.u32 4294901760, %v1308_v24  ;;  %v636_v17 = vsel %vm540_vm10, %v572_v20, %v604_v26 }
 0x195   : > { %1535 = vmatmul.f32.gmra.mxu1 %v6718_v14  ;;  %1575 = vmatmul.f32.gmra.mxu3 %v6721_v53  ;;  %v614_v6 = vsub.f32 1.0, %v582_v27  ;;  %8741 = vst [vmem:[#allocation53_spill] sm:$0xff] %v6810_v41  ;;  %v457_v11 = vmul.f32 20.0, %v425_v29  ;;  %v6819_v24 = vsub.f32 %v6762_v30, %v6788_v55  ;;  %v394_v20 = vand.u32 2147483647, %v6802_v37 }
 0x196   : > { %8739 = vst [vmem:[#allocation51_spill] sm:$0xff] %v6781_v28  ;;  %v6796_v62 = vsub.f32 %v6766_v8, %v6779_v0  ;;  %v6799_v58 = vand.u32 4294901760, %v6781_v28  ;;  %v5098_v18 = vpop.eup %5097  ;;  %v989_v26 = vsel %vm973_vm1, %v6487_v57, 1e+10  ;;  %v6832_v52 = vand.u32 4294901760, %v6806_v33 }
 0x197   : > { %v646_v15 = vsel %vm550_vm11, %v582_v27, %v614_v6  ;;  %v583_v23 = vmul.f32 0.5, %v5098_v18  ;;  %v668_v22 = vmul.f32 10.0, %v636_v17  ;;  %v6835_v29 = vand.u32 4294901760, %v6810_v41 }
 0x198   : > { %v8581_v13 = vand.u32 4294901760, %v6796_v62  ;;  %v6827_v47 = vsub.f32 %v6781_v28, %v6799_v58  ;;  %v999_v27 = vsel %vm973_vm1, %v928_v4, 1e+10  ;;  %v678_v6 = vmul.f32 10.0, %v646_v15 }
 0x199   : > { %v517_v18 = vmul.f32 1.442695, %v457_v11  ;;  %v426_v63 = vsub.f32 0.0, %v394_v20  ;;  %v1237_v49 = vand.u32 4294901760, %v1236_v16  ;;  %v615_v57 = vsub.f32 1.0, %v583_v23 }
 0x19a   : > { %v1316_v56 = vsub.f32 %v6796_v62, %v8581_v13  ;;  %v8589_v13 = vand.u32 4294901760, %v6819_v24  ;;  %v8588_v28 = vand.u32 4294901760, %v6827_v47  ;;  %v6844_v17 = vmul.f32 %v989_v26, %v668_v22 }
 0x19b   : > { %v6847_v30 = vmul.f32 %v999_v27, %v678_v6  ;;  %5101 = vpow2.f32 %v517_v18  ;;  %v458_v11 = vmul.f32 20.0, %v426_v63  ;;  %v647_v20 = vsel %vm551_vm12, %v583_v23, %v615_v57  ;;  %v6874_v57 = vld [vmem:[%s5526_s20 + $0xf8] sm:$0xff] }
 0x19c   : > { %1230 = vmatmul.f32.gmra.mxu0 %v1229_v34  ;;  %1310 = vmatmul.f32.gmra.mxu2 %v1309_v32  ;;  %v5100_v34 = vpop.eup %5099  ;;  %v6839_v32 = vld [vmem:[%s5526_s20 + $0xf0] sm:$0xff]  ;;  %v1317_v61 = vand.u32 4294901760, %v1316_v56  ;;  %8742 = vst [vmem:[#allocation54_spill] sm:$0xff] %v6844_v17  ;;  %v1244_v16 = vsub.f32 %v6819_v24, %v8589_v13  ;;  %v6863_v15 = vsub.f32 %v6810_v41, %v6835_v29  ;;  %v6866_v56 = vand.u32 4294901760, %v6844_v17 }
 0x19d   : > { %1539 = vmatmul.f32.gmra.mxu1 %v6728_v38  ;;  %1579 = vmatmul.f32.gmra.mxu3 %v6779_v0  ;;  %v584_v8 = vmul.f32 0.5, %v5100_v34  ;;  %v395_v4 = vand.u32 2147483647, %v6839_v32  ;;  %8743 = vst [vmem:[#allocation55_spill] sm:$0xff] %v6847_v30  ;;  %v679_v23 = vmul.f32 10.0, %v647_v20  ;;  %v6871_v6 = vand.u32 4294901760, %v6847_v30 }
 0x19e   : > { %8744 = vst [vmem:[#allocation56_spill] sm:$0xff] %v6863_v15  ;;  %v1000_v22 = vsel %vm973_vm1, %v930_v44, 1e+10  ;;  %v1245_v27 = vand.u32 4294901760, %v1244_v16  ;;  %v519_v34 = vmul.f32 1.442695, %v458_v11  ;;  %v6893_v43 = vsub.f32 %v6844_v17, %v6866_v56 }
 0x19f   : > { %v616_v63 = vsub.f32 1.0, %v584_v8  ;;  %v427_v26 = vsub.f32 0.0, %v395_v4  ;;  %v8593_v13 = vand.u32 4294901760, %v6863_v15  ;;  %v932_v4 = vpop.permute.xlu2 %931  ;;  %v6880_v16 = vmul.f32 %v1000_v22, %v679_v23 }
 0x1a0   : > { %5103 = vpow2.f32 %v519_v34  ;;  %v396_v11 = vand.u32 2147483647, %v6874_v57  ;;  %vm554_vm15 = vcmp.ge.f32.partialorder %v6802_v37, 0.0  ;;  %vm555_vm0 = vcmp.ge.f32.partialorder %v6839_v32, 0.0 }
 0x1a1   : > { %v5102_v41 = vpop.eup %5101  ;;  %v648_v44 = vsel %vm552_vm13, %v584_v8, %v616_v63  ;;  %8745 = vst [vmem:[#allocation57_spill] sm:$0xff] %v6880_v16  ;;  %v6897_v8 = vsub.f32 %v6847_v30, %v6871_v6  ;;  %vm556_vm2 = vcmp.ge.f32.partialorder %v6874_v57, 0.0  ;;  %vm4505_vm4 = vcmask 261312  }
 0x1a2   : > { %v585_v63 = vmul.f32 0.5, %v5102_v41  ;;  %v680_v23 = vmul.f32 10.0, %v648_v44  ;;  %v428_v34 = vsub.f32 0.0, %v396_v11  ;;  %vm4509_vm5 = vcmask 326912  }
 0x1a3   : > { %v8600_v17 = vand.u32 4294901760, %v6897_v8  ;;  %vm4513_vm6 = vcmask 392512   ;;  %vm4517_vm7 = vcmask 458112   ;;  %vm4521_vm8 = vcmask 523712  }
 0x1a4   : > { %1238 = vmatmul.f32.gmra.mxu0 %v1237_v49  ;;  %1318 = vmatmul.f32.gmra.mxu2 %v1317_v61  ;;  %v1324_v49 = vsub.f32 %v6827_v47, %v8588_v28  ;;  %v6859_v61 = vsub.f32 %v6806_v33, %v6832_v52  ;;  %v459_v33 = vmul.f32 20.0, %v427_v26  ;;  %v1001_v26 = vsel %vm973_vm1, %v932_v4, 1e+10 }
 0x1a5   : > { %1543 = vmatmul.f32.gmra.mxu1 %v6788_v55  ;;  %1583 = vmatmul.f32.gmra.mxu3 %v6799_v58  ;;  %v6906_v41 = vmul.f32 %v1001_v26, %v680_v23  ;;  %v460_v4 = vmul.f32 20.0, %v428_v34  ;;  %v1340_v44 = vsub.f32 %v6897_v8, %v8600_v17  ;;  %vm4525_vm9 = vcmask 589312  }
 0x1a6   : > { %v1325_v18 = vand.u32 4294901760, %v1324_v49  ;;  %v8592_v28 = vand.u32 4294901760, %v6859_v61  ;;  %v1332_v49 = vsub.f32 %v6863_v15, %v8593_v13  ;;  %v521_v22 = vmul.f32 1.442695, %v459_v33  ;;  %v5104_v36 = vpop.eup %5103 }
 0x1a7   : > { %v8598_v13 = vand.u32 4294901760, %v6893_v43  ;;  %v617_v15 = vsub.f32 1.0, %v585_v63  ;;  %8746 = vst [vmem:[#allocation58_spill] sm:$0xff] %v6906_v41  ;;  %v586_v11 = vmul.f32 0.5, %v5104_v36  ;;  %v523_v26 = vmul.f32 1.442695, %v460_v4 }
 0x1a8   : > { %v1252_v20 = vsub.f32 %v6859_v61, %v8592_v28  ;;  %v1333_v28 = vand.u32 4294901760, %v1332_v49  ;;  %5105 = vpow2.f32 %v521_v22  ;;  %v6921_v49 = vand.u32 4294901760, %v6906_v41 }
 0x1a9   : > { %v1260_v33 = vsub.f32 %v6893_v43, %v8598_v13  ;;  %v1341_v34 = vand.u32 4294901760, %v1340_v44  ;;  %v618_v30 = vsub.f32 1.0, %v586_v11  ;;  %5107 = vpow2.f32 %v523_v26  ;;  %v936_v44 = vpop.permute.xlu1 %935 }
 0x1aa   : > { %v6937_v4 = vsub.f32 %v6906_v41, %v6921_v49  ;;  %vm4529_vm10 = vcmask 654912   ;;  %vm8649_vm11 = vcmask 720512   ;;  %vm4537_vm12 = vcmask 786112  }
 0x1ab   : > { %v1261_v22 = vand.u32 4294901760, %v1260_v33  ;;  %v650_v33 = vsel %vm554_vm15, %v586_v11, %v618_v30  ;;  %vm4541_vm13 = vcmask 851712   ;;  %vm4549_vm15 = vcmask 982912  }
 0x1ac   : > { %1246 = vmatmul.f32.gmra.mxu0 %v1245_v27  ;;  %1326 = vmatmul.f32.gmra.mxu2 %v1325_v18  ;;  %v6901_v27 = vand.u32 4294901760, %v6880_v16  ;;  %v1253_v18 = vand.u32 4294901760, %v1252_v20  ;;  %v934_v20 = vpop.permute.xlu0 %933  ;;  %v8606_v26 = vand.u32 4294901760, %v6937_v4 }
 0x1ad   : > { %1547 = vmatmul.f32.gmra.mxu1 %v6832_v52  ;;  %1587 = vmatmul.f32.gmra.mxu3 %v6835_v29  ;;  %v1002_v13 = vsel %vm973_vm1, %v934_v20, 1e+10 }
 0x1ae   : > { %v6918_v19 = vsub.f32 %v6880_v16, %v6901_v27  ;;  %v5106_v17 = vpop.eup %5105  ;;  %v1356_v11 = vsub.f32 %v6937_v4, %v8606_v26 }
 0x1af   : > { %v587_v37 = vmul.f32 0.5, %v5106_v17 }
 0x1b0   : > { %8747 = vst [vmem:[#allocation59_spill] sm:$0xff] %v6918_v19  ;;  %v1357_v16 = vand.u32 4294901760, %v1356_v11 }
 0x1b4   : > { %1254 = vmatmul.f32.gmra.mxu0 %v1253_v18  ;;  %1334 = vmatmul.f32.gmra.mxu2 %v1333_v28  ;;  %v649_v28 = vsel %vm553_vm14, %v585_v63, %v617_v15  ;;  %v8601_v18 = vand.u32 4294901760, %v6918_v19  ;;  %v6926_v15 = vpop.f32.mrf.mxu1  ;;  %v940_v57 = vpop.permute.xlu0 %939  ;;  %vm4545_vm14 = vcmask 917312  }
 0x1b5   : > { %1551 = vmatmul.f32.gmra.mxu1 %v6866_v56  ;;  %1591 = vmatmul.f32.gmra.mxu3 %v6871_v6  ;;  %v681_v23 = vmul.f32 10.0, %v649_v28  ;;  %v6939_v28 = vpop.f32.mrf.mxu0  ;;  %v1005_v26 = vsel %vm973_vm1, %v940_v57, 1e+10 }
 0x1b6   : > { %v1348_v63 = vsub.f32 %v6918_v19, %v8601_v18  ;;  %v5108_v18 = vpop.eup %5107 }
 0x1b7   : > { %v6930_v36 = vmul.f32 %v1002_v13, %v681_v23  ;;  %v619_v23 = vsub.f32 1.0, %v587_v37 }
 0x1b8   : > { %v1349_v13 = vand.u32 4294901760, %v1348_v63 }
 0x1b9   : > { %8748 = vst [vmem:[#allocation60_spill] sm:$0xff] %v6930_v36  ;;  %v6942_v20 = vand.u32 4294901760, %v6930_v36  ;;  %v651_v32 = vsel %vm555_vm0, %v587_v37, %v619_v23  ;;  %vm4553_vm0 = vcmask 1048512  }
 0x1bb   : > { %v6959_v63 = vsub.f32 %v6930_v36, %v6942_v20 }
 0x1bc   : > { %1262 = vmatmul.f32.gmra.mxu0 %v1261_v22  ;;  %1342 = vmatmul.f32.gmra.mxu2 %v1341_v34  ;;  %v682_v22 = vmul.f32 10.0, %v650_v33  ;;  %v1003_v34 = vsel %vm973_vm1, %v936_v44, 1e+10  ;;  %v588_v33 = vmul.f32 0.5, %v5108_v18  ;;  %v938_v44 = vpop.permute.xlu2 %937 }
 0x1bd   : > { %1595 = vmatmul.f32.gmra.mxu3 %v6901_v27  ;;  %2279 = vmatmul.f32.vlgmr.msrb.gmra.mxu1 %v6258_v60 }
 0x1be   : > { %v6952_v17 = vmul.f32 %v1003_v34, %v682_v22  ;;  %v8607_v22 = vand.u32 4294901760, %v6959_v63  ;;  %v1004_v34 = vsel %vm973_vm1, %v938_v44, 1e+10  ;;  %v620_v19 = vsub.f32 1.0, %v588_v33 }
 0x1bf   : > { %vm4497_vm1 = vcmask 130112  }
 0x1c0   : > { %8749 = vst [vmem:[#allocation61_spill] sm:$0xff] %v6952_v17  ;;  %v6964_v41 = vand.u32 4294901760, %v6952_v17  ;;  %v1364_v37 = vsub.f32 %v6959_v63, %v8607_v22  ;;  %v652_v11 = vsel %vm556_vm2, %v588_v33, %v620_v19  ;;  %vm4710_vm2 = vcmask 1041409  }
 0x1c1   : > { %v6948_v30 = vpop.f32.mrf.mxu1  ;;  %v684_v44 = vmul.f32 10.0, %v652_v11 }
 0x1c2   : > { %v6979_v23 = vsub.f32 %v6952_v17, %v6964_v41 }
 0x1c3   : > { %v6993_v19 = vmul.f32 %v1005_v26, %v684_v44 }
 0x1c4   : > { %1350 = vmatmul.f32.gmra.mxu2 %v1349_v13  ;;  %2118 = vmatmul.f32.vlgmr.msrb.gmra.mxu0 %v6258_v60  ;;  %v683_v13 = vmul.f32 10.0, %v651_v32 }
 0x1c5   : > { %1599 = vmatmul.f32.gmra.mxu3 %v6921_v49  ;;  %2283 = vmatmul.f32.gmra.mxu1 %v6359_v21  ;;  %8751 = vst [vmem:[#allocation63_spill] sm:$0xff] %v6993_v19 }
 0x1c6   : > { %v6972_v18 = vmul.f32 %v1004_v34, %v683_v13  ;;  %v1365_v13 = vand.u32 4294901760, %v1364_v37  ;;  %v8608_v34 = vand.u32 4294901760, %v6979_v23 }
 0x1c8   : > { %8750 = vst [vmem:[#allocation62_spill] sm:$0xff] %v6972_v18  ;;  %v1372_v33 = vsub.f32 %v6979_v23, %v8608_v34 }
 0x1c9   : > { %v6961_v60 = vpop.f32.mrf.mxu0  ;;  %v6981_v32 = vpop.f32.mrf.mxu1 }
 0x1cc   : > { %1358 = vmatmul.f32.gmra.mxu2 %v1357_v16  ;;  %2122 = vmatmul.f32.gmra.mxu0 %v6359_v21  ;;  %v6986_v21 = vand.u32 4294901760, %v6972_v18 }
 0x1cd   : > { %1603 = vmatmul.f32.gmra.mxu3 %v6942_v20  ;;  %2287 = vmatmul.f32.gmra.mxu1 %v6356_v48 }
 0x1ce   : > { %v7000_v37 = vsub.f32 %v6972_v18, %v6986_v21 }
 0x1d0   : > { %8752 = vst [vmem:[#allocation64_spill] sm:$0xff] %v7000_v37  ;;  %v8610_v22 = vand.u32 4294901760, %v7000_v37 }
 0x1d1   : > { %v6983_v16 = vpop.f32.mrf.mxu0  ;;  %v7002_v11 = vpop.f32.mrf.mxu1 }
 0x1d2   : > { %v1380_v26 = vsub.f32 %v7000_v37, %v8610_v22 }
 0x1d4   : > { %1366 = vmatmul.f32.gmra.mxu2 %v1365_v13  ;;  %2126 = vmatmul.f32.gmra.mxu0 %v6356_v48  ;;  %v7007_v48 = vand.u32 4294901760, %v6993_v19  ;;  %v1373_v13 = vand.u32 4294901760, %v1372_v33  ;;  %v1381_v33 = vand.u32 4294901760, %v1380_v26 }
 0x1d5   : > { %1607 = vmatmul.f32.gmra.mxu3 %v6964_v41  ;;  %2291 = vmatmul.f32.gmra.mxu1 %v6389_v3 }
 0x1d6   : > { %v7018_v44 = vsub.f32 %v6993_v19, %v7007_v48 }
 0x1d8   : > { %8753 = vst [vmem:[#allocation65_spill] sm:$0xff] %v7018_v44  ;;  %v8613_v18 = vand.u32 4294901760, %v7018_v44 }
 0x1d9   : > { %v7004_v57 = vpop.f32.mrf.mxu0 }
 0x1dc   : > { %1374 = vmatmul.f32.gmra.mxu2 %v1373_v13  ;;  %2130 = vmatmul.f32.gmra.mxu0 %v6389_v3  ;;  %v7023_v13 = vpop.f32.mrf.mxu1  ;;  %v1388_v3 = vsub.f32 %v7018_v44, %v8613_v18 }
 0x1dd   : > { %1611 = vmatmul.f32.gmra.mxu3 %v6986_v21  ;;  %2295 = vmatmul.f32.gmra.mxu1 %v6420_v25 }
 0x1de   : > { %v1389_v22 = vand.u32 4294901760, %v1388_v3  ;;  %v8755_v3 = vand.u32 4294901760, %v6367_v2 }
 0x1e1   : > { %v7020_v34 = vpop.f32.mrf.mxu0 }
 0x1e4   : > { %1382 = vmatmul.f32.gmra.mxu2 %v1381_v33  ;;  %2134 = vmatmul.f32.gmra.mxu0 %v6420_v25  ;;  %v7034_v26 = vpop.f32.mrf.mxu1  ;;  %v8754_v33 = vand.u32 4294901760, %v6275_v39 }
 0x1e5   : > { %1615 = vmatmul.f32.gmra.mxu3 %v7007_v48  ;;  %2299 = vmatmul.f32.gmra.mxu1 %v6462_v50 }
 0x1e9   : > { %v7031_v19 = vpop.f32.mrf.mxu0 }
 0x1ec   : > { %1390 = vmatmul.f32.gmra.mxu2 %v1389_v22  ;;  %2138 = vmatmul.f32.gmra.mxu0 %v6462_v50  ;;  %v7046_v50 = vpop.f32.mrf.mxu1 }
 0x1ed   : > { %1863 = vmatmul.f32.vlgmr.msrb.gmra.mxu3 %v8754_v33  ;;  %2303 = vmatmul.f32.gmra.mxu1 %v6494_v46 }
 0x1f0   : > { %v1556_v25 = vpop.f32.mrf.mxu3 }
 0x1f1   : > { %v7041_v17 = vpop.f32.mrf.mxu0 }
 0x1f4   : > { %1669 = vmatmul.f32.vlgmr.msrb.gmra.mxu2 %v6275_v39  ;;  %2142 = vmatmul.f32.gmra.mxu0 %v6494_v46  ;;  %v8757_v39 = vand.u32 4294901760, %v6377_v7  ;;  %v7059_v37 = vpop.f32.mrf.mxu1 }
 0x1f5   : > { %1869 = vmatmul.f32.gmra.mxu3 %v8755_v3  ;;  %2307 = vmatmul.f32.gmra.mxu1 %v6531_v31 }
 0x1f7   : > { %v1271_v22 = vpop.f32.mrf.mxu2 }
 0x1f8   : > { %v7048_v18 = vadd.f32 %v1556_v25, %v1271_v22  ;;  %v1560_v33 = vpop.f32.mrf.mxu3 }
 0x1f9   : > { %v7055_v46 = vpop.f32.mrf.mxu0 }
 0x1fa   : > { %8756 = vst [vmem:[#allocation66_spill] sm:$0xff] %v7048_v18 }
 0x1fc   : > { %1674 = vmatmul.f32.gmra.mxu2 %v6367_v2  ;;  %2146 = vmatmul.f32.gmra.mxu0 %v6531_v31  ;;  %v8759_v2 = vand.u32 4294901760, %v6410_v40 }
 0x1fd   : > { %1875 = vmatmul.f32.gmra.mxu3 %v8757_v39  ;;  %2311 = vmatmul.f32.gmra.mxu1 %v6582_v12 }
 0x1ff   : > { %v1279_v3 = vpop.f32.mrf.mxu2 }
 0x200   : > { %v7057_v36 = vadd.f32 %v1560_v33, %v1279_v3  ;;  %v1564_v44 = vpop.f32.mrf.mxu3  ;;  %v7070_v33 = vpop.f32.mrf.mxu1 }
 0x201   : > { %v7068_v39 = vpop.f32.mrf.mxu0 }
 0x202   : > { %8758 = vst [vmem:[#allocation67_spill] sm:$0xff] %v7057_v36 }
 0x204   : > { %1679 = vmatmul.f32.gmra.mxu2 %v6377_v7  ;;  %2150 = vmatmul.f32.gmra.mxu0 %v6582_v12  ;;  %v8761_v7 = vand.u32 4294901760, %v6447_v42 }
 0x205   : > { %1881 = vmatmul.f32.gmra.mxu3 %v8759_v2  ;;  %2315 = vmatmul.f32.gmra.mxu1 %v6617_v51 }
 0x207   : > { %v1287_v31 = vpop.f32.mrf.mxu2 }
 0x208   : > { %v7066_v25 = vadd.f32 %v1564_v44, %v1287_v31  ;;  %v1568_v22 = vpop.f32.mrf.mxu3  ;;  %v7083_v31 = vpop.f32.mrf.mxu1 }
 0x209   : > { %v7079_v44 = vpop.f32.mrf.mxu0 }
 0x20a   : > { %8760 = vst [vmem:[#allocation68_spill] sm:$0xff] %v7066_v25 }
 0x20c   : > { %1684 = vmatmul.f32.gmra.mxu2 %v6410_v40  ;;  %2154 = vmatmul.f32.gmra.mxu0 %v6617_v51  ;;  %v8763_v40 = vand.u32 4294901760, %v6491_v35 }
 0x20d   : > { %1887 = vmatmul.f32.gmra.mxu3 %v8761_v7  ;;  %2319 = vmatmul.f32.gmra.mxu1 %v6670_v45 }
 0x20f   : > { %v1295_v12 = vpop.f32.mrf.mxu2 }
 0x210   : > { %v7077_v3 = vadd.f32 %v1568_v22, %v1295_v12  ;;  %v1572_v2 = vpop.f32.mrf.mxu3 }
 0x211   : > { %v7092_v22 = vpop.f32.mrf.mxu0 }
 0x212   : > { %8762 = vst [vmem:[#allocation69_spill] sm:$0xff] %v7077_v3 }
 0x214   : > { %1689 = vmatmul.f32.gmra.mxu2 %v6447_v42  ;;  %2158 = vmatmul.f32.gmra.mxu0 %v6670_v45  ;;  %v8765_v42 = vand.u32 4294901760, %v6515_v59  ;;  %v7097_v45 = vpop.f32.mrf.mxu1 }
 0x215   : > { %1893 = vmatmul.f32.gmra.mxu3 %v8763_v40  ;;  %2323 = vmatmul.f32.gmra.mxu1 %v6718_v14 }
 0x217   : > { %v1303_v51 = vpop.f32.mrf.mxu2 }
 0x218   : > { %v7088_v7 = vadd.f32 %v1572_v2, %v1303_v51  ;;  %v1576_v25 = vpop.f32.mrf.mxu3 }
 0x21a   : > { %8764 = vst [vmem:[#allocation70_spill] sm:$0xff] %v7088_v7 }
 0x21c   : > { %1694 = vmatmul.f32.gmra.mxu2 %v6491_v35  ;;  %2162 = vmatmul.f32.gmra.mxu0 %v6718_v14  ;;  %v8767_v35 = vand.u32 4294901760, %v6558_v54  ;;  %v7106_v14 = vpop.f32.mrf.mxu0  ;;  %v7110_v7 = vpop.f32.mrf.mxu1 }
 0x21d   : > { %1899 = vmatmul.f32.gmra.mxu3 %v8765_v42  ;;  %2327 = vmatmul.f32.gmra.mxu1 %v6728_v38 }
 0x21f   : > { %v1311_v12 = vpop.f32.mrf.mxu2 }
 0x220   : > { %v7099_v40 = vadd.f32 %v1576_v25, %v1311_v12  ;;  %v1580_v3 = vpop.f32.mrf.mxu3 }
 0x222   : > { %8766 = vst [vmem:[#allocation71_spill] sm:$0xff] %v7099_v40 }
 0x224   : > { %1699 = vmatmul.f32.gmra.mxu2 %v6515_v59  ;;  %2166 = vmatmul.f32.gmra.mxu0 %v6728_v38  ;;  %v8769_v59 = vand.u32 4294901760, %v6607_v10 }
 0x225   : > { %1905 = vmatmul.f32.gmra.mxu3 %v8767_v35  ;;  %2331 = vmatmul.f32.gmra.mxu1 %v6788_v55  ;;  %v7119_v35 = vpop.f32.mrf.mxu0 }
 0x227   : > { %v1319_v2 = vpop.f32.mrf.mxu2 }
 0x228   : > { %v7108_v51 = vadd.f32 %v1580_v3, %v1319_v2  ;;  %v1584_v42 = vpop.f32.mrf.mxu3  ;;  %v7121_v3 = vpop.f32.mrf.mxu1 }
 0x22a   : > { %8768 = vst [vmem:[#allocation72_spill] sm:$0xff] %v7108_v51 }
 0x22c   : > { %1704 = vmatmul.f32.gmra.mxu2 %v6558_v54  ;;  %2170 = vmatmul.f32.gmra.mxu0 %v6788_v55  ;;  %v8771_v54 = vld [vmem:[#allocation40_spill] sm:$0xff] }
 0x22d   : > { %1911 = vmatmul.f32.gmra.mxu3 %v8769_v59  ;;  %2335 = vmatmul.f32.gmra.mxu1 %v6832_v52  ;;  %v8772_v2 = vand.u32 4294901760, %v8771_v54 }
 0x22f   : > { %v1327_v38 = vpop.f32.mrf.mxu2 }
 0x230   : > { %v7117_v25 = vadd.f32 %v1584_v42, %v1327_v38  ;;  %v1588_v12 = vpop.f32.mrf.mxu3  ;;  %v7130_v42 = vpop.f32.mrf.mxu0 }
 0x231   : > { %8774 = vst [vmem:[#allocation74_spill] sm:$0xff] %v7130_v42  ;;  %v7134_v38 = vpop.f32.mrf.mxu1 }
 0x232   : > { %8770 = vst [vmem:[#allocation73_spill] sm:$0xff] %v7117_v25 }
 0x233   : > { %8775 = vst [vmem:[#allocation75_spill] sm:$0xff] %v7134_v38 }
 0x234   : > { %1709 = vmatmul.f32.gmra.mxu2 %v6607_v10  ;;  %2174 = vmatmul.f32.gmra.mxu0 %v6832_v52  ;;  %v8776_v10 = vld [vmem:[#allocation46_spill] sm:$0xff]  ;;  %v8778_v52 = vld [vmem:[#allocation28_spill] sm:$0xff] }
 0x235   : > { %1917 = vmatmul.f32.gmra.mxu3 %v8772_v2  ;;  %2339 = vmatmul.f32.gmra.mxu1 %v6866_v56  ;;  %v8777_v25 = vand.u32 4294901760, %v8776_v10 }
 0x237   : > { %v1335_v55 = vpop.f32.mrf.mxu2 }
 0x238   : > { %v7128_v59 = vadd.f32 %v1588_v12, %v1335_v55  ;;  %v1592_v51 = vpop.f32.mrf.mxu3  ;;  %v7143_v12 = vpop.f32.mrf.mxu0 }
 0x239   : > { %8780 = vst [vmem:[#allocation28_spill] sm:$0xff] %v7143_v12  ;;  %v7148_v55 = vpop.f32.mrf.mxu1 }
 0x23a   : > { %8773 = vst [vmem:[#allocation40_spill] sm:$0xff] %v7128_v59 }
 0x23c   : > { %1714 = vmatmul.f32.gmra.mxu2 %v8771_v54  ;;  %2178 = vmatmul.f32.gmra.mxu0 %v6866_v56  ;;  %v8781_v54 = vand.u32 4294901760, %v6737_v1  ;;  %v8782_v56 = vld [vmem:[#allocation29_spill] sm:$0xff] }
 0x23d   : > { %1923 = vmatmul.f32.gmra.mxu3 %v8777_v25  ;;  %2343 = vmatmul.f32.gmra.mxu1 %v8778_v52  ;;  %8783 = vst [vmem:[#allocation29_spill] sm:$0xff] %v7148_v55 }
 0x23f   : > { %v1343_v2 = vpop.f32.mrf.mxu2 }
 0x240   : > { %v7139_v40 = vadd.f32 %v1592_v51, %v1343_v2  ;;  %v1596_v36 = vpop.f32.mrf.mxu3  ;;  %v8785_v51 = vand.u32 4294901760, %v6775_v9 }
 0x241   : > { %v7161_v55 = vpop.f32.mrf.mxu1 }
 0x242   : > { %8779 = vst [vmem:[#allocation46_spill] sm:$0xff] %v7139_v40 }
 0x243   : > { %8789 = vst [vmem:[#allocation78_spill] sm:$0xff] %v7161_v55 }
 0x244   : > { %1719 = vmatmul.f32.gmra.mxu2 %v8776_v10  ;;  %2182 = vmatmul.f32.gmra.mxu0 %v8778_v52  ;;  %v8786_v10 = vld [vmem:[#allocation34_spill] sm:$0xff]  ;;  %v7157_v52 = vpop.f32.mrf.mxu0 }
 0x245   : > { %1929 = vmatmul.f32.gmra.mxu3 %v8781_v54  ;;  %2347 = vmatmul.f32.gmra.mxu1 %v8782_v56  ;;  %8787 = vst [vmem:[#allocation34_spill] sm:$0xff] %v7157_v52 }
 0x247   : > { %v1351_v25 = vpop.f32.mrf.mxu2 }
 0x248   : > { %v7150_v59 = vadd.f32 %v1596_v36, %v1351_v25  ;;  %v1600_v18 = vpop.f32.mrf.mxu3  ;;  %v8791_v36 = vld [vmem:[#allocation38_spill] sm:$0xff] }
 0x249   : > { %v2280_v52 = vpop.f32.mrf.mxu1 }
 0x24a   : > { %8784 = vst [vmem:[#allocation76_spill] sm:$0xff] %v7150_v59 }
 0x24c   : > { %1724 = vmatmul.f32.gmra.mxu2 %v6737_v1  ;;  %2186 = vmatmul.f32.gmra.mxu0 %v8782_v56  ;;  %v8790_v1 = vand.u32 4294901760, %v6819_v24  ;;  %v2119_v59 = vpop.f32.mrf.mxu0 }
 0x24d   : > { %1935 = vmatmul.f32.gmra.mxu3 %v8785_v51  ;;  %2351 = vmatmul.f32.gmra.mxu1 %v8786_v10 }
 0x24f   : > { %v1359_v2 = vpop.f32.mrf.mxu2 }
 0x250   : > { %v7159_v54 = vadd.f32 %v1600_v18, %v1359_v2  ;;  %v1604_v40 = vpop.f32.mrf.mxu3  ;;  %v8793_v18 = vand.u32 4294901760, %v6859_v61 }
 0x252   : > { %8788 = vst [vmem:[#allocation77_spill] sm:$0xff] %v7159_v54 }
 0x254   : > { %1729 = vmatmul.f32.gmra.mxu2 %v6775_v9  ;;  %2190 = vmatmul.f32.gmra.mxu0 %v8786_v10  ;;  %v8794_v9 = vld [vmem:[#allocation43_spill] sm:$0xff]  ;;  %v2123_v54 = vpop.f32.mrf.mxu0 }
 0x255   : > { %1941 = vmatmul.f32.gmra.mxu3 %v8790_v1  ;;  %2355 = vmatmul.f32.gmra.mxu1 %v8791_v36 }
 0x257   : > { %v1367_v56 = vpop.f32.mrf.mxu2 }
 0x258   : > { %v7168_v25 = vadd.f32 %v1604_v40, %v1367_v56  ;;  %v1608_v51 = vpop.f32.mrf.mxu3  ;;  %v2284_v40 = vpop.f32.mrf.mxu1  ;;  %v8796_v56 = vand.u32 4294901760, %v6893_v43 }
 0x25a   : > { %8792 = vst [vmem:[#allocation38_spill] sm:$0xff] %v7168_v25 }
 0x25c   : > { %1734 = vmatmul.f32.gmra.mxu2 %v6819_v24  ;;  %2194 = vmatmul.f32.gmra.mxu0 %v8791_v36 }
 0x25d   : > { %1947 = vmatmul.f32.gmra.mxu3 %v8793_v18  ;;  %2359 = vmatmul.f32.gmra.mxu1 %v8794_v9 }
 0x25f   : > { %v1375_v10 = vpop.f32.mrf.mxu2 }
 0x260   : > { %v7175_v2 = vadd.f32 %v1608_v51, %v1375_v10  ;;  %v1612_v1 = vpop.f32.mrf.mxu3  ;;  %v7186_v51 = vpop.f32.mrf.mxu0  ;;  %v8798_v10 = vld [vmem:[#allocation31_spill] sm:$0xff] }
 0x262   : > { %8795 = vst [vmem:[#allocation43_spill] sm:$0xff] %v7175_v2 }
 0x264   : > { %1739 = vmatmul.f32.gmra.mxu2 %v6859_v61  ;;  %2198 = vmatmul.f32.gmra.mxu0 %v8794_v9  ;;  %v8799_v61 = vand.u32 4294901760, %v8798_v10  ;;  %v7191_v9 = vpop.f32.mrf.mxu1 }
 0x265   : > { %1953 = vmatmul.f32.gmra.mxu3 %v8796_v56  ;;  %2363 = vmatmul.f32.gmra.mxu1 %v6721_v53 }
 0x267   : > { %v1383_v24 = vpop.f32.mrf.mxu2 }
 0x268   : > { %v7182_v36 = vadd.f32 %v1612_v1, %v1383_v24  ;;  %v1616_v18 = vpop.f32.mrf.mxu3  ;;  %v7202_v24 = vpop.f32.mrf.mxu0 }
 0x26a   : > { %8797 = vst [vmem:[#allocation79_spill] sm:$0xff] %v7182_v36  ;;  %v8803_v36 = vld [vmem:[#allocation18_spill] sm:$0xff] }
 0x26b   : > { %v2503_v55 = vsub.f32 0.0, %v8803_v36 }
 0x26c   : > { %1744 = vmatmul.f32.gmra.mxu2 %v6893_v43  ;;  %2202 = vmatmul.f32.gmra.mxu0 %v6721_v53  ;;  %v8801_v43 = vld [vmem:[#allocation33_spill] sm:$0xff]  ;;  %v1493_v53 = vadd.f32 %v6926_v15, %v6939_v28  ;;  %v1497_v15 = vadd.f32 %v6948_v30, %v6961_v60 }
 0x26d   : > { %1959 = vmatmul.f32.gmra.mxu3 %v8799_v61  ;;  %2367 = vmatmul.f32.gmra.mxu1 %v6779_v0  ;;  %v8802_v1 = vand.u32 4294901760, %v8801_v43  ;;  %v2535_v12 = vmul.f32 1.442695, %v2503_v55  ;;  %v8807_v30 = vld [vmem:[#allocation41_spill] sm:$0xff] }
 0x26e   : > { %v8808_v60 = vand.u32 4294901760, %v8807_v30 }
 0x26f   : > { %v1391_v56 = vpop.f32.mrf.mxu2  ;;  %5109 = vpow2.f32 %v2535_v12 }
 0x270   : > { %v7193_v2 = vadd.f32 %v1616_v18, %v1391_v56  ;;  %v1864_v25 = vpop.f32.mrf.mxu3 }
 0x272   : > { %8800 = vst [vmem:[#allocation31_spill] sm:$0xff] %v7193_v2  ;;  %v7205_v2 = vpop.f32.mrf.mxu1 }
 0x274   : > { %1749 = vmatmul.f32.gmra.mxu2 %v8798_v10  ;;  %2206 = vmatmul.f32.gmra.mxu0 %v6779_v0 }
 0x275   : > { %1965 = vmatmul.f32.gmra.mxu3 %v8802_v1  ;;  %2371 = vmatmul.f32.gmra.mxu1 %v6799_v58  ;;  %v8804_v1 = vld [vmem:[#allocation37_spill] sm:$0xff]  ;;  %v5110_v12 = vpop.eup %5109 }
 0x276   : > { %v8805_v38 = vand.u32 4294901760, %v8804_v1 }
 0x277   : > { %v1670_v61 = vpop.f32.mrf.mxu2 }
 0x278   : > { %v1671_v18 = vadd.f32 %v1670_v61, %v1493_v53  ;;  %v1870_v56 = vpop.f32.mrf.mxu3  ;;  %v8806_v53 = vld [vmem:[#allocation20_spill] sm:$0xff] }
 0x27a   : > { %v1865_v10 = vadd.f32 %v1864_v25, %v1671_v18  ;;  %v2504_v25 = vsub.f32 0.0, %v8806_v53 }
 0x27c   : > { %v2120_v0 = vadd.f32 %v2119_v59, %v1865_v10  ;;  %1754 = vmatmul.f32.gmra.mxu2 %v8801_v43  ;;  %2210 = vmatmul.f32.gmra.mxu0 %v6799_v58  ;;  %v7215_v43 = vpop.f32.mrf.mxu0  ;;  %v7217_v10 = vpop.f32.mrf.mxu1 }
 0x27d   : > { %1971 = vmatmul.f32.gmra.mxu3 %v8805_v38  ;;  %2375 = vmatmul.f32.gmra.mxu1 %v6835_v29  ;;  %v2537_v38 = vmul.f32 1.442695, %v2504_v25 }
 0x27e   : > { %v2281_v28 = vadd.f32 %v2280_v52, %v2120_v0  ;;  %v1501_v52 = vadd.f32 %v6981_v32, %v6983_v16 }
 0x27f   : > { %v1675_v36 = vpop.f32.mrf.mxu2 }
 0x280   : > { %v2407_v55 = vsub.f32 0.0, %v2281_v28  ;;  %v1676_v59 = vadd.f32 %v1675_v36, %v1497_v15  ;;  %v1876_v61 = vpop.f32.mrf.mxu3  ;;  %v8809_v15 = vld [vmem:[#allocation19_spill] sm:$0xff] }
 0x281   : > { %v2505_v28 = vsub.f32 0.0, %v8809_v15 }
 0x282   : > { %v2439_v18 = vmul.f32 1.442695, %v2407_v55  ;;  %v1871_v58 = vadd.f32 %v1870_v56, %v1676_v59  ;;  %v2695_v59 = vld [vmem:[%s7228_s14 + $0x100] sm:$0xff] }
 0x283   : > { %v2539_v16 = vmul.f32 1.442695, %v2505_v28 }
 0x284   : > { %5111 = vpow2.f32 %v2439_v18  ;;  %v2124_v42 = vadd.f32 %v2123_v54, %v1871_v58  ;;  %1759 = vmatmul.f32.gmra.mxu2 %v8804_v1  ;;  %2214 = vmatmul.f32.gmra.mxu0 %v6835_v29  ;;  %v2599_v1 = vsub.f32 1.0, %v5110_v12  ;;  %v2663_v18 = vld [vmem:[%s7228_s14] sm:$0xff]  ;;  %v7232_v58 = vpop.f32.mrf.mxu0 }
 0x285   : > { %1977 = vmatmul.f32.gmra.mxu3 %v8808_v60  ;;  %2379 = vmatmul.f32.gmra.mxu1 %v6871_v6  ;;  %5113 = vpow2.f32 %v2537_v38 }
 0x286   : > { %v2285_v56 = vadd.f32 %v2284_v40, %v2124_v42  ;;  %v7237_v40 = vpop.f32.mrf.mxu1 }
 0x287   : > { %v1680_v0 = vpop.f32.mrf.mxu2 }
 0x288   : > { %v2408_v36 = vsub.f32 0.0, %v2285_v56  ;;  %v1681_v54 = vadd.f32 %v1680_v0, %v1501_v52  ;;  %v1882_v53 = vpop.f32.mrf.mxu3  ;;  %v1505_v56 = vadd.f32 %v7002_v11, %v7004_v57  ;;  %v2727_v11 = vld [vmem:[%s7228_s14 + $0x200] sm:$0xff] }
 0x28a   : > { %v5112_v25 = vpop.eup %5111  ;;  %v2441_v29 = vmul.f32 1.442695, %v2408_v36  ;;  %v1877_v55 = vadd.f32 %v1876_v61, %v1681_v54  ;;  %v8810_v61 = vld [vmem:[#allocation47_spill] sm:$0xff] }
 0x28b   : > { %v2631_v32 = vmul.f32 %v5112_v25, %v2599_v1  ;;  %v8811_v38 = vand.u32 4294901760, %v8810_v61  ;;  %v5114_v52 = vpop.eup %5113 }
 0x28c   : > { %5115 = vpow2.f32 %v2441_v29  ;;  %v2128_v42 = vadd.f32 %v7186_v51, %v1877_v55  ;;  %1764 = vmatmul.f32.gmra.mxu2 %v8807_v30  ;;  %2218 = vmatmul.f32.gmra.mxu0 %v6871_v6  ;;  %v8812_v6 = vld [vmem:[#allocation21_spill] sm:$0xff]  ;;  %v2600_v54 = vsub.f32 1.0, %v5114_v52  ;;  %v2696_v55 = vld [vmem:[%s7228_s14 + $0x108] sm:$0xff] }
 0x28d   : > { %1983 = vmatmul.f32.gmra.mxu3 %v8811_v38  ;;  %2383 = vmatmul.f32.gmra.mxu1 %v6901_v27  ;;  %v2791_v60 = vmul.f32 %v2695_v59, %v2631_v32  ;;  %v2759_v12 = vmul.f32 %v2663_v18, %v2631_v32  ;;  %v2506_v0 = vsub.f32 0.0, %v8812_v6  ;;  %5117 = vpow2.f32 %v2539_v16  ;;  %v2664_v59 = vld [vmem:[%s7228_s14 + $0x8] sm:$0xff]  ;;  %v7252_v16 = vpop.f32.mrf.mxu0 }
 0x28e   : > { %v2289_v51 = vadd.f32 %v7191_v9, %v2128_v42  ;;  %v8813_v42 = vand.u32 4294901760, %v6747_v5 }
 0x28f   : > { %v1685_v30 = vpop.f32.mrf.mxu2  ;;  %2919 = vadd.xlane.f32.xlu2 %v2791_v60  ;;  %2855 = vadd.xlane.f32.xlu1 %v2759_v12  ;;  %v2541_v57 = vmul.f32 1.442695, %v2506_v0  ;;  %v1509_v12 = vadd.f32 %v7023_v13, %v7020_v34 }
 0x290   : > { %v2409_v15 = vsub.f32 0.0, %v2289_v51  ;;  %v1686_v28 = vadd.f32 %v1685_v30, %v1505_v56  ;;  %v1888_v36 = vpop.f32.mrf.mxu3  ;;  %v8814_v56 = vld [vmem:[#allocation22_spill] sm:$0xff] }
 0x291   : > { %v2507_v51 = vsub.f32 0.0, %v8814_v56  ;;  %v2730_v56 = vld [vmem:[%s7228_s14 + $0x218] sm:$0xff] }
 0x292   : > { %v5116_v1 = vpop.eup %5115  ;;  %v2443_v25 = vmul.f32 1.442695, %v2409_v15  ;;  %v1883_v29 = vadd.f32 %v1882_v53, %v1686_v28  ;;  %v2665_v28 = vld [vmem:[%s7228_s14 + $0x10] sm:$0xff] }
 0x293   : > { %v2632_v18 = vmul.f32 %v5116_v1, %v2600_v54  ;;  %v5118_v60 = vpop.eup %5117  ;;  %v2697_v54 = vld [vmem:[%s7228_s14 + $0x110] sm:$0xff] }
 0x294   : > { %5119 = vpow2.f32 %v2443_v25  ;;  %v2132_v9 = vadd.f32 %v7202_v24, %v1883_v29  ;;  %1769 = vmatmul.f32.gmra.mxu2 %v8810_v61  ;;  %2222 = vmatmul.f32.gmra.mxu0 %v6901_v27  ;;  %v2823_v24 = vmul.f32 %v2727_v11, %v2631_v32  ;;  %v7260_v61 = vpop.f32.mrf.mxu1  ;;  %v2601_v15 = vsub.f32 1.0, %v5118_v60  ;;  %v2728_v32 = vld [vmem:[%s7228_s14 + $0x208] sm:$0xff] }
 0x295   : > { %1989 = vmatmul.f32.gmra.mxu3 %v8813_v42  ;;  %2387 = vmatmul.f32.gmra.mxu1 %v6921_v49  ;;  %v2792_v53 = vmul.f32 %v2696_v55, %v2632_v18  ;;  %v2760_v38 = vmul.f32 %v2664_v59, %v2632_v18  ;;  %5121 = vpow2.f32 %v2541_v57  ;;  %v2543_v25 = vmul.f32 1.442695, %v2507_v51 }
 0x296   : > { %v2293_v52 = vadd.f32 %v7205_v2, %v2132_v9  ;;  %v8815_v55 = vand.u32 4294901760, %v6796_v62  ;;  %v2824_v11 = vmul.f32 %v2728_v32, %v2632_v18  ;;  %v1513_v9 = vadd.f32 %v7034_v26, %v7031_v19 }
 0x297   : > { %v1690_v27 = vpop.f32.mrf.mxu2  ;;  %2921 = vadd.xlane.f32.xlu0 %v2792_v53  ;;  %2857 = vadd.xlane.f32.xlu2 %v2760_v38 }
 0x298   : > { %v2410_v30 = vsub.f32 0.0, %v2293_v52  ;;  %v1691_v6 = vadd.f32 %v1690_v27, %v1509_v12  ;;  %v1894_v0 = vpop.f32.mrf.mxu3  ;;  %2983 = vadd.xlane.f32.xlu1 %v2823_v24  ;;  %v2729_v24 = vld [vmem:[%s7228_s14 + $0x210] sm:$0xff]  ;;  %v2666_v27 = vld [vmem:[%s7228_s14 + $0x18] sm:$0xff] }
 0x29a   : > { %v5120_v34 = vpop.eup %5119  ;;  %v2445_v13 = vmul.f32 1.442695, %v2410_v30  ;;  %v1889_v2 = vadd.f32 %v1888_v36, %v1691_v6 }
 0x29b   : > { %v2633_v1 = vmul.f32 %v5120_v34, %v2601_v15  ;;  %v5122_v57 = vpop.eup %5121  ;;  %v8817_v15 = vand.u32 4294901760, %v6827_v47 }
 0x29c   : > { %5123 = vpow2.f32 %v2445_v13  ;;  %v2136_v29 = vadd.f32 %v7215_v43, %v1889_v2  ;;  %1774 = vmatmul.f32.gmra.mxu2 %v6747_v5  ;;  %2226 = vmatmul.f32.gmra.mxu0 %v6921_v49  ;;  %v7275_v43 = vpop.f32.mrf.mxu0  ;;  %v8816_v49 = vld [vmem:[#allocation23_spill] sm:$0xff]  ;;  %v7278_v12 = vpop.f32.mrf.mxu1  ;;  %v2602_v19 = vsub.f32 1.0, %v5122_v57 }
 0x29d   : > { %1995 = vmatmul.f32.gmra.mxu3 %v8815_v55  ;;  %2391 = vmatmul.f32.gmra.mxu1 %v6942_v20  ;;  %v2761_v59 = vmul.f32 %v2665_v28, %v2633_v1  ;;  %v2793_v36 = vmul.f32 %v2697_v54, %v2633_v1  ;;  %5125 = vpow2.f32 %v2543_v25  ;;  %v2508_v53 = vsub.f32 0.0, %v8816_v49  ;;  %v8819_v49 = vld [vmem:[#allocation56_spill] sm:$0xff] }
 0x29e   : > { %v2297_v42 = vadd.f32 %v7217_v10, %v2136_v29  ;;  %v2825_v34 = vmul.f32 %v2729_v24, %v2633_v1  ;;  %v1517_v28 = vadd.f32 %v7046_v50, %v7041_v17 }
 0x29f   : > { %v1695_v5 = vpop.f32.mrf.mxu2  ;;  %2859 = vadd.xlane.f32.xlu0 %v2761_v59  ;;  %2985 = vadd.xlane.f32.xlu2 %v2824_v11  ;;  %v2545_v30 = vmul.f32 1.442695, %v2508_v53  ;;  %v2699_v11 = vld [vmem:[%s7228_s14 + $0x120] sm:$0xff]  ;;  %v8820_v53 = vand.u32 4294901760, %v8819_v49 }
 0x2a0   : > { %v2411_v38 = vsub.f32 0.0, %v2297_v42  ;;  %v1696_v18 = vadd.f32 %v1695_v5, %v1513_v9  ;;  %v1900_v60 = vpop.f32.mrf.mxu3  ;;  %2923 = vadd.xlane.f32.xlu1 %v2793_v36  ;;  %v2667_v36 = vld [vmem:[%s7228_s14 + $0x20] sm:$0xff] }
 0x2a2   : > { %v5124_v26 = vpop.eup %5123  ;;  %v2447_v10 = vmul.f32 1.442695, %v2411_v38  ;;  %v1895_v52 = vadd.f32 %v1894_v0, %v1696_v18 }
 0x2a3   : > { %v2634_v51 = vmul.f32 %v5124_v26, %v2602_v19  ;;  %v5126_v2 = vpop.eup %5125  ;;  %v1521_v26 = vadd.f32 %v7059_v37, %v7055_v46  ;;  %v2731_v37 = vld [vmem:[%s7228_s14 + $0x220] sm:$0xff]  ;;  %v2700_v46 = vld [vmem:[%s7228_s14 + $0x128] sm:$0xff] }
 0x2a4   : > { %5127 = vpow2.f32 %v2447_v10  ;;  %v2140_v6 = vadd.f32 %v7232_v58, %v1895_v52  ;;  %1779 = vmatmul.f32.gmra.mxu2 %v6796_v62  ;;  %2230 = vmatmul.f32.gmra.mxu0 %v6942_v20  ;;  %v8818_v62 = vld [vmem:[#allocation24_spill] sm:$0xff]  ;;  %v7293_v29 = vpop.f32.mrf.mxu0  ;;  %v2603_v55 = vsub.f32 1.0, %v5126_v2  ;;  %v7298_v57 = vpop.f32.mrf.mxu1 }
 0x2a5   : > { %2001 = vmatmul.f32.gmra.mxu3 %v8817_v15  ;;  %2395 = vmatmul.f32.gmra.mxu1 %v6964_v41  ;;  %v2762_v13 = vmul.f32 %v2666_v27, %v2634_v51  ;;  %v2826_v0 = vmul.f32 %v2730_v56, %v2634_v51  ;;  %5129 = vpow2.f32 %v2545_v30  ;;  %v2509_v20 = vsub.f32 0.0, %v8818_v62  ;;  %v2732_v15 = vld [vmem:[%s7228_s14 + $0x228] sm:$0xff] }
 0x2a6   : > { %v2301_v32 = vadd.f32 %v7237_v40, %v2140_v6  ;;  %v2698_v40 = vld [vmem:[%s7228_s14 + $0x118] sm:$0xff] }
 0x2a7   : > { %v1700_v58 = vpop.f32.mrf.mxu2  ;;  %2987 = vadd.xlane.f32.xlu0 %v2825_v34  ;;  %2861 = vadd.xlane.f32.xlu2 %v2762_v13  ;;  %v2547_v42 = vmul.f32 1.442695, %v2509_v20  ;;  %v2794_v18 = vmul.f32 %v2698_v40, %v2634_v51 }
 0x2a8   : > { %v2412_v54 = vsub.f32 0.0, %v2301_v32  ;;  %v1701_v25 = vadd.f32 %v1700_v58, %v1517_v28  ;;  %v1906_v1 = vpop.f32.mrf.mxu3  ;;  %2989 = vadd.xlane.f32.xlu1 %v2826_v0  ;;  %v8822_v28 = vand.u32 4294901760, %v6897_v8 }
 0x2aa   : > { %v5128_v59 = vpop.eup %5127  ;;  %v2449_v17 = vmul.f32 1.442695, %v2412_v54  ;;  %v1901_v50 = vadd.f32 %v1900_v60, %v1701_v25  ;;  %v1525_v54 = vadd.f32 %v7070_v33, %v7068_v39  ;;  %v8823_v25 = vld [vmem:[#allocation30_spill] sm:$0xff]  ;;  %v2668_v39 = vld [vmem:[%s7228_s14 + $0x28] sm:$0xff]  ;;  %v2733_v33 = vld [vmem:[%s7228_s14 + $0x230] sm:$0xff] }
 0x2ab   : > { %v2635_v9 = vmul.f32 %v5128_v59, %v2603_v55  ;;  %v5130_v19 = vpop.eup %5129 }
 0x2ac   : > { %5131 = vpow2.f32 %v2449_v17  ;;  %v2144_v5 = vadd.f32 %v7252_v16, %v1901_v50  ;;  %1784 = vmatmul.f32.gmra.mxu2 %v6827_v47  ;;  %2234 = vmatmul.f32.gmra.mxu0 %v6964_v41  ;;  %v8821_v41 = vld [vmem:[#allocation25_spill] sm:$0xff]  ;;  %v2604_v56 = vsub.f32 1.0, %v5130_v19  ;;  %v7313_v34 = vpop.f32.mrf.mxu0  ;;  %v7318_v2 = vpop.f32.mrf.mxu1 }
 0x2ad   : > { %2007 = vmatmul.f32.gmra.mxu3 %v8820_v53  ;;  %2399 = vmatmul.f32.gmra.mxu1 %v6986_v21  ;;  %v2795_v38 = vmul.f32 %v2699_v11, %v2635_v9  ;;  %v2763_v60 = vmul.f32 %v2667_v36, %v2635_v9  ;;  %v2510_v10 = vsub.f32 0.0, %v8821_v41  ;;  %5133 = vpow2.f32 %v2547_v42  ;;  %v8824_v53 = vld [vmem:[#allocation59_spill] sm:$0xff] }
 0x2ae   : > { %v2305_v16 = vadd.f32 %v7260_v61, %v2144_v5  ;;  %v2827_v58 = vmul.f32 %v2731_v37, %v2635_v9  ;;  %v2669_v9 = vld [vmem:[%s7228_s14 + $0x30] sm:$0xff] }
 0x2af   : > { %v1705_v47 = vpop.f32.mrf.mxu2  ;;  %2927 = vadd.xlane.f32.xlu0 %v2795_v38  ;;  %2925 = vadd.xlane.f32.xlu2 %v2794_v18  ;;  %v2549_v13 = vmul.f32 1.442695, %v2510_v10  ;;  %v8825_v38 = vand.u32 4294901760, %v8824_v53 }
 0x2b0   : > { %v2413_v52 = vsub.f32 0.0, %v2305_v16  ;;  %v1706_v24 = vadd.f32 %v1705_v47, %v1521_v26  ;;  %v1912_v27 = vpop.f32.mrf.mxu3  ;;  %2863 = vadd.xlane.f32.xlu1 %v2763_v60  ;;  %v1529_v16 = vadd.f32 %v7083_v31, %v7079_v44  ;;  %v2702_v31 = vld [vmem:[%s7228_s14 + $0x138] sm:$0xff] }
 0x2b2   : > { %v5132_v51 = vpop.eup %5131  ;;  %v2451_v30 = vmul.f32 1.442695, %v2413_v52  ;;  %v1907_v6 = vadd.f32 %v1906_v1, %v1706_v24  ;;  %v2511_v1 = vsub.f32 0.0, %v8823_v25 }
 0x2b3   : > { %v2636_v61 = vmul.f32 %v5132_v51, %v2604_v56  ;;  %v5134_v20 = vpop.eup %5133 }
 0x2b4   : > { %5135 = vpow2.f32 %v2451_v30  ;;  %v2148_v0 = vadd.f32 %v7275_v43, %v1907_v6  ;;  %1789 = vmatmul.f32.gmra.mxu2 %v8819_v49  ;;  %2238 = vmatmul.f32.gmra.mxu0 %v6986_v21  ;;  %v2605_v50 = vsub.f32 1.0, %v5134_v20  ;;  %v2159_v49 = vpop.f32.mrf.mxu0  ;;  %v2701_v30 = vld [vmem:[%s7228_s14 + $0x130] sm:$0xff] }
 0x2b5   : > { %2013 = vmatmul.f32.gmra.mxu3 %v8822_v28  ;;  %2403 = vmatmul.f32.gmra.mxu1 %v7007_v48  ;;  %v2828_v32 = vmul.f32 %v2732_v15, %v2636_v61  ;;  %v2796_v62 = vmul.f32 %v2700_v46, %v2636_v61  ;;  %5137 = vpow2.f32 %v2549_v13  ;;  %v2764_v60 = vmul.f32 %v2668_v39, %v2636_v61 }
 0x2b6   : > { %v2309_v43 = vadd.f32 %v7278_v12, %v2148_v0  ;;  %v2551_v12 = vmul.f32 1.442695, %v2511_v1  ;;  %v8827_v46 = vand.u32 4294901760, %v6937_v4 }
 0x2b7   : > { %v1710_v21 = vpop.f32.mrf.mxu2  ;;  %2993 = vadd.xlane.f32.xlu0 %v2828_v32  ;;  %2991 = vadd.xlane.f32.xlu2 %v2827_v58  ;;  %v1533_v32 = vadd.f32 %v7097_v45, %v7092_v22 }
 0x2b8   : > { %v2414_v55 = vsub.f32 0.0, %v2309_v43  ;;  %v1711_v59 = vadd.f32 %v1710_v21, %v1525_v54  ;;  %v1918_v17 = vpop.f32.mrf.mxu3  ;;  %2929 = vadd.xlane.f32.xlu1 %v2796_v62 }
 0x2ba   : > { %v5136_v11 = vpop.eup %5135  ;;  %v2453_v40 = vmul.f32 1.442695, %v2414_v55  ;;  %v1913_v36 = vadd.f32 %v1912_v27, %v1711_v59 }
 0x2bb   : > { %v2637_v42 = vmul.f32 %v5136_v11, %v2605_v50  ;;  %v5138_v26 = vpop.eup %5137  ;;  %v2703_v50 = vld [vmem:[%s7228_s14 + $0x140] sm:$0xff] }
 0x2bc   : > { %5139 = vpow2.f32 %v2453_v40  ;;  %v2152_v5 = vadd.f32 %v7293_v29, %v1913_v36  ;;  %1794 = vmatmul.f32.gmra.mxu2 %v6897_v8  ;;  %2242 = vmatmul.f32.gmra.mxu0 %v7007_v48  ;;  %v2320_v29 = vpop.f32.mrf.mxu1  ;;  %v8826_v48 = vld [vmem:[#allocation35_spill] sm:$0xff]  ;;  %v2606_v27 = vsub.f32 1.0, %v5138_v26  ;;  %v2163_v62 = vpop.f32.mrf.mxu0 }
 0x2bd   : > { %2019 = vmatmul.f32.gmra.mxu3 %v8825_v38  ;;  %v2765_v18 = vmul.f32 %v2669_v9, %v2637_v42  ;;  %v2829_v19 = vmul.f32 %v2733_v33, %v2637_v42  ;;  %5141 = vpow2.f32 %v2551_v12  ;;  %v2512_v41 = vsub.f32 0.0, %v8826_v48 }
 0x2be   : > { %v2313_v47 = vadd.f32 %v7298_v57, %v2152_v5  ;;  %v2670_v57 = vld [vmem:[%s7228_s14 + $0x38] sm:$0xff]  ;;  %v2797_v13 = vmul.f32 %v2701_v30, %v2637_v42  ;;  %v8829_v9 = vand.u32 4294901760, %v6959_v63  ;;  %v1537_v5 = vadd.f32 %v7110_v7, %v7106_v14  ;;  %v2672_v7 = vld [vmem:[%s7228_s14 + $0x48] sm:$0xff]  ;;  %v2671_v14 = vld [vmem:[%s7228_s14 + $0x40] sm:$0xff] }
 0x2bf   : > { %v1715_v8 = vpop.f32.mrf.mxu2  ;;  %2867 = vadd.xlane.f32.xlu0 %v2765_v18  ;;  %2865 = vadd.xlane.f32.xlu2 %v2764_v60  ;;  %v2553_v15 = vmul.f32 1.442695, %v2512_v41  ;;  %v1541_v30 = vadd.f32 %v7121_v3, %v7119_v35  ;;  %v2673_v35 = vld [vmem:[%s7228_s14 + $0x50] sm:$0xff] }
 0x2c0   : > { %v2415_v10 = vsub.f32 0.0, %v2313_v47  ;;  %v1716_v52 = vadd.f32 %v1715_v8, %v1529_v16  ;;  %v1924_v24 = vpop.f32.mrf.mxu3  ;;  %2995 = vadd.xlane.f32.xlu1 %v2829_v19 }
 0x2c2   : > { %v5140_v56 = vpop.eup %5139  ;;  %v2455_v51 = vmul.f32 1.442695, %v2415_v10  ;;  %v1919_v44 = vadd.f32 %v1918_v17, %v1716_v52  ;;  %v2734_v17 = vld [vmem:[%s7228_s14 + $0x238] sm:$0xff] }
 0x2c3   : > { %v2638_v6 = vmul.f32 %v5140_v56, %v2606_v27  ;;  %v5142_v28 = vpop.eup %5141  ;;  %v8831_v27 = vand.u32 4294901760, %v6979_v23 }
 0x2c4   : > { %5143 = vpow2.f32 %v2455_v51  ;;  %v2156_v37 = vadd.f32 %v7313_v34, %v1919_v44  ;;  %1799 = vmatmul.f32.gmra.mxu2 %v8824_v53  ;;  %v8828_v34 = vld [vmem:[#allocation39_spill] sm:$0xff]  ;;  %v2324_v1 = vpop.f32.mrf.mxu1  ;;  %v2607_v55 = vsub.f32 1.0, %v5142_v28  ;;  %v2167_v26 = vpop.f32.mrf.mxu0 }
 0x2c5   : > { %2025 = vmatmul.f32.gmra.mxu3 %v8827_v46  ;;  %v2798_v61 = vmul.f32 %v2702_v31, %v2638_v6  ;;  %v2766_v0 = vmul.f32 %v2670_v57, %v2638_v6  ;;  %v2513_v54 = vsub.f32 0.0, %v8828_v34  ;;  %5145 = vpow2.f32 %v2553_v15  ;;  %v8832_v15 = vld [vmem:[#allocation48_spill] sm:$0xff] }
 0x2c6   : > { %v2317_v58 = vadd.f32 %v7318_v2, %v2156_v37  ;;  %v2735_v2 = vld [vmem:[%s7228_s14 + $0x240] sm:$0xff]  ;;  %v2830_v33 = vmul.f32 %v2734_v17, %v2638_v6 }
 0x2c7   : > { %v1720_v20 = vpop.f32.mrf.mxu2  ;;  %2933 = vadd.xlane.f32.xlu0 %v2798_v61  ;;  %2931 = vadd.xlane.f32.xlu2 %v2797_v13  ;;  %v2555_v40 = vmul.f32 1.442695, %v2513_v54 }
 0x2c8   : > { %v2416_v43 = vsub.f32 0.0, %v2317_v58  ;;  %v1721_v21 = vadd.f32 %v1720_v20, %v1533_v32  ;;  %v1930_v25 = vpop.f32.mrf.mxu3  ;;  %2869 = vadd.xlane.f32.xlu1 %v2766_v0  ;;  %v2705_v58 = vld [vmem:[%s7228_s14 + $0x150] sm:$0xff] }
 0x2ca   : > { %v5144_v59 = vpop.eup %5143  ;;  %v2457_v22 = vmul.f32 1.442695, %v2416_v43  ;;  %v1925_v45 = vadd.f32 %v1924_v24, %v1721_v21  ;;  %v8833_v21 = vld [vmem:[#allocation64_spill] sm:$0xff] }
 0x2cb   : > { %v2639_v11 = vmul.f32 %v5144_v59, %v2607_v55  ;;  %v5146_v12 = vpop.eup %5145 }
 0x2cc   : > { %5147 = vpow2.f32 %v2457_v22  ;;  %v2160_v36 = vadd.f32 %v2159_v49, %v1925_v45  ;;  %1804 = vmatmul.f32.gmra.mxu2 %v6937_v4  ;;  %v8830_v49 = vld [vmem:[#allocation44_spill] sm:$0xff]  ;;  %v2608_v16 = vsub.f32 1.0, %v5146_v12  ;;  %v2328_v41 = vpop.f32.mrf.mxu1  ;;  %v2171_v3 = vpop.f32.mrf.mxu0  ;;  %v8835_v45 = vld [vmem:[#allocation74_spill] sm:$0xff] }
 0x2cd   : > { %2031 = vmatmul.f32.gmra.mxu3 %v8829_v9  ;;  %v2831_v39 = vmul.f32 %v2735_v2, %v2639_v11  ;;  %v2799_v42 = vmul.f32 %v2703_v50, %v2639_v11  ;;  %5149 = vpow2.f32 %v2555_v40  ;;  %v2514_v4 = vsub.f32 0.0, %v8830_v49  ;;  %v8836_v2 = vld [vmem:[#allocation75_spill] sm:$0xff]  ;;  %v8837_v40 = vld [vmem:[#allocation49_spill] sm:$0xff] }
 0x2ce   : > { %v2321_v53 = vadd.f32 %v2320_v29, %v2160_v36  ;;  %v2736_v29 = vld [vmem:[%s7228_s14 + $0x248] sm:$0xff]  ;;  %v2767_v51 = vmul.f32 %v2671_v14, %v2639_v11  ;;  %v1545_v17 = vadd.f32 %v8836_v2, %v8835_v45 }
 0x2cf   : > { %v1725_v38 = vpop.f32.mrf.mxu2  ;;  %2999 = vadd.xlane.f32.xlu0 %v2831_v39  ;;  %2997 = vadd.xlane.f32.xlu2 %v2830_v33  ;;  %v2557_v52 = vmul.f32 1.442695, %v2514_v4  ;;  %v8840_v14 = vld [vmem:[#allocation28_spill] sm:$0xff] }
 0x2d0   : > { %v2417_v18 = vsub.f32 0.0, %v2321_v53  ;;  %v1726_v60 = vadd.f32 %v1725_v38, %v1537_v5  ;;  %v1936_v19 = vpop.f32.mrf.mxu3  ;;  %2935 = vadd.xlane.f32.xlu1 %v2799_v42  ;;  %v2738_v5 = vld [vmem:[%s7228_s14 + $0x258] sm:$0xff]  ;;  %v2737_v53 = vld [vmem:[%s7228_s14 + $0x250] sm:$0xff] }
 0x2d1   : > { %v2706_v38 = vld [vmem:[%s7228_s14 + $0x158] sm:$0xff] }
 0x2d2   : > { %v5148_v47 = vpop.eup %5147  ;;  %v2459_v8 = vmul.f32 1.442695, %v2417_v18  ;;  %v1931_v48 = vadd.f32 %v1930_v25, %v1726_v60  ;;  %v8834_v25 = vand.u32 4294901760, %v8833_v21 }
 0x2d3   : > { %v2640_v10 = vmul.f32 %v5148_v47, %v2608_v16  ;;  %v5150_v31 = vpop.eup %5149 }
 0x2d4   : > { %5151 = vpow2.f32 %v2459_v8  ;;  %v2164_v24 = vadd.f32 %v2163_v62, %v1931_v48  ;;  %1809 = vmatmul.f32.gmra.mxu2 %v6959_v63  ;;  %v2515_v63 = vsub.f32 0.0, %v8832_v15  ;;  %v2609_v13 = vsub.f32 1.0, %v5150_v31  ;;  %v2704_v62 = vld [vmem:[%s7228_s14 + $0x148] sm:$0xff]  ;;  %v2332_v43 = vpop.f32.mrf.mxu1  ;;  %v2675_v15 = vld [vmem:[%s7228_s14 + $0x60] sm:$0xff] }
 0x2d5   : > { %2037 = vmatmul.f32.gmra.mxu3 %v8831_v27  ;;  %v2768_v56 = vmul.f32 %v2672_v7, %v2640_v10  ;;  %v2832_v44 = vmul.f32 %v2736_v29, %v2640_v10  ;;  %5153 = vpow2.f32 %v2557_v52  ;;  %v2800_v55 = vmul.f32 %v2704_v62, %v2640_v10  ;;  %v8841_v29 = vld [vmem:[#allocation29_spill] sm:$0xff]  ;;  %v8842_v27 = vld [vmem:[#allocation52_spill] sm:$0xff] }
 0x2d6   : > { %v2325_v57 = vadd.f32 %v2324_v1, %v2164_v24  ;;  %v2559_v34 = vmul.f32 1.442695, %v2515_v63  ;;  %v2674_v63 = vld [vmem:[%s7228_s14 + $0x58] sm:$0xff] }
 0x2d7   : > { %v1730_v6 = vpop.f32.mrf.mxu2  ;;  %2873 = vadd.xlane.f32.xlu0 %v2768_v56  ;;  %2871 = vadd.xlane.f32.xlu2 %v2767_v51  ;;  %v2517_v56 = vsub.f32 0.0, %v8842_v27  ;;  %v5377_v27 = vmov 839922192  }
 0x2d8   : > { %v2418_v37 = vsub.f32 0.0, %v2325_v57  ;;  %v1731_v46 = vadd.f32 %v1730_v6, %v1541_v30  ;;  %3001 = vadd.xlane.f32.xlu1 %v2832_v44  ;;  %v1942_v61 = vpop.f32.mrf.mxu3 }
 0x2da   : > { %v5152_v0 = vpop.eup %5151  ;;  %v2461_v28 = vmul.f32 1.442695, %v2418_v37  ;;  %v1937_v32 = vadd.f32 %v1936_v19, %v1731_v46  ;;  %v2175_v19 = vpop.f32.mrf.mxu0  ;;  %v2739_v37 = vld [vmem:[%s7228_s14 + $0x260] sm:$0xff] }
 0x2db   : > { %v2641_v20 = vmul.f32 %v5152_v0, %v2609_v13  ;;  %v5154_v22 = vpop.eup %5153 }
 0x2dc   : > { %5155 = vpow2.f32 %v2461_v28  ;;  %v2168_v54 = vadd.f32 %v2167_v26, %v1937_v32  ;;  %1814 = vmatmul.f32.gmra.mxu2 %v6979_v23  ;;  %v2516_v23 = vsub.f32 0.0, %v8837_v40  ;;  %v2610_v39 = vsub.f32 1.0, %v5154_v22  ;;  %v8838_v26 = vld [vmem:[#allocation65_spill] sm:$0xff]  ;;  %v2336_v52 = vpop.f32.mrf.mxu1  ;;  %v2676_v40 = vld [vmem:[%s7228_s14 + $0x68] sm:$0xff] }
 0x2dd   : > { %2043 = vmatmul.f32.gmra.mxu3 %v8834_v25  ;;  %v2801_v1 = vmul.f32 %v2705_v58, %v2641_v20  ;;  %v2769_v59 = vmul.f32 %v2673_v35, %v2641_v20  ;;  %5157 = vpow2.f32 %v2559_v34  ;;  %v8839_v16 = vand.u32 4294901760, %v8838_v26  ;;  %v8843_v35 = vld [vmem:[#allocation34_spill] sm:$0xff] }
 0x2de   : > { %v2329_v50 = vadd.f32 %v2328_v41, %v2168_v54  ;;  %v2561_v18 = vmul.f32 1.442695, %v2516_v23  ;;  %v2833_v8 = vmul.f32 %v2737_v53, %v2641_v20  ;;  %v1549_v41 = vadd.f32 %v8841_v29, %v8840_v14  ;;  %v8846_v53 = vld [vmem:[#allocation27_spill] sm:$0xff]  ;;  %v2740_v14 = vld [vmem:[%s7228_s14 + $0x268] sm:$0xff]  ;;  %v2709_v29 = vld [vmem:[%s7228_s14 + $0x170] sm:$0xff] }
 0x2df   : > { %v1735_v11 = vpop.f32.mrf.mxu2  ;;  %2939 = vadd.xlane.f32.xlu0 %v2801_v1  ;;  %2937 = vadd.xlane.f32.xlu2 %v2800_v55 }
 0x2e0   : > { %v2419_v36 = vsub.f32 0.0, %v2329_v50  ;;  %v1736_v9 = vadd.f32 %v1735_v11, %v1545_v17  ;;  %2875 = vadd.xlane.f32.xlu1 %v2769_v59  ;;  %v1948_v49 = vpop.f32.mrf.mxu3  ;;  %v2708_v50 = vld [vmem:[%s7228_s14 + $0x168] sm:$0xff]  ;;  %v2707_v11 = vld [vmem:[%s7228_s14 + $0x160] sm:$0xff] }
 0x2e2   : > { %v5156_v33 = vpop.eup %5155  ;;  %v2463_v42 = vmul.f32 1.442695, %v2419_v36  ;;  %v1943_v12 = vadd.f32 %v1942_v61, %v1736_v9  ;;  %v2563_v61 = vmul.f32 1.442695, %v2517_v56  ;;  %v2179_v54 = vpop.f32.mrf.mxu0  ;;  %v3144_v56 = vunpack.c.l.s4 %v5377_v27 }
 0x2e3   : > { %v2642_v4 = vmul.f32 %v5156_v33, %v2610_v39  ;;  %v5158_v7 = vpop.eup %5157 }
 0x2e4   : > { %5159 = vpow2.f32 %v2463_v42  ;;  %v2172_v60 = vadd.f32 %v2171_v3, %v1943_v12  ;;  %1819 = vmatmul.f32.gmra.mxu2 %v8833_v21  ;;  %v2611_v31 = vsub.f32 1.0, %v5158_v7  ;;  %v8844_v3 = vld [vmem:[#allocation78_spill] sm:$0xff]  ;;  %v2340_v59 = vpop.f32.mrf.mxu1  ;;  %v2741_v7 = vld [vmem:[%s7228_s14 + $0x270] sm:$0xff] }
 0x2e5   : > { %2049 = vmatmul.f32.gmra.mxu3 %v8839_v16  ;;  %v2834_v47 = vmul.f32 %v2738_v5, %v2642_v4  ;;  %v2802_v48 = vmul.f32 %v2706_v38, %v2642_v4  ;;  %5161 = vpow2.f32 %v2561_v18  ;;  %v2770_v32 = vmul.f32 %v2674_v63, %v2642_v4  ;;  %v8845_v21 = vld [vmem:[#allocation54_spill] sm:$0xff] }
 0x2e6   : > { %v2333_v10 = vadd.f32 %v2332_v43, %v2172_v60  ;;  %v1553_v20 = vadd.f32 %v8844_v3, %v8843_v35  ;;  %v2518_v25 = vsub.f32 0.0, %v8845_v21  ;;  %v2519_v38 = vsub.f32 0.0, %v8846_v53  ;;  %v8847_v60 = vld [vmem:[#allocation66_spill] sm:$0xff]  ;;  %v2679_v53 = vld [vmem:[%s7228_s14 + $0x80] sm:$0xff] }
 0x2e7   : > { %v1740_v24 = vpop.f32.mrf.mxu2  ;;  %3005 = vadd.xlane.f32.xlu0 %v2834_v47  ;;  %3003 = vadd.xlane.f32.xlu2 %v2833_v8  ;;  %v8848_v63 = vld [vmem:[#allocation26_spill] sm:$0xff] }
 0x2e8   : > { %v2420_v51 = vsub.f32 0.0, %v2333_v10  ;;  %v1741_v44 = vadd.f32 %v1740_v24, %v1549_v41  ;;  %2941 = vadd.xlane.f32.xlu1 %v2802_v48  ;;  %v1954_v0 = vpop.f32.mrf.mxu3  ;;  %v2565_v36 = vmul.f32 1.442695, %v2518_v25  ;;  %v2567_v41 = vmul.f32 1.442695, %v2519_v38  ;;  %v2678_v21 = vld [vmem:[%s7228_s14 + $0x78] sm:$0xff] }
 0x2e9   : > { %v2710_v38 = vld [vmem:[%s7228_s14 + $0x178] sm:$0xff] }
 0x2ea   : > { %v5160_v30 = vpop.eup %5159  ;;  %v2465_v57 = vmul.f32 1.442695, %v2420_v51  ;;  %v1949_v6 = vadd.f32 %v1948_v49, %v1741_v44  ;;  %v5378_v51 = vmov 1985246804  }
 0x2eb   : > { %v2643_v46 = vmul.f32 %v5160_v30, %v2611_v31  ;;  %v5162_v62 = vpop.eup %5161  ;;  %v3148_v44 = vunpack.c.l.s4 %v5378_v51 }
 0x2ec   : > { %5163 = vpow2.f32 %v2465_v57  ;;  %v2176_v13 = vadd.f32 %v2175_v19, %v1949_v6  ;;  %1824 = vmatmul.f32.gmra.mxu2 %v8838_v26  ;;  %v2612_v22 = vsub.f32 1.0, %v5162_v62  ;;  %v2183_v26 = vpop.f32.mrf.mxu0  ;;  %v2344_v10 = vpop.f32.mrf.mxu1 }
 0x2ed   : > { %v2771_v28 = vmul.f32 %v2675_v15, %v2643_v46  ;;  %v2835_v58 = vmul.f32 %v2739_v37, %v2643_v46  ;;  %5165 = vpow2.f32 %v2563_v61  ;;  %v2803_v33 = vmul.f32 %v2707_v11, %v2643_v46 }
 0x2ee   : > { %v2337_v34 = vadd.f32 %v2336_v52, %v2176_v13  ;;  %v2520_v37 = vsub.f32 0.0, %v8848_v63  ;;  %v8849_v13 = vld [vmem:[#allocation67_spill] sm:$0xff] }
 0x2ef   : > { %v1745_v43 = vpop.f32.mrf.mxu2  ;;  %2879 = vadd.xlane.f32.xlu0 %v2771_v28  ;;  %2877 = vadd.xlane.f32.xlu2 %v2770_v32  ;;  %v7403_v28 = vunpack.c.0.s8 %v3144_v56  ;;  %v7405_v32 = vunpack.c.0.s8 %v3148_v44 }
 0x2f0   : > { %v2421_v1 = vsub.f32 0.0, %v2337_v34  ;;  %v1746_v55 = vadd.f32 %v1745_v43, %v1553_v20  ;;  %3007 = vadd.xlane.f32.xlu1 %v2835_v58  ;;  %v1960_v49 = vpop.f32.mrf.mxu3  ;;  %v2742_v43 = vld [vmem:[%s7228_s14 + $0x278] sm:$0xff]  ;;  %v2569_v25 = vmul.f32 1.442695, %v2520_v37 }
 0x2f2   : > { %v5164_v45 = vpop.eup %5163  ;;  %v2467_v2 = vmul.f32 1.442695, %v2421_v1  ;;  %v1955_v17 = vadd.f32 %v1954_v0, %v1746_v55 }
 0x2f3   : > { %v2644_v23 = vmul.f32 %v5164_v45, %v2612_v22  ;;  %v5166_v12 = vpop.eup %5165 }
 0x2f4   : > { %5167 = vpow2.f32 %v2467_v2  ;;  %v2180_v9 = vadd.f32 %v2179_v54, %v1955_v17  ;;  %v2613_v16 = vsub.f32 1.0, %v5166_v12  ;;  %v2677_v54 = vld [vmem:[%s7228_s14 + $0x70] sm:$0xff]  ;;  %v2187_v1 = vpop.f32.mrf.mxu0 }
 0x2f5   : > { %v2804_v39 = vmul.f32 %v2708_v50, %v2644_v23  ;;  %v2772_v42 = vmul.f32 %v2676_v40, %v2644_v23  ;;  %5169 = vpow2.f32 %v2565_v36  ;;  %v2836_v30 = vmul.f32 %v2740_v14, %v2644_v23  ;;  %v2348_v50 = vpop.f32.mrf.mxu1 }
 0x2f6   : > { %v2341_v5 = vadd.f32 %v2340_v59, %v2180_v9  ;;  %v5379_v9 = vmov 0  }
 0x2f7   : > { %v1750_v4 = vpop.f32.mrf.mxu2  ;;  %2945 = vadd.xlane.f32.xlu0 %v2804_v39  ;;  %2943 = vadd.xlane.f32.xlu2 %v2803_v33 }
 0x2f8   : > { %v2422_v18 = vsub.f32 0.0, %v2341_v5  ;;  %v1751_v19 = vadd.f32 %v1750_v4, %v8847_v60  ;;  %2881 = vadd.xlane.f32.xlu1 %v2772_v42  ;;  %v1966_v58 = vpop.f32.mrf.mxu3  ;;  %5042 = vset.pattern.permute.xlu0 %v5379_v9 }
 0x2f9   : > { %5043 = vset.pattern.permute.xlu1 %v5379_v9  ;;  %5044 = vset.pattern.permute.xlu2 %v5379_v9  ;;  %v8857_v9 = vld [vmem:[#allocation32_spill] sm:$0xff] }
 0x2fa   : > { %v5168_v47 = vpop.eup %5167  ;;  %v2469_v8 = vmul.f32 1.442695, %v2422_v18  ;;  %v1961_v48 = vadd.f32 %v1960_v49, %v1751_v19 }
 0x2fb   : > { %v2645_v52 = vmul.f32 %v5168_v47, %v2613_v16  ;;  %v5170_v6 = vpop.eup %5169 }
 0x2fc   : > { %5171 = vpow2.f32 %v2469_v8  ;;  %v2184_v24 = vadd.f32 %v2183_v26, %v1961_v48  ;;  %v2614_v62 = vsub.f32 1.0, %v5170_v6  ;;  %v2191_v44 = vpop.f32.mrf.mxu0  ;;  %v2680_v6 = vld [vmem:[%s7228_s14 + $0x88] sm:$0xff] }
 0x2fd   : > { %v2837_v31 = vmul.f32 %v2741_v7, %v2645_v52  ;;  %v2805_v57 = vmul.f32 %v2709_v29, %v2645_v52  ;;  %5173 = vpow2.f32 %v2567_v41  ;;  %v2773_v11 = vmul.f32 %v2677_v54, %v2645_v52  ;;  %v2743_v29 = vld [vmem:[%s7228_s14 + $0x280] sm:$0xff] }
 0x2fe   : > { %v2345_v15 = vadd.f32 %v2344_v10, %v2184_v24 }
 0x2ff   : > { %v1755_v46 = vpop.f32.mrf.mxu2  ;;  %3011 = vadd.xlane.f32.xlu0 %v2837_v31  ;;  %3009 = vadd.xlane.f32.xlu2 %v2836_v30 }
 0x300   : > { %v2423_v61 = vsub.f32 0.0, %v2345_v15  ;;  %v1756_v0 = vadd.f32 %v1755_v46, %v8849_v13  ;;  %2947 = vadd.xlane.f32.xlu1 %v2805_v57  ;;  %v1972_v51 = vpop.f32.mrf.mxu3  ;;  %v2352_v13 = vpop.f32.mrf.mxu1 }
 0x302   : > { %v5172_v35 = vpop.eup %5171  ;;  %v2471_v3 = vmul.f32 1.442695, %v2423_v61  ;;  %v1967_v20 = vadd.f32 %v1966_v58, %v1756_v0  ;;  %v7407_v34 = vpop.xlane.xlu2 %2919  ;;  %v8853_v0 = vld [vmem:[#allocation68_spill] sm:$0xff] }
 0x303   : > { %v2856_v55 = vpop.xlane.xlu1 %2855  ;;  %v2646_v59 = vmul.f32 %v5172_v35, %v2614_v62  ;;  %v5174_v17 = vpop.eup %5173 }
 0x304   : > { %5175 = vpow2.f32 %v2471_v3  ;;  %v2188_v22 = vadd.f32 %v2187_v1, %v1967_v20  ;;  %v3146_v45 = vperm.slane %v2856_v55, %v7403_v28  ;;  %v3150_v2 = vperm.slane %v2856_v55, %v7405_v32 }
 0x305   : > { %v2838_v40 = vmul.f32 %v2742_v43, %v2646_v59  ;;  %v2774_v23 = vmul.f32 %v2678_v21, %v2646_v59  ;;  %5177 = vpow2.f32 %v2569_v25  ;;  %v2615_v33 = vsub.f32 1.0, %v5174_v17  ;;  %v2195_v43 = vpop.f32.mrf.mxu0  ;;  %v8854_v21 = vld [vmem:[#allocation69_spill] sm:$0xff] }
 0x306   : > { %v2349_v36 = vadd.f32 %v2348_v50, %v2188_v22  ;;  %3911 = vst [vmem:[#allocation1] ss:$2 sm:$0xff] %v3146_v45  ;;  %v2806_v16 = vmul.f32 %v2710_v38, %v2646_v59 }
 0x307   : > { %3913 = vst [vmem:[#allocation1 + $0x1] ss:$2 sm:$0xff] %v3150_v2  ;;  %2883 = vadd.xlane.f32.xlu2 %v2773_v11  ;;  %2885 = vadd.xlane.f32.xlu0 %v2774_v23  ;;  %v1760_v8 = vpop.f32.mrf.mxu2 }
 0x308   : > { %v2424_v39 = vsub.f32 0.0, %v2349_v36  ;;  %3013 = vadd.xlane.f32.xlu1 %v2838_v40  ;;  %v1761_v58 = vadd.f32 %v1760_v8, %v8853_v0  ;;  %v1978_v62 = vpop.f32.mrf.mxu3  ;;  %v2356_v45 = vpop.f32.mrf.mxu1 }
 0x30a   : > { %v5176_v42 = vpop.eup %5175  ;;  %v2473_v12 = vmul.f32 1.442695, %v2424_v39  ;;  %v7414_v5 = vpop.xlane.xlu0 %2921  ;;  %v1973_v35 = vadd.f32 %v1972_v51, %v1761_v58  ;;  %v2521_v39 = vsub.f32 0.0, %v8857_v9 }
 0x30b   : > { %v2858_v49 = vpop.xlane.xlu2 %2857  ;;  %v7418_v4 = vpop.xlane.xlu1 %2983  ;;  %v7420_v18 = vmul.f32 %v5176_v42, %v2615_v33 }
 0x30c   : > { %8850 = vst [vmem:[#allocation33_spill] sm:$0xff] %v7418_v4  ;;  %5179 = vpow2.f32 %v2473_v12  ;;  %v3154_v60 = vperm.slane %v2858_v49, %v7403_v28  ;;  %v3158_v19 = vperm.slane %v2858_v49, %v7405_v32  ;;  %v5178_v47 = vpop.eup %5177  ;;  %v2192_v22 = vadd.f32 %v2191_v44, %v1973_v35 }
 0x30d   : > { %v2775_v26 = vmul.f32 %v2679_v53, %v7420_v18  ;;  %v2616_v48 = vsub.f32 1.0, %v5178_v47  ;;  %v2839_v56 = vmul.f32 %v2743_v29, %v7420_v18  ;;  %v2199_v42 = vpop.f32.mrf.mxu0  ;;  %v8858_v53 = vld [vmem:[#allocation70_spill] sm:$0xff] }
 0x30e   : > { %3915 = vst [vmem:[#allocation1 + $0x10] ss:$2 sm:$0xff] %v3154_v60  ;;  %v3926_v31 = vld.sshfl [vmem:[#allocation1] sm:$0xff pattern:$0x75316420]  ;;  %v2353_v50 = vadd.f32 %v2352_v13, %v2192_v22 }
 0x30f   : > { %3917 = vst [vmem:[#allocation1 + $0x11] ss:$2 sm:$0xff] %v3158_v19  ;;  %2949 = vadd.xlane.f32.xlu2 %v2806_v16  ;;  %v1765_v30 = vpop.f32.mrf.mxu2  ;;  %v2571_v60 = vmul.f32 1.442695, %v2521_v39 }
 0x310   : > { %2887 = vadd.xlane.f32.xlu1 %v2775_v26  ;;  %v1766_v25 = vadd.f32 %v1765_v30, %v8854_v21  ;;  %v1984_v11 = vpop.f32.mrf.mxu3  ;;  %v2425_v12 = vsub.f32 0.0, %v2353_v50  ;;  %v8859_v26 = vld [vmem:[#allocation36_spill] sm:$0xff]  ;;  %v2360_v47 = vpop.f32.mrf.mxu1 }
 0x311   : > { %v2522_v16 = vsub.f32 0.0, %v8859_v26  ;;  %5181 = vpow2.f32 %v2571_v60 }
 0x312   : > { %v5180_v7 = vpop.eup %5179  ;;  %v2860_v14 = vpop.xlane.xlu0 %2859  ;;  %v1979_v17 = vadd.f32 %v1978_v62, %v1766_v25  ;;  %v2475_v8 = vmul.f32 1.442695, %v2425_v12 }
 0x313   : > { %v3162_v41 = vperm.slane %v2860_v14, %v7403_v28  ;;  %v3166_v10 = vperm.slane %v2860_v14, %v7405_v32  ;;  %v7428_v52 = vpop.xlane.xlu2 %2985  ;;  %v7430_v24 = vpop.xlane.xlu1 %2923  ;;  %v7432_v27 = vmul.f32 %v5180_v7, %v2616_v48 }
 0x314   : > { %8851 = vst [vmem:[#allocation18_spill] sm:$0xff] %v7428_v52  ;;  %v2196_v33 = vadd.f32 %v2195_v43, %v1979_v17  ;;  %5183 = vpow2.f32 %v2475_v8  ;;  %v8885_v52 = vld [vmem:[#allocation38_spill] sm:$0xff] }
 0x315   : > { %3919 = vst [vmem:[#allocation1 + $0x20] ss:$2 sm:$0xff] %v3162_v41  ;;  %v2776_v61 = vmul.f32 %v2680_v6, %v7432_v27  ;;  %v2573_v6 = vmul.f32 1.442695, %v2522_v16 }
 0x316   : > { %3921 = vst [vmem:[#allocation1 + $0x21] ss:$2 sm:$0xff] %v3166_v10  ;;  %v3927_v2 = vld.sshfl [vmem:[#allocation1 + $0x10] sm:$0xff pattern:$0x75316420]  ;;  %v2357_v19 = vadd.f32 %v2356_v45, %v2196_v33 }
 0x317   : > { %3015 = vadd.xlane.f32.xlu2 %v2839_v56  ;;  %v1770_v1 = vpop.f32.mrf.mxu2  ;;  %v5182_v58 = vpop.eup %5181  ;;  %5185 = vpow2.f32 %v2573_v6 }
 0x318   : > { %v1771_v38 = vadd.f32 %v1770_v1, %v8858_v53  ;;  %v2426_v56 = vsub.f32 0.0, %v2357_v19  ;;  %v1990_v30 = vpop.f32.mrf.mxu3  ;;  %v8861_v1 = vld [vmem:[#allocation42_spill] sm:$0xff]  ;;  %v2364_v45 = vpop.f32.mrf.mxu1  ;;  %v2617_v50 = vsub.f32 1.0, %v5182_v58 }
 0x31a   : > { %v7435_v57 = vpop.xlane.xlu0 %2987  ;;  %v1985_v48 = vadd.f32 %v1984_v11, %v1771_v38  ;;  %v2477_v13 = vmul.f32 1.442695, %v2426_v56  ;;  %v5184_v25 = vpop.eup %5183 }
 0x31b   : > { %v2862_v15 = vpop.xlane.xlu2 %2861  ;;  %v7438_v63 = vpop.xlane.xlu1 %2989  ;;  %4207 = vperm.xlu0 %5042, %v3926_v31  }
 0x31c   : > { %8852 = vst [vmem:[#allocation37_spill] sm:$0xff] %v7438_v63  ;;  %v3170_v37 = vperm.slane %v2862_v15, %v7403_v28  ;;  %v3174_v46 = vperm.slane %v2862_v15, %v7405_v32  ;;  %v2200_v15 = vadd.f32 %v2199_v42, %v1985_v48  ;;  %5187 = vpow2.f32 %v2477_v13 }
 0x31d   : > { %v3928_v51 = vld.sshfl [vmem:[#allocation1 + $0x20] sm:$0xff pattern:$0x75316420]  ;;  %v7477_v42 = vmul.f32 %v5184_v25, %v2617_v50  ;;  %v5186_v12 = vpop.eup %5185  ;;  %v2712_v50 = vld [vmem:[%s7228_s14 + $0x188] sm:$0xff] }
 0x31e   : > { %3923 = vst [vmem:[#allocation1 + $0x30] ss:$2 sm:$0xff] %v3170_v37  ;;  %v8860_v37 = vld [vmem:[#allocation71_spill] sm:$0xff]  ;;  %v2361_v62 = vadd.f32 %v2360_v47, %v2200_v15  ;;  %v2744_v15 = vld [vmem:[%s7228_s14 + $0x288] sm:$0xff] }
 0x31f   : > { %3925 = vst [vmem:[#allocation1 + $0x31] ss:$2 sm:$0xff] %v3174_v46  ;;  %2889 = vadd.xlane.f32.xlu2 %v2776_v61  ;;  %v1775_v49 = vpop.f32.mrf.mxu2  ;;  %v2203_v61 = vpop.f32.mrf.mxu0 }
 0x320   : > { %v1776_v46 = vadd.f32 %v1775_v49, %v8860_v37  ;;  %v2427_v11 = vsub.f32 0.0, %v2361_v62  ;;  %v1996_v33 = vpop.f32.mrf.mxu3  ;;  %v2711_v49 = vld [vmem:[%s7228_s14 + $0x180] sm:$0xff]  ;;  %v8866_v37 = vld [vmem:[#allocation50_spill] sm:$0xff] }
 0x322   : > { %v7444_v3 = vpop.xlane.xlu0 %2927  ;;  %v1991_v35 = vadd.f32 %v1990_v30, %v1776_v46  ;;  %v5188_v60 = vpop.eup %5187  ;;  %v2479_v26 = vmul.f32 1.442695, %v2427_v11  ;;  %v2525_v46 = vsub.f32 0.0, %v8866_v37 }
 0x323   : > { %v7446_v20 = vpop.xlane.xlu2 %2925  ;;  %v2864_v54 = vpop.xlane.xlu1 %2863 }
 0x324   : > { %v3178_v55 = vperm.slane %v2864_v54, %v7403_v28  ;;  %v3182_v59 = vperm.slane %v2864_v54, %v7405_v32  ;;  %v2204_v39 = vadd.f32 %v2203_v61, %v1991_v35 }
 0x326   : > { %3930 = vst [vmem:[#allocation1] ss:$2 sm:$0xff] %v3178_v55  ;;  %v2523_v55 = vsub.f32 0.0, %v8861_v1  ;;  %v7475_v9 = vld.sshfl [vmem:[#allocation1 + $0x30] sm:$0xff pattern:$0x75316420]  ;;  %v2365_v16 = vadd.f32 %v2364_v45, %v2204_v39 }
 0x327   : > { %3931 = vst [vmem:[#allocation1 + $0x1] ss:$2 sm:$0xff] %v3182_v59  ;;  %v1780_v0 = vpop.f32.mrf.mxu2  ;;  %v8862_v59 = vld [vmem:[#allocation72_spill] sm:$0xff]  ;;  %v2207_v19 = vpop.f32.mrf.mxu0  ;;  %v2579_v45 = vmul.f32 1.442695, %v2525_v46 }
 0x328   : > { %v1781_v22 = vadd.f32 %v1780_v0, %v8862_v59  ;;  %v2575_v53 = vmul.f32 1.442695, %v2523_v55 }
 0x329   : > { %4210 = vperm.xlu1 %5043, %v3927_v2  }
 0x32a   : > { %v7451_v40 = vpop.xlane.xlu0 %2993  ;;  %v1997_v38 = vadd.f32 %v1996_v33, %v1781_v22  ;;  %5189 = vpow2.f32 %v2575_v53  ;;  %v2681_v33 = vld [vmem:[%s7228_s14 + $0x90] sm:$0xff] }
 0x32b   : > { %8855 = vst [vmem:[#allocation20_spill] sm:$0xff] %v7451_v40  ;;  %v7453_v23 = vpop.xlane.xlu2 %2991  ;;  %v7455_v36 = vpop.xlane.xlu1 %2929  ;;  %5191 = vpow2.f32 %v2479_v26 }
 0x32c   : > { %8856 = vst [vmem:[#allocation41_spill] sm:$0xff] %v7453_v23  ;;  %v2208_v56 = vadd.f32 %v2207_v19, %v1997_v38  ;;  %v2777_v19 = vmul.f32 %v2681_v33, %v7477_v42  ;;  %v2715_v23 = vld [vmem:[%s7228_s14 + $0x1a0] sm:$0xff] }
 0x330   : > { %v5190_v61 = vpop.eup %5189 }
 0x331   : > { %v5192_v25 = vpop.eup %5191 }
 0x332   : > { %v2868_v7 = vpop.xlane.xlu0 %2867 }
 0x333   : > { %v3194_v14 = vperm.slane %v2868_v7, %v7403_v28  ;;  %v3198_v29 = vperm.slane %v2868_v7, %v7405_v32  ;;  %v2866_v41 = vpop.xlane.xlu2 %2865  ;;  %v7462_v10 = vpop.xlane.xlu1 %2995  ;;  %v2807_v7 = vmul.f32 %v2711_v49, %v7420_v18 }
 0x334   : > { %v3186_v44 = vperm.slane %v2866_v41, %v7403_v28  ;;  %v3190_v31 = vperm.slane %v2866_v41, %v7405_v32 }
 0x335   : > { %3934 = vst [vmem:[#allocation1 + $0x20] ss:$2 sm:$0xff] %v3194_v14  ;;  %v2618_v14 = vsub.f32 1.0, %v5186_v12  ;;  %v2808_v12 = vmul.f32 %v2712_v50, %v7432_v27 }
 0x336   : > { %3935 = vst [vmem:[#allocation1 + $0x21] ss:$2 sm:$0xff] %v3198_v29  ;;  %v8865_v29 = vld [vmem:[#allocation45_spill] sm:$0xff] }
 0x337   : > { %3932 = vst [vmem:[#allocation1 + $0x10] ss:$2 sm:$0xff] %v3186_v44  ;;  %4213 = vperm.xlu2 %5044, %v3928_v51   ;;  %v2524_v41 = vsub.f32 0.0, %v8865_v29  ;;  %v7488_v51 = vmul.f32 %v5188_v60, %v2618_v14  ;;  %v2428_v44 = vsub.f32 0.0, %v2365_v16  ;;  %v2745_v29 = vld [vmem:[%s7228_s14 + $0x290] sm:$0xff] }
 0x338   : > { %3933 = vst [vmem:[#allocation1 + $0x11] ss:$2 sm:$0xff] %v3190_v31  ;;  %v2368_v31 = vpop.f32.mrf.mxu1 }
 0x339   : > { %v2577_v30 = vmul.f32 1.442695, %v2524_v41  ;;  %v2369_v6 = vadd.f32 %v2368_v31, %v2208_v56  ;;  %v2481_v13 = vmul.f32 1.442695, %v2428_v44  ;;  %v2714_v44 = vld [vmem:[%s7228_s14 + $0x198] sm:$0xff]  ;;  %v2841_v31 = vmul.f32 %v2745_v29, %v7477_v42 }
 0x33a   : > { %v7467_v54 = vpop.xlane.xlu0 %2933  ;;  %v2810_v46 = vmul.f32 %v2714_v44, %v7488_v51  ;;  %v2211_v44 = vpop.f32.mrf.mxu0 }
 0x33b   : > { %v7469_v43 = vpop.xlane.xlu2 %2931  ;;  %v2870_v21 = vpop.xlane.xlu1 %2869  ;;  %5193 = vpow2.f32 %v2577_v30  ;;  %v2429_v1 = vsub.f32 0.0, %v2369_v6 }
 0x33c   : > { %v3202_v2 = vperm.slane %v2870_v21, %v7403_v28  ;;  %v3206_v17 = vperm.slane %v2870_v21, %v7405_v32  ;;  %v2840_v21 = vmul.f32 %v2744_v15, %v7432_v27  ;;  %5195 = vpow2.f32 %v2481_v13 }
 0x33d   : > { %v2483_v39 = vmul.f32 1.442695, %v2429_v1  ;;  %5197 = vpow2.f32 %v2579_v45  ;;  %v7515_v14 = vld.sshfl [vmem:[#allocation1 + $0x20] sm:$0xff pattern:$0x75316420] }
 0x33e   : > { %3936 = vst [vmem:[#allocation1 + $0x30] ss:$2 sm:$0xff] %v3202_v2  ;;  %v2619_v2 = vsub.f32 1.0, %v5190_v61  ;;  %v2713_v61 = vld [vmem:[%s7228_s14 + $0x190] sm:$0xff]  ;;  %v2746_v45 = vld [vmem:[%s7228_s14 + $0x298] sm:$0xff] }
 0x33f   : > { %3937 = vst [vmem:[#allocation1 + $0x31] ss:$2 sm:$0xff] %v3206_v17  ;;  %v7497_v55 = vld.sshfl [vmem:[#allocation1 + $0x10] sm:$0xff pattern:$0x75316420]  ;;  %5199 = vpow2.f32 %v2483_v39  ;;  %v1785_v39 = vpop.f32.mrf.mxu2 }
 0x340   : > { %v7501_v17 = vld.sshfl [vmem:[#allocation1] sm:$0xff pattern:$0x75316420]  ;;  %v7504_v11 = vmul.f32 %v5192_v25, %v2619_v2 }
 0x341   : > { %v5194_v53 = vpop.eup %5193 }
 0x342   : > { %v7480_v47 = vpop.xlane.xlu0 %2999  ;;  %v5196_v26 = vpop.eup %5195  ;;  %v2620_v27 = vsub.f32 1.0, %v5194_v53  ;;  %v2684_v53 = vld [vmem:[%s7228_s14 + $0xa8] sm:$0xff] }
 0x343   : > { %8863 = vst [vmem:[#allocation19_spill] sm:$0xff] %v7480_v47  ;;  %v7482_v8 = vpop.xlane.xlu2 %2997  ;;  %v7484_v48 = vpop.xlane.xlu1 %2935 }
 0x344   : > { %8864 = vst [vmem:[#allocation47_spill] sm:$0xff] %v7482_v8  ;;  %v7518_v41 = vmul.f32 %v5196_v26, %v2620_v27  ;;  %v5198_v56 = vpop.eup %5197 }
 0x345   : > { %2951 = vadd.xlane.f32.xlu0 %v2807_v7  ;;  %v5200_v30 = vpop.eup %5199  ;;  %v2621_v13 = vsub.f32 1.0, %v5198_v56 }
 0x346   : > { %v7544_v33 = vld.sshfl [vmem:[#allocation1 + $0x30] sm:$0xff pattern:$0x75316420] }
 0x34a   : > { %v2874_v0 = vpop.xlane.xlu0 %2873 }
 0x34b   : > { %v3218_v18 = vperm.slane %v2874_v0, %v7403_v28  ;;  %v3222_v58 = vperm.slane %v2874_v0, %v7405_v32  ;;  %v2872_v62 = vpop.xlane.xlu2 %2871  ;;  %v7494_v35 = vpop.xlane.xlu1 %3001  ;;  %v7530_v0 = vmul.f32 %v5200_v30, %v2621_v13 }
 0x34c   : > { %8867 = vst [vmem:[#allocation21_spill] sm:$0xff] %v7494_v35  ;;  %v3210_v59 = vperm.slane %v2872_v62, %v7403_v28  ;;  %v3214_v22 = vperm.slane %v2872_v62, %v7405_v32  ;;  %v8883_v35 = vld [vmem:[#allocation77_spill] sm:$0xff] }
 0x34d   : > { %3944 = vst [vmem:[#allocation1 + $0x10] ss:$2 sm:$0xff] %v3218_v18  ;;  %3017 = vadd.xlane.f32.xlu0 %v2840_v21  ;;  %v2809_v18 = vmul.f32 %v2713_v61, %v7477_v42  ;;  %v2717_v61 = vld [vmem:[%s7228_s14 + $0x1b0] sm:$0xff] }
 0x34e   : > { %3945 = vst [vmem:[#allocation1 + $0x11] ss:$2 sm:$0xff] %v3222_v58  ;;  %v2747_v58 = vld [vmem:[%s7228_s14 + $0x2a0] sm:$0xff] }
 0x34f   : > { %3942 = vst [vmem:[#allocation1] ss:$2 sm:$0xff] %v3210_v59 }
 0x350   : > { %3943 = vst [vmem:[#allocation1 + $0x1] ss:$2 sm:$0xff] %v3214_v22  ;;  %v2843_v22 = vmul.f32 %v2747_v58, %v7504_v11 }
 0x352   : > { %v7508_v38 = vpop.xlane.xlu0 %2939 }
 0x353   : > { %v7510_v49 = vpop.xlane.xlu2 %2937  ;;  %v2876_v60 = vpop.xlane.xlu1 %2875  ;;  %2953 = vadd.xlane.f32.xlu1 %v2808_v12  ;;  %v2842_v12 = vmul.f32 %v2746_v45, %v7488_v51  ;;  %v8874_v45 = vld [vmem:[#allocation40_spill] sm:$0xff] }
 0x354   : > { %v3226_v16 = vperm.slane %v2876_v60, %v7403_v28  ;;  %v3230_v7 = vperm.slane %v2876_v60, %v7405_v32 }
 0x355   : > { %2891 = vadd.xlane.f32.xlu0 %v2777_v19  ;;  %v7555_v56 = vld.sshfl [vmem:[#allocation1 + $0x10] sm:$0xff pattern:$0x75316420] }
 0x356   : > { %3946 = vst [vmem:[#allocation1 + $0x20] ss:$2 sm:$0xff] %v3226_v16  ;;  %v2780_v16 = vmul.f32 %v2684_v53, %v7518_v41 }
 0x357   : > { %3947 = vst [vmem:[#allocation1 + $0x21] ss:$2 sm:$0xff] %v3230_v7  ;;  %v7540_v2 = vld.sshfl [vmem:[#allocation1] sm:$0xff pattern:$0x75316420]  ;;  %v2002_v7 = vpop.f32.mrf.mxu3 }
 0x35a   : > { %v7522_v6 = vpop.xlane.xlu0 %3005 }
 0x35b   : > { %8868 = vst [vmem:[#allocation22_spill] sm:$0xff] %v7522_v6  ;;  %v7524_v15 = vpop.xlane.xlu2 %3003  ;;  %v7526_v37 = vpop.xlane.xlu1 %2941  ;;  %3019 = vadd.xlane.f32.xlu1 %v2841_v31  ;;  %v8871_v31 = vld [vmem:[#allocation73_spill] sm:$0xff] }
 0x35c   : > { %8869 = vst [vmem:[#allocation23_spill] sm:$0xff] %v7524_v15  ;;  %v1786_v30 = vadd.f32 %v1785_v39, %v8871_v31 }
 0x35d   : > { %2957 = vadd.xlane.f32.xlu0 %v2810_v46  ;;  %v1790_v46 = vpop.f32.mrf.mxu2 }
 0x360   : > { %2955 = vadd.xlane.f32.xlu2 %v2809_v18  ;;  %v2003_v18 = vadd.f32 %v2002_v7, %v1786_v30  ;;  %v7576_v30 = vld.sshfl [vmem:[#allocation1 + $0x20] sm:$0xff pattern:$0x75316420] }
 0x362   : > { %v2880_v62 = vpop.xlane.xlu0 %2879 }
 0x363   : > { %v3242_v21 = vperm.slane %v2880_v62, %v7403_v28  ;;  %v3246_v25 = vperm.slane %v2880_v62, %v7405_v32  ;;  %v2878_v1 = vpop.xlane.xlu2 %2877  ;;  %v7536_v59 = vpop.xlane.xlu1 %3007 }
 0x364   : > { %8870 = vst [vmem:[#allocation24_spill] sm:$0xff] %v7536_v59  ;;  %v3234_v50 = vperm.slane %v2878_v1, %v7403_v28  ;;  %v3238_v42 = vperm.slane %v2878_v1, %v7405_v32  ;;  %v2212_v1 = vadd.f32 %v2211_v44, %v2003_v18 }
 0x365   : > { %3954 = vst [vmem:[#allocation1] ss:$2 sm:$0xff] %v3242_v21  ;;  %3023 = vadd.xlane.f32.xlu0 %v2843_v22  ;;  %v2813_v21 = vmul.f32 %v2717_v61, %v7530_v0  ;;  %v2008_v22 = vpop.f32.mrf.mxu3  ;;  %v1795_v39 = vpop.f32.mrf.mxu2 }
 0x366   : > { %3955 = vst [vmem:[#allocation1 + $0x1] ss:$2 sm:$0xff] %v3246_v25  ;;  %v2372_v25 = vpop.f32.mrf.mxu1 }
 0x367   : > { %3948 = vst [vmem:[#allocation1 + $0x30] ss:$2 sm:$0xff] %v3234_v50  ;;  %v1791_v50 = vadd.f32 %v1790_v46, %v8874_v45  ;;  %v2373_v53 = vadd.f32 %v2372_v25, %v2212_v1  ;;  %v8876_v46 = vld [vmem:[#allocation51_spill] sm:$0xff]  ;;  %v8877_v1 = vld [vmem:[#allocation46_spill] sm:$0xff] }
 0x368   : > { %3949 = vst [vmem:[#allocation1 + $0x31] ss:$2 sm:$0xff] %v3238_v42  ;;  %3021 = vadd.xlane.f32.xlu2 %v2842_v12  ;;  %v2215_v42 = vpop.f32.mrf.mxu0  ;;  %v2526_v61 = vsub.f32 0.0, %v8876_v46 }
 0x36a   : > { %v7548_v60 = vpop.xlane.xlu0 %2945 }
 0x36b   : > { %v7550_v19 = vpop.xlane.xlu2 %2943  ;;  %v2882_v26 = vpop.xlane.xlu1 %2881 }
 0x36c   : > { %v3250_v27 = vperm.slane %v2882_v26, %v7403_v28  ;;  %v3254_v29 = vperm.slane %v2882_v26, %v7405_v32 }
 0x36d   : > { %2897 = vadd.xlane.f32.xlu0 %v2780_v16  ;;  %v2014_v45 = vpop.f32.mrf.mxu3 }
 0x36e   : > { %3956 = vst [vmem:[#allocation1 + $0x10] ss:$2 sm:$0xff] %v3250_v27  ;;  %v2009_v27 = vadd.f32 %v2008_v22, %v1791_v50  ;;  %v2376_v18 = vpop.f32.mrf.mxu1  ;;  %v1796_v22 = vadd.f32 %v1795_v39, %v8877_v1  ;;  %v2581_v50 = vmul.f32 1.442695, %v2526_v61  ;;  %v8878_v39 = vld [vmem:[#allocation53_spill] sm:$0xff] }
 0x36f   : > { %3957 = vst [vmem:[#allocation1 + $0x11] ss:$2 sm:$0xff] %v3254_v29  ;;  %v7571_v29 = vld.sshfl [vmem:[#allocation1 + $0x30] sm:$0xff pattern:$0x75316420] }
 0x370   : > { %v2216_v25 = vadd.f32 %v2215_v42, %v2009_v27  ;;  %v2219_v6 = vpop.f32.mrf.mxu0  ;;  %v2015_v8 = vadd.f32 %v2014_v45, %v1796_v22  ;;  %v7585_v42 = vld.sshfl [vmem:[#allocation1] sm:$0xff pattern:$0x75316420]  ;;  %v2527_v27 = vsub.f32 0.0, %v8878_v39  ;;  %5201 = vpow2.f32 %v2581_v50  ;;  %v8880_v45 = vld [vmem:[#allocation55_spill] sm:$0xff] }
 0x371   : > { %v2528_v39 = vsub.f32 0.0, %v8880_v45 }
 0x372   : > { %v7559_v13 = vpop.xlane.xlu0 %3011  ;;  %v2583_v61 = vmul.f32 1.442695, %v2527_v27 }
 0x373   : > { %8872 = vst [vmem:[#allocation56_spill] sm:$0xff] %v7559_v13  ;;  %v7561_v58 = vpop.xlane.xlu2 %3009  ;;  %v7563_v62 = vpop.xlane.xlu1 %2947 }
 0x374   : > { %8873 = vst [vmem:[#allocation25_spill] sm:$0xff] %v7561_v58  ;;  %4216 = vperm.xlu1 %5043, %v7475_v9  }
 0x375   : > { %2963 = vadd.xlane.f32.xlu0 %v2813_v21  ;;  %v2430_v21 = vsub.f32 0.0, %v2373_v53 }
 0x376   : > { %v2380_v46 = vpop.f32.mrf.mxu1  ;;  %v7597_v45 = vld.sshfl [vmem:[#allocation1 + $0x10] sm:$0xff pattern:$0x75316420] }
 0x378   : > { %v2223_v50 = vpop.f32.mrf.mxu0 }
 0x37a   : > { %v2886_v12 = vpop.xlane.xlu0 %2885 }
 0x37b   : > { %v2884_v26 = vpop.xlane.xlu2 %2883  ;;  %v7568_v16 = vpop.xlane.xlu1 %3013  ;;  %v3266_v7 = vperm.slane %v2886_v12, %v7403_v28  ;;  %v3270_v44 = vperm.slane %v2886_v12, %v7405_v32 }
 0x37c   : > { %8875 = vst [vmem:[#allocation30_spill] sm:$0xff] %v7568_v16  ;;  %v3258_v9 = vperm.slane %v2884_v26, %v7403_v28  ;;  %v3262_v31 = vperm.slane %v2884_v26, %v7405_v32  ;;  %v2485_v26 = vmul.f32 1.442695, %v2430_v21 }
 0x37d   : > { %3960 = vst [vmem:[#allocation1 + $0x30] ss:$2 sm:$0xff] %v3266_v7  ;;  %v2377_v7 = vadd.f32 %v2376_v18, %v2216_v25  ;;  %v2020_v18 = vpop.f32.mrf.mxu3  ;;  %v5202_v25 = vpop.eup %5201 }
 0x37e   : > { %3958 = vst [vmem:[#allocation1 + $0x20] ss:$2 sm:$0xff] %v3258_v9  ;;  %5203 = vpow2.f32 %v2485_v26  ;;  %v2384_v27 = vpop.f32.mrf.mxu1 }
 0x37f   : > { %3959 = vst [vmem:[#allocation1 + $0x21] ss:$2 sm:$0xff] %v3262_v31  ;;  %v1800_v31 = vpop.f32.mrf.mxu2  ;;  %5205 = vpow2.f32 %v2583_v61 }
 0x380   : > { %3961 = vst [vmem:[#allocation1 + $0x31] ss:$2 sm:$0xff] %v3270_v44  ;;  %4219 = vperm.xlu2 %5044, %v7501_v17   ;;  %v2431_v17 = vsub.f32 0.0, %v2377_v7  ;;  %v2220_v44 = vadd.f32 %v2219_v6, %v2015_v8  ;;  %v2585_v6 = vmul.f32 1.442695, %v2528_v39 }
 0x382   : > { %v2381_v1 = vadd.f32 %v2380_v46, %v2220_v44 }
 0x383   : > { %v2888_v16 = vpop.xlane.xlu1 %2887  ;;  %v7581_v12 = vpop.xlane.xlu2 %2949 }
 0x384   : > { %v3274_v9 = vperm.slane %v2888_v16, %v7403_v28  ;;  %v3278_v53 = vperm.slane %v2888_v16, %v7405_v32  ;;  %v2487_v16 = vmul.f32 1.442695, %v2431_v17  ;;  %v5204_v22 = vpop.eup %5203  ;;  %v2432_v26 = vsub.f32 0.0, %v2381_v1 }
 0x385   : > { %v2026_v61 = vpop.f32.mrf.mxu3 }
 0x386   : > { %3966 = vst [vmem:[#allocation1] ss:$2 sm:$0xff] %v3274_v9  ;;  %5207 = vpow2.f32 %v2487_v16  ;;  %v2489_v17 = vmul.f32 1.442695, %v2432_v26  ;;  %v2682_v26 = vld [vmem:[%s7228_s14 + $0x98] sm:$0xff]  ;;  %v2388_v40 = vpop.f32.mrf.mxu1 }
 0x387   : > { %3967 = vst [vmem:[#allocation1 + $0x1] ss:$2 sm:$0xff] %v3278_v53  ;;  %v1805_v9 = vpop.f32.mrf.mxu2  ;;  %v2622_v53 = vsub.f32 1.0, %v5202_v25  ;;  %5209 = vpow2.f32 %v2585_v6 }
 0x388   : > { %5211 = vpow2.f32 %v2489_v17  ;;  %v1806_v6 = vadd.f32 %v1805_v9, %v8883_v35 }
 0x389   : > { %4228 = vperm.xlu0 %5042, %v7544_v33   ;;  %v7592_v8 = vmul.f32 %v5204_v22, %v2622_v53  ;;  %v8881_v33 = vld [vmem:[#allocation76_spill] sm:$0xff]  ;;  %v2227_v22 = vpop.f32.mrf.mxu0 }
 0x38a   : > { %v1801_v7 = vadd.f32 %v1800_v31, %v8881_v33  ;;  %v8882_v31 = vld [vmem:[#allocation17_spill] sm:$0xff] }
 0x38b   : > { %v7589_v21 = vpop.xlane.xlu2 %3015  ;;  %v7600_v39 = vadd.s32 4294967288, %v8882_v31  ;;  %v7603_v53 = vadd.s32 4294967280, %v8882_v31 }
 0x38c   : > { %8879 = vst [vmem:[#allocation59_spill] sm:$0xff] %v7589_v21  ;;  %v5206_v21 = vpop.eup %5205  ;;  %v2021_v16 = vadd.f32 %v2020_v18, %v1801_v7 }
 0x38d   : > { %v5208_v25 = vpop.eup %5207  ;;  %v2623_v1 = vsub.f32 1.0, %v5206_v21  ;;  %v2778_v21 = vmul.f32 %v2682_v26, %v7488_v51  ;;  %v2032_v9 = vpop.f32.mrf.mxu3  ;;  %v8884_v26 = vld [vmem:[#allocation57_spill] sm:$0xff] }
 0x38e   : > { %v2224_v59 = vadd.f32 %v2223_v50, %v2021_v16  ;;  %v5210_v17 = vpop.eup %5209  ;;  %v2027_v50 = vadd.f32 %v2026_v61, %v1806_v6  ;;  %v2811_v6 = vmul.f32 %v2715_v23, %v7504_v11 }
 0x38f   : > { %v1810_v33 = vpop.f32.mrf.mxu2  ;;  %v7606_v63 = vmul.f32 %v5208_v25, %v2623_v1  ;;  %v5212_v25 = vpop.eup %5211  ;;  %v2624_v16 = vsub.f32 1.0, %v5210_v17 }
 0x390   : > { %v2385_v1 = vadd.f32 %v2384_v27, %v2224_v59  ;;  %v1811_v4 = vadd.f32 %v1810_v33, %v8885_v52  ;;  %v2392_v17 = vpop.f32.mrf.mxu1 }
 0x391   : > { %v2231_v59 = vpop.f32.mrf.mxu0 }
 0x392   : > { %v2433_v13 = vsub.f32 0.0, %v2385_v1  ;;  %v8887_v1 = vld [vmem:[#allocation43_spill] sm:$0xff] }
 0x393   : > { %v2890_v58 = vpop.xlane.xlu2 %2889 }
 0x394   : > { %v3282_v44 = vperm.slane %v2890_v58, %v7403_v28  ;;  %v3286_v46 = vperm.slane %v2890_v58, %v7405_v32  ;;  %v4208_v58 = vpop.permute.xlu0 %4207 }
 0x396   : > { %3968 = vst [vmem:[#allocation1 + $0x10] ss:$2 sm:$0xff] %v3282_v44  ;;  %v4494_v44 = vperm.slane %v4208_v58, %v8882_v31  ;;  %v2529_v58 = vsub.f32 0.0, %v8884_v26  ;;  %v2716_v26 = vld [vmem:[%s7228_s14 + $0x1a8] sm:$0xff] }
 0x397   : > { %3969 = vst [vmem:[#allocation1 + $0x11] ss:$2 sm:$0xff] %v3286_v46  ;;  %v1815_v27 = vpop.f32.mrf.mxu2 }
 0x398   : > { %v2587_v61 = vmul.f32 1.442695, %v2529_v58  ;;  %v1816_v23 = vadd.f32 %v1815_v27, %v8887_v1 }
 0x39a   : > { %5213 = vpow2.f32 %v2587_v61  ;;  %v8888_v61 = vld [vmem:[#allocation60_spill] sm:$0xff] }
 0x39b   : > { %v4211_v18 = vpop.permute.xlu1 %4210  ;;  %v4214_v7 = vpop.permute.xlu2 %4213 }
 0x39c   : > { %v4496_v46 = vperm.slane %v4211_v18, %v7600_v39  ;;  %v4500_v47 = vperm.slane %v4214_v7, %v7603_v53  ;;  %v7619_v18 = vmul.f32 %v5212_v25, %v2624_v16  ;;  %v2228_v7 = vadd.f32 %v2227_v22, %v2027_v50  ;;  %v8886_v25 = vld [vmem:[#allocation58_spill] sm:$0xff]  ;;  %v2038_v22 = vpop.f32.mrf.mxu3 }
 0x39d   : > { %v2530_v16 = vsub.f32 0.0, %v8886_v25  ;;  %v8889_v25 = vld [vmem:[#allocation79_spill] sm:$0xff] }
 0x39e   : > { %v4498_v35 = vsel %vm4497_vm1, %v4496_v46, %v4494_v44  ;;  %2893 = vadd.xlane.f32.xlu1 %v2778_v21  ;;  %v2683_v21 = vld [vmem:[%s7228_s14 + $0xa0] sm:$0xff]  ;;  %v2491_v44 = vmul.f32 1.442695, %v2433_v13  ;;  %v2033_v46 = vadd.f32 %v2032_v9, %v1811_v4  ;;  %v2235_v13 = vpop.f32.mrf.mxu0 }
 0x39f   : > { %v7615_v51 = vsel %vm4501_vm3, %v4500_v47, %v4498_v35  ;;  %v2389_v47 = vadd.f32 %v2388_v40, %v2228_v7  ;;  %v2779_v35 = vmul.f32 %v2683_v21, %v7504_v11  ;;  %v2589_v50 = vmul.f32 1.442695, %v2530_v16  ;;  %v1820_v40 = vpop.f32.mrf.mxu2  ;;  %v2750_v11 = vld [vmem:[%s7228_s14 + $0x2b8] sm:$0xff] }
 0x3a0   : > { %5215 = vpow2.f32 %v2491_v44  ;;  %v2232_v33 = vadd.f32 %v2231_v59, %v2033_v46  ;;  %v5214_v4 = vpop.eup %5213  ;;  %v2039_v7 = vadd.f32 %v2038_v22, %v1816_v23  ;;  %v2396_v59 = vpop.f32.mrf.mxu1  ;;  %v2846_v27 = vmul.f32 %v2750_v11, %v7592_v8  ;;  %v8890_v11 = vld [vmem:[#allocation61_spill] sm:$0xff] }
 0x3a1   : > { %v2434_v52 = vsub.f32 0.0, %v2389_v47  ;;  %5217 = vpow2.f32 %v2589_v50  ;;  %v2625_v44 = vsub.f32 1.0, %v5214_v4  ;;  %v1821_v16 = vadd.f32 %v1820_v40, %v8889_v25 }
 0x3a2   : > { %v2393_v58 = vadd.f32 %v2392_v17, %v2232_v33  ;;  %v2236_v46 = vadd.f32 %v2235_v13, %v2039_v7 }
 0x3a3   : > { %v2493_v9 = vmul.f32 1.442695, %v2434_v52 }
 0x3a4   : > { %v2435_v47 = vsub.f32 0.0, %v2393_v58  ;;  %v2044_v17 = vpop.f32.mrf.mxu3  ;;  %v2397_v23 = vadd.f32 %v2396_v59, %v2236_v46 }
 0x3a5   : > { %5219 = vpow2.f32 %v2493_v9  ;;  %v2045_v50 = vadd.f32 %v2044_v17, %v1821_v16  ;;  %v2532_v9 = vsub.f32 0.0, %v8890_v11  ;;  %v2720_v11 = vld [vmem:[%s7228_s14 + $0x1c8] sm:$0xff] }
 0x3a6   : > { %2959 = vadd.xlane.f32.xlu1 %v2811_v6  ;;  %v2812_v6 = vmul.f32 %v2716_v26, %v7518_v41  ;;  %v5216_v21 = vpop.eup %5215  ;;  %v2495_v1 = vmul.f32 1.442695, %v2435_v47  ;;  %v2687_v26 = vld [vmem:[%s7228_s14 + $0xc0] sm:$0xff]  ;;  %v2239_v4 = vpop.f32.mrf.mxu0  ;;  %v2436_v7 = vsub.f32 0.0, %v2397_v23 }
 0x3a7   : > { %v7633_v22 = vmul.f32 %v5216_v21, %v2625_v44  ;;  %v5218_v33 = vpop.eup %5217  ;;  %v2783_v40 = vmul.f32 %v2687_v26, %v7606_v63  ;;  %v2240_v21 = vadd.f32 %v2239_v4, %v2045_v50  ;;  %v2593_v47 = vmul.f32 1.442695, %v2532_v9  ;;  %v8892_v26 = vld [vmem:[#allocation62_spill] sm:$0xff] }
 0x3a8   : > { %v2626_v13 = vsub.f32 1.0, %v5218_v33  ;;  %v2400_v59 = vpop.f32.mrf.mxu1  ;;  %v2497_v16 = vmul.f32 1.442695, %v2436_v7 }
 0x3a9   : > { %2895 = vadd.xlane.f32.xlu2 %v2779_v35  ;;  %v2531_v35 = vsub.f32 0.0, %v8888_v61  ;;  %v1825_v61 = vpop.f32.mrf.mxu2  ;;  %v2401_v17 = vadd.f32 %v2400_v59, %v2240_v21  ;;  %v8894_v59 = vld [vmem:[#allocation63_spill] sm:$0xff] }
 0x3ab   : > { %v2591_v52 = vmul.f32 1.442695, %v2531_v35  ;;  %v8891_v35 = vld [vmem:[#allocation31_spill] sm:$0xff] }
 0x3ac   : > { %v1826_v44 = vadd.f32 %v1825_v61, %v8891_v35  ;;  %v2050_v46 = vpop.f32.mrf.mxu3  ;;  %v2816_v61 = vmul.f32 %v2720_v11, %v7619_v18 }
 0x3ad   : > { %5221 = vpow2.f32 %v2591_v52 }
 0x3ae   : > { %5223 = vpow2.f32 %v2495_v1  ;;  %v2051_v52 = vadd.f32 %v2050_v46, %v1826_v44  ;;  %v2533_v1 = vsub.f32 0.0, %v8892_v26  ;;  %v2243_v4 = vpop.f32.mrf.mxu0 }
 0x3af   : > { %5225 = vpow2.f32 %v2593_v47  ;;  %v2534_v47 = vsub.f32 0.0, %v8894_v59 }
 0x3b0   : > { %5227 = vpow2.f32 %v2497_v16  ;;  %v2244_v9 = vadd.f32 %v2243_v4, %v2051_v52  ;;  %v2404_v7 = vpop.f32.mrf.mxu1  ;;  %v7655_v52 = vld.sshfl [vmem:[#allocation1 + $0x20] sm:$0xff pattern:$0x75316420] }
 0x3b1   : > { %2961 = vadd.xlane.f32.xlu2 %v2812_v6  ;;  %v5220_v6 = vpop.eup %5219 }
 0x3b2   : > { %v2405_v35 = vadd.f32 %v2404_v7, %v2244_v9 }
 0x3b3   : > { %3029 = vadd.xlane.f32.xlu0 %v2846_v27  ;;  %v7641_v27 = vmul.f32 %v5220_v6, %v2626_v13  ;;  %v5222_v25 = vpop.eup %5221  ;;  %v2437_v6 = vsub.f32 0.0, %v2401_v17 }
 0x3b4   : > { %v5224_v33 = vpop.eup %5223  ;;  %v2627_v50 = vsub.f32 1.0, %v5222_v25  ;;  %v2438_v17 = vsub.f32 0.0, %v2405_v35 }
 0x3b5   : > { %v5226_v21 = vpop.eup %5225 }
 0x3b6   : > { %v7649_v13 = vmul.f32 %v5224_v33, %v2627_v50  ;;  %v5228_v44 = vpop.eup %5227  ;;  %v2628_v25 = vsub.f32 1.0, %v5226_v21  ;;  %v2597_v33 = vmul.f32 1.442695, %v2534_v47  ;;  %v2501_v50 = vmul.f32 1.442695, %v2438_v17 }
 0x3b8   : > { %v7637_v58 = vpop.xlane.xlu0 %2951  ;;  %v7657_v11 = vmul.f32 %v5228_v44, %v2628_v25  ;;  %v7674_v25 = vld.sshfl [vmem:[#allocation1 + $0x10] sm:$0xff pattern:$0x75316420] }
 0x3bb   : > { %2903 = vadd.xlane.f32.xlu0 %v2783_v40  ;;  %v2595_v40 = vmul.f32 1.442695, %v2533_v1 }
 0x3bd   : > { %5229 = vpow2.f32 %v2595_v40 }
 0x3bf   : > { %4222 = vperm.xlu1 %5043, %v7497_v55   ;;  %v2499_v55 = vmul.f32 1.442695, %v2437_v6 }
 0x3c0   : > { %v7646_v23 = vpop.xlane.xlu0 %3017 }
 0x3c1   : > { %8893 = vst [vmem:[#allocation35_spill] sm:$0xff] %v7646_v23  ;;  %5231 = vpow2.f32 %v2499_v55  ;;  %v2688_v23 = vld [vmem:[%s7228_s14 + $0xc8] sm:$0xff] }
 0x3c2   : > { %5233 = vpow2.f32 %v2597_v33 }
 0x3c3   : > { %2969 = vadd.xlane.f32.xlu0 %v2816_v61  ;;  %v5230_v1 = vpop.eup %5229  ;;  %5235 = vpow2.f32 %v2501_v50  ;;  %v2685_v50 = vld [vmem:[%s7228_s14 + $0xb0] sm:$0xff] }
 0x3c4   : > { %v2629_v6 = vsub.f32 1.0, %v5230_v1 }
 0x3c7   : > { %v5232_v4 = vpop.eup %5231 }
 0x3c8   : > { %v2892_v46 = vpop.xlane.xlu0 %2891  ;;  %v7661_v9 = vmul.f32 %v5232_v4, %v2629_v6  ;;  %v5234_v40 = vpop.eup %5233  ;;  %v2749_v4 = vld [vmem:[%s7228_s14 + $0x2b0] sm:$0xff]  ;;  %v2781_v6 = vmul.f32 %v2685_v50, %v7530_v0  ;;  %v2723_v50 = vld [vmem:[%s7228_s14 + $0x1e0] sm:$0xff] }
 0x3c9   : > { %v3290_v26 = vperm.slane %v2892_v46, %v7403_v28  ;;  %v3294_v16 = vperm.slane %v2892_v46, %v7405_v32  ;;  %4225 = vperm.xlu2 %5044, %v7515_v14   ;;  %v7663_v14 = vpop.xlane.xlu1 %2953  ;;  %v5236_v7 = vpop.eup %5235  ;;  %v2630_v55 = vsub.f32 1.0, %v5234_v40  ;;  %v2845_v40 = vmul.f32 %v2749_v4, %v7530_v0 }
 0x3cb   : > { %3970 = vst [vmem:[#allocation1 + $0x20] ss:$2 sm:$0xff] %v3290_v26  ;;  %v7668_v35 = vmul.f32 %v5236_v7, %v2630_v55  ;;  %v2748_v26 = vld [vmem:[%s7228_s14 + $0x2a8] sm:$0xff]  ;;  %v2718_v7 = vld [vmem:[%s7228_s14 + $0x1b8] sm:$0xff] }
 0x3cc   : > { %3971 = vst [vmem:[#allocation1 + $0x21] ss:$2 sm:$0xff] %v3294_v16  ;;  %v2844_v33 = vmul.f32 %v2748_v26, %v7518_v41  ;;  %v2686_v55 = vld [vmem:[%s7228_s14 + $0xb8] sm:$0xff] }
 0x3cd   : > { %v2782_v41 = vmul.f32 %v2686_v55, %v7592_v8  ;;  %v7710_v55 = vadd.s32 4294967264, %v8882_v31 }
 0x3d0   : > { %v7659_v61 = vpop.xlane.xlu0 %2957 }
 0x3d1   : > { %v7670_v44 = vpop.xlane.xlu1 %3019 }
 0x3d2   : > { %8896 = vst [vmem:[#allocation44_spill] sm:$0xff] %v7670_v44  ;;  %v2784_v44 = vmul.f32 %v2688_v23, %v7619_v18  ;;  %v2726_v23 = vld [vmem:[%s7228_s14 + $0x1f8] sm:$0xff] }
 0x3d3   : > { %v7695_v26 = vpop.xlane.xlu2 %2955 }
 0x3d7   : > { %4237 = vperm.xlu0 %5042, %v7576_v30   ;;  %v7677_v30 = vadd.s32 4294967272, %v8882_v31 }
 0x3d8   : > { %v7666_v21 = vpop.xlane.xlu0 %3023 }
 0x3d9   : > { %8895 = vst [vmem:[#allocation39_spill] sm:$0xff] %v7666_v21 }
 0x3e0   : > { %v2898_v59 = vpop.xlane.xlu0 %2897 }
 0x3e1   : > { %v3314_v47 = vperm.slane %v2898_v59, %v7403_v28  ;;  %v3318_v46 = vperm.slane %v2898_v59, %v7405_v32  ;;  %v2814_v59 = vmul.f32 %v2718_v7, %v7592_v8  ;;  %v2819_v8 = vmul.f32 %v2723_v50, %v7649_v13  ;;  %v7707_v7 = vld.sshfl [vmem:[#allocation1 + $0x30] sm:$0xff pattern:$0x75316420] }
 0x3e3   : > { %3980 = vst [vmem:[#allocation1 + $0x10] ss:$2 sm:$0xff] %v3314_v47  ;;  %v2719_v47 = vld [vmem:[%s7228_s14 + $0x1c0] sm:$0xff] }
 0x3e4   : > { %3981 = vst [vmem:[#allocation1 + $0x11] ss:$2 sm:$0xff] %v3318_v46  ;;  %v2815_v0 = vmul.f32 %v2719_v47, %v7606_v63 }
 0x3e6   : > { %v4217_v16 = vpop.permute.xlu1 %4216 }
 0x3e7   : > { %v4504_v17 = vperm.slane %v4217_v16, %v7677_v30  ;;  %v2690_v16 = vld [vmem:[%s7228_s14 + $0xd8] sm:$0xff] }
 0x3e9   : > { %v4506_v1 = vsel %vm4505_vm4, %v4504_v17, %v7615_v51  ;;  %3025 = vadd.xlane.f32.xlu1 %v2844_v33  ;;  %v2753_v51 = vld [vmem:[%s7228_s14 + $0x2d0] sm:$0xff]  ;;  %v2786_v17 = vmul.f32 %v2690_v16, %v7641_v27  ;;  %v7700_v33 = vpop.xlane.xlu2 %3021  ;;  %v7719_v16 = vld.sshfl [vmem:[#allocation1] sm:$0xff pattern:$0x75316420] }
 0x3ea   : > { %v2849_v46 = vmul.f32 %v2753_v51, %v7633_v22  ;;  %8897 = vst [vmem:[#allocation48_spill] sm:$0xff] %v7700_v33  ;;  %v2751_v33 = vld [vmem:[%s7228_s14 + $0x2c0] sm:$0xff] }
 0x3eb   : > { %v2847_v21 = vmul.f32 %v2751_v33, %v7606_v63 }
 0x3f1   : > { %2899 = vadd.xlane.f32.xlu1 %v2781_v6 }
 0x3f2   : > { %3027 = vadd.xlane.f32.xlu2 %v2845_v40 }
 0x3f9   : > { %2965 = vadd.xlane.f32.xlu1 %v2814_v59  ;;  %v4220_v59 = vpop.permute.xlu2 %4219 }
 0x3fa   : > { %2901 = vadd.xlane.f32.xlu2 %v2782_v41  ;;  %v7712_v41 = vpop.xlane.xlu0 %2963  ;;  %v4508_v51 = vperm.slane %v4220_v59, %v7710_v55 }
 0x3fc   : > { %v4510_v47 = vsel %vm4509_vm5, %v4508_v51, %v4506_v1 }
 0x401   : > { %3035 = vadd.xlane.f32.xlu0 %v2849_v46 }
 0x402   : > { %2967 = vadd.xlane.f32.xlu2 %v2815_v0 }
 0x409   : > { %2909 = vadd.xlane.f32.xlu0 %v2786_v17  ;;  %v7721_v17 = vpop.permute.xlu0 %4228 }
 0x411   : > { %v2894_v4 = vpop.xlane.xlu1 %2893  ;;  %2975 = vadd.xlane.f32.xlu0 %v2819_v8 }
 0x412   : > { %v3298_v6 = vperm.slane %v2894_v4, %v7403_v28  ;;  %v3302_v40 = vperm.slane %v2894_v4, %v7405_v32  ;;  %4231 = vperm.xlu1 %5043, %v7540_v2   ;;  %v7731_v4 = vadd.s32 4294967256, %v8882_v31 }
 0x414   : > { %3972 = vst [vmem:[#allocation1 + $0x30] ss:$2 sm:$0xff] %v3298_v6  ;;  %v7734_v6 = vadd.s32 4294967248, %v8882_v31 }
 0x415   : > { %3973 = vst [vmem:[#allocation1 + $0x31] ss:$2 sm:$0xff] %v3302_v40 }
 0x41a   : > { %4234 = vperm.xlu2 %5044, %v7555_v56   ;;  %v7728_v56 = vpop.xlane.xlu1 %2959 }
 0x41c   : > { %v2896_v46 = vpop.xlane.xlu2 %2895 }
 0x41d   : > { %v3306_v2 = vperm.slane %v2896_v46, %v7403_v28  ;;  %v3310_v0 = vperm.slane %v2896_v46, %v7405_v32 }
 0x41f   : > { %3978 = vst [vmem:[#allocation1] ss:$2 sm:$0xff] %v3306_v2 }
 0x420   : > { %3979 = vst [vmem:[#allocation1 + $0x1] ss:$2 sm:$0xff] %v3310_v0 }
 0x424   : > { %v7724_v50 = vpop.xlane.xlu2 %2961 }
 0x425   : > { %4246 = vperm.xlu0 %5042, %v7597_v45  }
 0x426   : > { %v7726_v8 = vpop.xlane.xlu0 %3029 }
 0x427   : > { %8898 = vst [vmem:[#allocation64_spill] sm:$0xff] %v7726_v8  ;;  %v7738_v45 = vld.sshfl [vmem:[#allocation1] sm:$0xff pattern:$0x75316420] }
 0x42c   : > { %v4226_v51 = vpop.permute.xlu2 %4225 }
 0x42d   : > { %v4516_v0 = vperm.slane %v4226_v51, %v7734_v6  ;;  %v2689_v51 = vld [vmem:[%s7228_s14 + $0xd0] sm:$0xff] }
 0x42e   : > { %v2904_v1 = vpop.xlane.xlu0 %2903 }
 0x42f   : > { %v3338_v40 = vperm.slane %v2904_v1, %v7403_v28  ;;  %v3342_v59 = vperm.slane %v2904_v1, %v7405_v32 }
 0x431   : > { %3990 = vst [vmem:[#allocation1] ss:$2 sm:$0xff] %v3338_v40  ;;  %v4223_v46 = vpop.permute.xlu1 %4222  ;;  %v2752_v40 = vld [vmem:[%s7228_s14 + $0x2c8] sm:$0xff] }
 0x432   : > { %3991 = vst [vmem:[#allocation1 + $0x1] ss:$2 sm:$0xff] %v3342_v59  ;;  %v4512_v2 = vperm.slane %v4223_v46, %v7731_v4  ;;  %v2848_v59 = vmul.f32 %v2752_v40, %v7619_v18  ;;  %v2721_v46 = vld [vmem:[%s7228_s14 + $0x1d0] sm:$0xff]  ;;  %v2822_v40 = vmul.f32 %v2726_v23, %v7668_v35  ;;  %v3977_v23 = vld.sshfl [vmem:[#allocation1 + $0x30] sm:$0xff pattern:$0x75316420] }
 0x434   : > { %v4514_v8 = vsel %vm4513_vm6, %v4512_v2, %v4510_v47  ;;  %v2785_v47 = vmul.f32 %v2689_v51, %v7633_v22  ;;  %v2756_v2 = vld [vmem:[%s7228_s14 + $0x2e8] sm:$0xff] }
 0x435   : > { %v4518_v1 = vsel %vm4517_vm7, %v4516_v0, %v4514_v8  ;;  %v2817_v8 = vmul.f32 %v2721_v46, %v7633_v22  ;;  %v2852_v63 = vmul.f32 %v2756_v2, %v7657_v11  ;;  %v2693_v0 = vld [vmem:[%s7228_s14 + $0xf0] sm:$0xff]  ;;  %v7765_v22 = vadd.s32 4294967240, %v8882_v31  ;;  %v7774_v2 = vld.sshfl [vmem:[#allocation1 + $0x20] sm:$0xff pattern:$0x75316420] }
 0x436   : > { %v2789_v18 = vmul.f32 %v2693_v0, %v7661_v9 }
 0x43c   : > { %3031 = vadd.xlane.f32.xlu1 %v2847_v21  ;;  %v2722_v21 = vld [vmem:[%s7228_s14 + $0x1d8] sm:$0xff] }
 0x43d   : > { %v2818_v33 = vmul.f32 %v2722_v21, %v7641_v27 }
 0x443   : > { %3033 = vadd.xlane.f32.xlu2 %v2848_v59  ;;  %v7767_v59 = vpop.xlane.xlu0 %2969 }
 0x444   : > { %2905 = vadd.xlane.f32.xlu1 %v2784_v44 }
 0x44b   : > { %2907 = vadd.xlane.f32.xlu2 %v2785_v47 }
 0x44c   : > { %2971 = vadd.xlane.f32.xlu1 %v2817_v8 }
 0x44f   : > { %3041 = vadd.xlane.f32.xlu0 %v2852_v63  ;;  %v4520_v63 = vperm.slane %v7721_v17, %v7765_v22 }
 0x451   : > { %v4522_v21 = vsel %vm4521_vm8, %v4520_v63, %v4518_v1 }
 0x453   : > { %2973 = vadd.xlane.f32.xlu2 %v2818_v33  ;;  %v7780_v33 = vpop.permute.xlu0 %4237 }
 0x457   : > { %2915 = vadd.xlane.f32.xlu0 %v2789_v18 }
 0x45c   : > { %v7761_v44 = vpop.xlane.xlu1 %3025 }
 0x45d   : > { %8899 = vst [vmem:[#allocation74_spill] sm:$0xff] %v7761_v44  ;;  %v2754_v44 = vld [vmem:[%s7228_s14 + $0x2d8] sm:$0xff] }
 0x45f   : > { %2981 = vadd.xlane.f32.xlu0 %v2822_v40 }
 0x464   : > { %v2900_v51 = vpop.xlane.xlu1 %2899 }
 0x465   : > { %v3322_v46 = vperm.slane %v2900_v51, %v7403_v28  ;;  %v3326_v47 = vperm.slane %v2900_v51, %v7405_v32  ;;  %4240 = vperm.xlu1 %5043, %v7571_v29   ;;  %v7772_v8 = vpop.xlane.xlu2 %3027 }
 0x466   : > { %8900 = vst [vmem:[#allocation75_spill] sm:$0xff] %v7772_v8  ;;  %v2755_v8 = vld [vmem:[%s7228_s14 + $0x2e0] sm:$0xff] }
 0x467   : > { %3982 = vst [vmem:[#allocation1 + $0x20] ss:$2 sm:$0xff] %v3322_v46 }
 0x468   : > { %3983 = vst [vmem:[#allocation1 + $0x21] ss:$2 sm:$0xff] %v3326_v47 }
 0x46b   : > { %4243 = vperm.xlu2 %5044, %v7585_v42  }
 0x46c   : > { %v7789_v1 = vpop.xlane.xlu1 %2965 }
 0x46d   : > { %v2902_v0 = vpop.xlane.xlu2 %2901  ;;  %8902 = vst [vmem:[#allocation65_spill] sm:$0xff] %v7789_v1  ;;  %v2691_v1 = vld [vmem:[%s7228_s14 + $0xe0] sm:$0xff] }
 0x46e   : > { %v3330_v18 = vperm.slane %v2902_v0, %v7403_v28  ;;  %v3334_v29 = vperm.slane %v2902_v0, %v7405_v32  ;;  %v7799_v0 = vadd.s32 4294967224, %v8882_v31  ;;  %v2787_v15 = vmul.f32 %v2691_v1, %v7649_v13 }
 0x46f   : > { %v3988_v63 = vld.sshfl [vmem:[#allocation1 + $0x20] sm:$0xff pattern:$0x75316420] }
 0x470   : > { %3984 = vst [vmem:[#allocation1 + $0x30] ss:$2 sm:$0xff] %v3330_v18 }
 0x471   : > { %3985 = vst [vmem:[#allocation1 + $0x31] ss:$2 sm:$0xff] %v3334_v29 }
 0x472   : > { %8903 = vst [vmem:[#allocation28_spill] sm:$0xff] %v7799_v0 }
 0x473   : > { %4255 = vperm.xlu0 %5042, %v7719_v16   ;;  %v7796_v16 = vadd.s32 4294967232, %v8882_v31 }
 0x474   : > { %v7785_v17 = vpop.xlane.xlu0 %3035 }
 0x475   : > { %8901 = vst [vmem:[#allocation49_spill] sm:$0xff] %v7785_v17  ;;  %v7787_v40 = vpop.xlane.xlu2 %2967  ;;  %v2850_v17 = vmul.f32 %v2754_v44, %v7641_v27 }
 0x478   : > { %v7793_v47 = vld.sshfl [vmem:[#allocation1 + $0x30] sm:$0xff pattern:$0x75316420] }
 0x47b   : > { %4264 = vperm.xlu0 %5042, %v3977_v23  }
 0x47c   : > { %v2910_v42 = vpop.xlane.xlu0 %2909 }
 0x47d   : > { %v3362_v51 = vperm.slane %v2910_v42, %v7403_v28  ;;  %v3366_v46 = vperm.slane %v2910_v42, %v7405_v32  ;;  %v4235_v18 = vpop.permute.xlu2 %4234 }
 0x47e   : > { %v4528_v42 = vperm.slane %v4235_v18, %v7799_v0  ;;  %v2724_v0 = vld [vmem:[%s7228_s14 + $0x1e8] sm:$0xff] }
 0x47f   : > { %3996 = vst [vmem:[#allocation1 + $0x30] ss:$2 sm:$0xff] %v3362_v51 }
 0x480   : > { %3997 = vst [vmem:[#allocation1 + $0x31] ss:$2 sm:$0xff] %v3366_v46 }
 0x483   : > { %4273 = vperm.xlu0 %5042, %v3988_v63   ;;  %v2851_v63 = vmul.f32 %v2755_v8, %v7649_v13 }
 0x484   : > { %v4232_v29 = vpop.permute.xlu1 %4231  ;;  %v7819_v8 = vpop.xlane.xlu0 %2975 }
 0x485   : > { %v4524_v23 = vperm.slane %v4232_v29, %v7796_v16  ;;  %v2692_v29 = vld [vmem:[%s7228_s14 + $0xe8] sm:$0xff] }
 0x486   : > { %v2788_v18 = vmul.f32 %v2692_v29, %v7657_v11 }
 0x487   : > { %v4526_v51 = vsel %vm4525_vm9, %v4524_v23, %v4522_v21  ;;  %v2820_v21 = vmul.f32 %v2724_v0, %v7657_v11  ;;  %v2725_v23 = vld [vmem:[%s7228_s14 + $0x1f0] sm:$0xff] }
 0x488   : > { %v4530_v46 = vsel %vm4529_vm10, %v4528_v42, %v4526_v51  ;;  %v2821_v27 = vmul.f32 %v2725_v23, %v7661_v9  ;;  %v3987_v42 = vld.sshfl [vmem:[#allocation1 + $0x10] sm:$0xff pattern:$0x75316420] }
 0x48f   : > { %3037 = vadd.xlane.f32.xlu1 %v2850_v17 }
 0x494   : > { %3039 = vadd.xlane.f32.xlu2 %v2851_v63 }
 0x497   : > { %2911 = vadd.xlane.f32.xlu1 %v2787_v15  ;;  %v7826_v11 = vpop.permute.xlu0 %4246 }
 0x49c   : > { %2913 = vadd.xlane.f32.xlu2 %v2788_v18 }
 0x49f   : > { %2977 = vadd.xlane.f32.xlu1 %v2820_v21 }
 0x4a4   : > { %2979 = vadd.xlane.f32.xlu2 %v2821_v27 }
 0x4af   : > { %v7817_v44 = vpop.xlane.xlu1 %3031 }
 0x4b0   : > { %8904 = vst [vmem:[#allocation29_spill] sm:$0xff] %v7817_v44  ;;  %v2757_v44 = vld [vmem:[%s7228_s14 + $0x2f0] sm:$0xff] }
 0x4b6   : > { %v7821_v17 = vpop.xlane.xlu2 %3033 }
 0x4b7   : > { %8905 = vst [vmem:[#allocation52_spill] sm:$0xff] %v7821_v17  ;;  %v2906_v13 = vpop.xlane.xlu1 %2905  ;;  %v3450_v17 = vperm.slane %v7469_v43, %v7403_v28 }
 0x4b8   : > { %v3346_v15 = vperm.slane %v2906_v13, %v7403_v28  ;;  %v3350_v1 = vperm.slane %v2906_v13, %v7405_v32  ;;  %4249 = vperm.xlu1 %5043, %v7655_v52   ;;  %v7834_v52 = vadd.s32 4294967216, %v8882_v31 }
 0x4ba   : > { %3992 = vst [vmem:[#allocation1 + $0x10] ss:$2 sm:$0xff] %v3346_v15  ;;  %v4532_v21 = vperm.slane %v7780_v33, %v7834_v52  ;;  %v7850_v33 = vadd.s32 4294967208, %v8882_v31 }
 0x4bb   : > { %3993 = vst [vmem:[#allocation1 + $0x11] ss:$2 sm:$0xff] %v3350_v1 }
 0x4bc   : > { %4252 = vperm.xlu2 %5044, %v7707_v7   ;;  %v4534_v7 = vsel %vm8649_vm11, %v4532_v21, %v4530_v46  ;;  %v3422_v46 = vperm.slane %v7430_v24, %v7405_v32 }
 0x4be   : > { %v2908_v0 = vpop.xlane.xlu2 %2907 }
 0x4bf   : > { %v3354_v51 = vperm.slane %v2908_v0, %v7403_v28  ;;  %v3358_v63 = vperm.slane %v2908_v0, %v7405_v32  ;;  %v7845_v0 = vpop.xlane.xlu1 %2971 }
 0x4c1   : > { %3994 = vst [vmem:[#allocation1 + $0x20] ss:$2 sm:$0xff] %v3354_v51  ;;  %v3418_v51 = vperm.slane %v7430_v24, %v7403_v28 }
 0x4c2   : > { %v3999_v29 = vld.sshfl [vmem:[#allocation1 + $0x10] sm:$0xff pattern:$0x75316420]  ;;  %3995 = vst [vmem:[#allocation1 + $0x21] ss:$2 sm:$0xff] %v3358_v63  ;;  %v7831_v18 = vpop.xlane.xlu0 %3041 }
 0x4c3   : > { %8906 = vst [vmem:[#allocation34_spill] sm:$0xff] %v7831_v18  ;;  %4282 = vperm.xlu0 %5042, %v3999_v29   ;;  %v7857_v29 = vadd.s32 4294967200, %v8882_v31 }
 0x4c6   : > { %v7843_v1 = vpop.xlane.xlu2 %2973 }
 0x4c7   : > { %8907 = vst [vmem:[#allocation78_spill] sm:$0xff] %v7843_v1  ;;  %v2853_v1 = vmul.f32 %v2757_v44, %v7661_v9 }
 0x4c9   : > { %v7841_v15 = vld.sshfl [vmem:[#allocation1 + $0x20] sm:$0xff pattern:$0x75316420] }
 0x4ca   : > { %v2916_v23 = vpop.xlane.xlu0 %2915 }
 0x4cb   : > { %v3386_v27 = vperm.slane %v2916_v23, %v7403_v28  ;;  %v3390_v13 = vperm.slane %v2916_v23, %v7405_v32 }
 0x4cd   : > { %4006 = vst [vmem:[#allocation1 + $0x20] ss:$2 sm:$0xff] %v3386_v27 }
 0x4ce   : > { %4007 = vst [vmem:[#allocation1 + $0x21] ss:$2 sm:$0xff] %v3390_v13  ;;  %v4244_v21 = vpop.permute.xlu2 %4243 }
 0x4cf   : > { %v4540_v13 = vperm.slane %v4244_v21, %v7857_v29 }
 0x4d5   : > { %v7854_v63 = vld.sshfl [vmem:[#allocation1 + $0x20] sm:$0xff pattern:$0x75316420] }
 0x4d6   : > { %4018 = vst [vmem:[#allocation1 + $0x20] ss:$2 sm:$0xff] %v3418_v51  ;;  %v3454_v51 = vperm.slane %v7469_v43, %v7405_v32 }
 0x4d7   : > { %4019 = vst [vmem:[#allocation1 + $0x21] ss:$2 sm:$0xff] %v3422_v46  ;;  %v4241_v23 = vpop.permute.xlu1 %4240 }
 0x4d8   : > { %v4536_v27 = vperm.slane %v4241_v23, %v7850_v33  ;;  %v2758_v23 = vld [vmem:[%s7228_s14 + $0x2f8] sm:$0xff] }
 0x4d9   : > { %v2854_v21 = vmul.f32 %v2758_v23, %v7668_v35 }
 0x4da   : > { %v4538_v18 = vsel %vm4537_vm12, %v4536_v27, %v4534_v7  ;;  %v2694_v7 = vld [vmem:[%s7228_s14 + $0xf8] sm:$0xff]  ;;  %v3486_v27 = vperm.slane %v7508_v38, %v7405_v32 }
 0x4db   : > { %v4542_v24 = vsel %vm4541_vm13, %v4540_v13, %v4538_v18  ;;  %v3482_v18 = vperm.slane %v7508_v38, %v7403_v28  ;;  %v2790_v43 = vmul.f32 %v2694_v7, %v7668_v35  ;;  %v3998_v35 = vld.sshfl [vmem:[#allocation1] sm:$0xff pattern:$0x75316420]  ;;  %v4001_v7 = vld.sshfl [vmem:[#allocation1 + $0x30] sm:$0xff pattern:$0x75316420] }
 0x4de   : > { %v7868_v46 = vld.sshfl [vmem:[#allocation1 + $0x20] sm:$0xff pattern:$0x75316420] }
 0x4df   : > { %4030 = vst [vmem:[#allocation1 + $0x20] ss:$2 sm:$0xff] %v3450_v17  ;;  %v7888_v17 = vadd.s32 4294967192, %v8882_v31 }
 0x4e0   : > { %4031 = vst [vmem:[#allocation1 + $0x21] ss:$2 sm:$0xff] %v3454_v51 }
 0x4e2   : > { %3043 = vadd.xlane.f32.xlu1 %v2853_v1 }
 0x4e5   : > { %3045 = vadd.xlane.f32.xlu2 %v2854_v21 }
 0x4e7   : > { %v7878_v13 = vld.sshfl [vmem:[#allocation1 + $0x20] sm:$0xff pattern:$0x75316420] }
 0x4e8   : > { %4042 = vst [vmem:[#allocation1 + $0x20] ss:$2 sm:$0xff] %v3482_v18 }
 0x4e9   : > { %4043 = vst [vmem:[#allocation1 + $0x21] ss:$2 sm:$0xff] %v3486_v27  ;;  %v3414_v27 = vperm.slane %v7414_v5, %v7405_v32 }
 0x4ea   : > { %2917 = vadd.xlane.f32.xlu1 %v2790_v43 }
 0x4fd   : > { %4261 = vperm.xlu2 %5044, %v7774_v2   ;;  %v4544_v2 = vperm.slane %v7826_v11, %v7888_v17  ;;  %v3406_v11 = vperm.slane %v7407_v34, %v7405_v32 }
 0x502   : > { %v7882_v9 = vpop.xlane.xlu1 %3037 }
 0x503   : > { %4258 = vperm.xlu1 %5043, %v7674_v25  }
 0x505   : > { %4270 = vperm.xlu2 %5044, %v3987_v42   ;;  %v4546_v42 = vsel %vm4545_vm14, %v4544_v2, %v4542_v24  ;;  %v3410_v24 = vperm.slane %v7414_v5, %v7403_v28  ;;  %v3442_v5 = vperm.slane %v7455_v36, %v7403_v28 }
 0x507   : > { %v7885_v44 = vpop.xlane.xlu2 %3039 }
 0x50a   : > { %v2912_v38 = vpop.xlane.xlu1 %2911 }
 0x50b   : > { %v3370_v1 = vperm.slane %v2912_v38, %v7403_v28  ;;  %v3374_v51 = vperm.slane %v2912_v38, %v7405_v32  ;;  %4267 = vperm.xlu1 %5043, %v7738_v45   ;;  %v3402_v45 = vperm.slane %v7407_v34, %v7403_v28  ;;  %v3438_v34 = vperm.slane %v7444_v3, %v7405_v32 }
 0x50d   : > { %4002 = vst [vmem:[#allocation1] ss:$2 sm:$0xff] %v3370_v1  ;;  %4279 = vperm.xlu2 %5044, %v3998_v35  }
 0x50e   : > { %4003 = vst [vmem:[#allocation1 + $0x1] ss:$2 sm:$0xff] %v3374_v51 }
 0x50f   : > { %v2914_v25 = vpop.xlane.xlu2 %2913 }
 0x510   : > { %v3378_v23 = vperm.slane %v2914_v25, %v7403_v28  ;;  %v3382_v21 = vperm.slane %v2914_v25, %v7405_v32  ;;  %v7926_v25 = vadd.s32 4294967184, %v8882_v31 }
 0x512   : > { %4004 = vst [vmem:[#allocation1 + $0x10] ss:$2 sm:$0xff] %v3378_v23  ;;  %v7917_v51 = vpop.xlane.xlu1 %2977  ;;  %v7929_v23 = vadd.s32 4294967176, %v8882_v31 }
 0x513   : > { %4005 = vst [vmem:[#allocation1 + $0x11] ss:$2 sm:$0xff] %v3382_v21  ;;  %4276 = vperm.xlu1 %5043, %v7793_v47   ;;  %v3434_v47 = vperm.slane %v7444_v3, %v7403_v28  ;;  %v3466_v3 = vperm.slane %v7484_v48, %v7403_v28 }
 0x515   : > { %v4010_v18 = vld.sshfl [vmem:[#allocation1] sm:$0xff pattern:$0x75316420]  ;;  %4288 = vperm.xlu2 %5044, %v4001_v7  }
 0x516   : > { %4014 = vst [vmem:[#allocation1] ss:$2 sm:$0xff] %v3402_v45  ;;  %4291 = vperm.xlu0 %5042, %v4010_v18   ;;  %v3474_v45 = vperm.slane %v7510_v49, %v7403_v28 }
 0x517   : > { %4015 = vst [vmem:[#allocation1 + $0x1] ss:$2 sm:$0xff] %v3406_v11  ;;  %v7913_v1 = vpop.xlane.xlu2 %2979 }
 0x51a   : > { %v4011_v43 = vld.sshfl [vmem:[#allocation1 + $0x10] sm:$0xff pattern:$0x75316420] }
 0x51b   : > { %4016 = vst [vmem:[#allocation1 + $0x10] ss:$2 sm:$0xff] %v3410_v24  ;;  %4285 = vperm.xlu1 %5043, %v7841_v15   ;;  %v3446_v15 = vperm.slane %v7455_v36, %v7405_v32 }
 0x51c   : > { %4017 = vst [vmem:[#allocation1 + $0x11] ss:$2 sm:$0xff] %v3414_v27 }
 0x51d   : > { %4297 = vperm.xlu2 %5044, %v7854_v63   ;;  %v3470_v63 = vperm.slane %v7484_v48, %v7405_v32  ;;  %v3478_v48 = vperm.slane %v7510_v49, %v7405_v32  ;;  %v3546_v49 = vperm.slane %v7695_v26, %v7403_v28 }
 0x51e   : > { %v4022_v38 = vld.sshfl [vmem:[#allocation1] sm:$0xff pattern:$0x75316420] }
 0x51f   : > { %4026 = vst [vmem:[#allocation1] ss:$2 sm:$0xff] %v3434_v47  ;;  %v4253_v36 = vpop.permute.xlu2 %4252  ;;  %v3518_v47 = vperm.slane %v7563_v62, %v7405_v32 }
 0x520   : > { %4027 = vst [vmem:[#allocation1 + $0x1] ss:$2 sm:$0xff] %v3438_v34  ;;  %v4552_v18 = vperm.slane %v4253_v36, %v7929_v23  ;;  %v7947_v34 = vld.sshfl [vmem:[#allocation1 + $0x20] sm:$0xff pattern:$0x75316420]  ;;  %v3502_v36 = vperm.slane %v7550_v19, %v7405_v32 }
 0x521   : > { %4055 = vst [vmem:[#allocation1 + $0x21] ss:$2 sm:$0xff] %v3518_v47  ;;  %v3426_v47 = vperm.slane %v7446_v20, %v7403_v28 }
 0x523   : > { %v4023_v35 = vld.sshfl [vmem:[#allocation1 + $0x10] sm:$0xff pattern:$0x75316420]  ;;  %4294 = vperm.xlu1 %5043, %v4011_v43   ;;  %v3514_v43 = vperm.slane %v7563_v62, %v7403_v28  ;;  %v3582_v62 = vperm.slane %v7712_v41, %v7405_v32 }
 0x524   : > { %4028 = vst [vmem:[#allocation1 + $0x10] ss:$2 sm:$0xff] %v3442_v5  ;;  %v3578_v5 = vperm.slane %v7712_v41, %v7403_v28 }
 0x525   : > { %4029 = vst [vmem:[#allocation1 + $0x11] ss:$2 sm:$0xff] %v3446_v15  ;;  %4306 = vperm.xlu2 %5044, %v4023_v35  }
 0x526   : > { %4054 = vst [vmem:[#allocation1 + $0x20] ss:$2 sm:$0xff] %v3514_v43  ;;  %v3614_v43 = vperm.slane %v7845_v0, %v7405_v32 }
 0x527   : > { %v4034_v2 = vld.sshfl [vmem:[#allocation1] sm:$0xff pattern:$0x75316420] }
 0x528   : > { %4038 = vst [vmem:[#allocation1] ss:$2 sm:$0xff] %v3466_v3 }
 0x529   : > { %4039 = vst [vmem:[#allocation1 + $0x1] ss:$2 sm:$0xff] %v3470_v63 }
 0x52a   : > { %v4250_v21 = vpop.permute.xlu1 %4249 }
 0x52b   : > { %v4548_v7 = vperm.slane %v4250_v21, %v7926_v25  ;;  %4303 = vperm.xlu1 %5043, %v4022_v38   ;;  %v7969_v21 = vpop.xlane.xlu0 %2981 }
 0x52c   : > { %v7936_v11 = vld.sshfl [vmem:[#allocation1 + $0x10] sm:$0xff pattern:$0x75316420] }
 0x52d   : > { %4040 = vst [vmem:[#allocation1 + $0x10] ss:$2 sm:$0xff] %v3474_v45  ;;  %v4550_v24 = vsel %vm4549_vm15, %v4548_v7, %v4546_v42  ;;  %4315 = vperm.xlu2 %5044, %v4034_v2   ;;  %v3550_v42 = vperm.slane %v7695_v26, %v7405_v32  ;;  %v7953_v38 = vld.sshfl [vmem:[#allocation1 + $0x20] sm:$0xff pattern:$0x75316420]  ;;  %v3498_v2 = vperm.slane %v7550_v19, %v7403_v28 }
 0x52e   : > { %4041 = vst [vmem:[#allocation1 + $0x11] ss:$2 sm:$0xff] %v3478_v48  ;;  %v7941_v27 = vsel %vm4553_vm0, %v4552_v18, %v4550_v24  ;;  %v3506_v45 = vperm.slane %v7548_v60, %v7403_v28  ;;  %v3510_v48 = vperm.slane %v7548_v60, %v7405_v32  ;;  %v3610_v19 = vperm.slane %v7845_v0, %v7403_v28 }
 0x52f   : > { %4066 = vst [vmem:[#allocation1 + $0x20] ss:$2 sm:$0xff] %v3546_v49  ;;  %v3430_v60 = vperm.slane %v7446_v20, %v7405_v32  ;;  %v3542_v20 = vperm.slane %v7663_v14, %v7405_v32 }
 0x530   : > { %4067 = vst [vmem:[#allocation1 + $0x21] ss:$2 sm:$0xff] %v3550_v42  ;;  %v7971_v41 = vld.sshfl [vmem:[#allocation1] sm:$0xff pattern:$0x75316420]  ;;  %v3530_v42 = vperm.slane %v7637_v58, %v7403_v28 }
 0x531   : > { %4050 = vst [vmem:[#allocation1] ss:$2 sm:$0xff] %v3498_v2 }
 0x532   : > { %4051 = vst [vmem:[#allocation1 + $0x1] ss:$2 sm:$0xff] %v3502_v36 }
 0x535   : > { %v7975_v7 = vld.sshfl [vmem:[#allocation1 + $0x10] sm:$0xff pattern:$0x75316420] }
 0x536   : > { %4052 = vst [vmem:[#allocation1 + $0x10] ss:$2 sm:$0xff] %v3506_v45  ;;  %v3458_v45 = vperm.slane %v7467_v54, %v7403_v28 }
 0x537   : > { %v7961_v35 = vld.sshfl [vmem:[#allocation1 + $0x20] sm:$0xff pattern:$0x75316420]  ;;  %4053 = vst [vmem:[#allocation1 + $0x11] ss:$2 sm:$0xff] %v3510_v48  ;;  %v3462_v48 = vperm.slane %v7467_v54, %v7405_v32 }
 0x538   : > { %4078 = vst [vmem:[#allocation1 + $0x20] ss:$2 sm:$0xff] %v3578_v5  ;;  %v4256_v5 = vpop.permute.xlu0 %4255 }
 0x539   : > { %4079 = vst [vmem:[#allocation1 + $0x21] ss:$2 sm:$0xff] %v3582_v62  ;;  %v3534_v62 = vperm.slane %v7637_v58, %v7405_v32  ;;  %v7995_v0 = vld.sshfl [vmem:[#allocation1] sm:$0xff pattern:$0x75316420]  ;;  %v4555_v54 = vperm.slane %v4256_v5, %v8882_v31 }
 0x53a   : > { %4062 = vst [vmem:[#allocation1] ss:$2 sm:$0xff] %v3530_v42  ;;  %v3674_v42 = vperm.slane %v7435_v57, %v7403_v28 }
 0x53b   : > { %4063 = vst [vmem:[#allocation1 + $0x1] ss:$2 sm:$0xff] %v3534_v62 }
 0x53e   : > { %v8005_v2 = vld.sshfl [vmem:[#allocation1 + $0x10] sm:$0xff pattern:$0x75316420] }
 0x53f   : > { %4065 = vst [vmem:[#allocation1 + $0x11] ss:$2 sm:$0xff] %v3542_v20 }
 0x540   : > { %v7979_v18 = vld.sshfl [vmem:[#allocation1 + $0x20] sm:$0xff pattern:$0x75316420] }
 0x541   : > { %4090 = vst [vmem:[#allocation1 + $0x20] ss:$2 sm:$0xff] %v3610_v19  ;;  %v3566_v19 = vperm.slane %v7728_v56, %v7405_v32 }
 0x542   : > { %4091 = vst [vmem:[#allocation1 + $0x21] ss:$2 sm:$0xff] %v3614_v43  ;;  %v4265_v43 = vpop.permute.xlu0 %4264 }
 0x543   : > { %v4560_v62 = vperm.slane %v4265_v43, %v7677_v30  ;;  %v3594_v43 = vperm.slane %v7787_v40, %v7403_v28 }
 0x549   : > { %v8007_v36 = vld.sshfl [vmem:[#allocation1 + $0x20] sm:$0xff pattern:$0x75316420] }
 0x555   : > { %v7957_v15 = vpop.xlane.xlu1 %3043 }
 0x558   : > { %v7983_v24 = vpop.xlane.xlu2 %3045 }
 0x55d   : > { %v2918_v3 = vpop.xlane.xlu1 %2917 }
 0x55e   : > { %v3394_v63 = vperm.slane %v2918_v3, %v7403_v28  ;;  %v3398_v26 = vperm.slane %v2918_v3, %v7405_v32  ;;  %v3538_v3 = vperm.slane %v7663_v14, %v7403_v28 }
 0x560   : > { %4008 = vst [vmem:[#allocation1 + $0x30] ss:$2 sm:$0xff] %v3394_v63  ;;  %v3642_v63 = vperm.slane %v7913_v1, %v7403_v28  ;;  %v4262_v58 = vpop.permute.xlu2 %4261 }
 0x561   : > { %4009 = vst [vmem:[#allocation1 + $0x31] ss:$2 sm:$0xff] %v3398_v26  ;;  %v3646_v26 = vperm.slane %v7913_v1, %v7405_v32  ;;  %v3562_v1 = vperm.slane %v7728_v56, %v7403_v28 }
 0x562   : > { %4064 = vst [vmem:[#allocation1 + $0x10] ss:$2 sm:$0xff] %v3538_v3 }
 0x563   : > { %4102 = vst [vmem:[#allocation1 + $0x20] ss:$2 sm:$0xff] %v3642_v63  ;;  %v3490_v63 = vperm.slane %v7526_v37, %v7403_v28 }
 0x564   : > { %4103 = vst [vmem:[#allocation1 + $0x21] ss:$2 sm:$0xff] %v3646_v26  ;;  %v3494_v26 = vperm.slane %v7526_v37, %v7405_v32  ;;  %v3678_v37 = vperm.slane %v7435_v57, %v7405_v32 }
 0x568   : > { %v4013_v49 = vld.sshfl [vmem:[#allocation1 + $0x30] sm:$0xff pattern:$0x75316420]  ;;  %v4271_v3 = vpop.permute.xlu2 %4270 }
 0x569   : > { %4020 = vst [vmem:[#allocation1 + $0x30] ss:$2 sm:$0xff] %v3426_v47  ;;  %4300 = vperm.xlu0 %5042, %v4013_v49   ;;  %v8018_v47 = vld.sshfl [vmem:[#allocation1] sm:$0xff pattern:$0x75316420] }
 0x56a   : > { %4021 = vst [vmem:[#allocation1 + $0x31] ss:$2 sm:$0xff] %v3430_v60 }
 0x56b   : > { %4074 = vst [vmem:[#allocation1] ss:$2 sm:$0xff] %v3562_v1  ;;  %v8031_v5 = vld.sshfl [vmem:[#allocation1 + $0x20] sm:$0xff pattern:$0x75316420]  ;;  %v4274_v1 = vpop.permute.xlu0 %4273 }
 0x56c   : > { %4075 = vst [vmem:[#allocation1 + $0x1] ss:$2 sm:$0xff] %v3566_v19 }
 0x56d   : > { %4114 = vst [vmem:[#allocation1 + $0x20] ss:$2 sm:$0xff] %v3674_v42  ;;  %v3522_v42 = vperm.slane %v7581_v12, %v7403_v28 }
 0x56e   : > { %4115 = vst [vmem:[#allocation1 + $0x21] ss:$2 sm:$0xff] %v3678_v37 }
 0x571   : > { %v4025_v14 = vld.sshfl [vmem:[#allocation1 + $0x30] sm:$0xff pattern:$0x75316420]  ;;  %4309 = vperm.xlu0 %5042, %v7868_v46   ;;  %v4558_v46 = vperm.slane %v4262_v58, %v7603_v53 }
 0x572   : > { %4032 = vst [vmem:[#allocation1 + $0x30] ss:$2 sm:$0xff] %v3458_v45  ;;  %4312 = vperm.xlu1 %5043, %v4025_v14   ;;  %v8039_v14 = vld.sshfl [vmem:[#allocation1 + $0x10] sm:$0xff pattern:$0x75316420] }
 0x573   : > { %4033 = vst [vmem:[#allocation1 + $0x31] ss:$2 sm:$0xff] %v3462_v48  ;;  %v3570_v48 = vperm.slane %v7724_v50, %v7403_v28  ;;  %v8053_v57 = vld.sshfl [vmem:[#allocation1] sm:$0xff pattern:$0x75316420] }
 0x574   : > { %4086 = vst [vmem:[#allocation1] ss:$2 sm:$0xff] %v3594_v43 }
 0x575   : > { %v4259_v60 = vpop.permute.xlu1 %4258  ;;  %4076 = vst [vmem:[#allocation1 + $0x10] ss:$2 sm:$0xff] %v3570_v48 }
 0x576   : > { %v4556_v49 = vperm.slane %v4259_v60, %v7600_v39  ;;  %v4564_v60 = vperm.slane %v4271_v3, %v7731_v4 }
 0x578   : > { %v4557_v56 = vsel %vm4497_vm1, %v4556_v49, %v4555_v54  ;;  %v3598_v54 = vperm.slane %v7787_v40, %v7405_v32  ;;  %v3526_v40 = vperm.slane %v7581_v12, %v7405_v32  ;;  %v8073_v12 = vld.sshfl [vmem:[#allocation1 + $0x20] sm:$0xff pattern:$0x75316420] }
 0x579   : > { %v4559_v20 = vsel %vm4501_vm3, %v4558_v46, %v4557_v56  ;;  %4318 = vperm.xlu0 %5042, %v7936_v11   ;;  %v3574_v11 = vperm.slane %v7724_v50, %v7405_v32  ;;  %v4566_v50 = vperm.slane %v4274_v1, %v7734_v6 }
 0x57a   : > { %v4037_v58 = vld.sshfl [vmem:[#allocation1 + $0x30] sm:$0xff pattern:$0x75316420]  ;;  %4321 = vperm.xlu1 %5043, %v7878_v13   ;;  %v4561_v45 = vsel %vm4505_vm4, %v4560_v62, %v4559_v20  ;;  %v4280_v62 = vpop.permute.xlu2 %4279  ;;  %4087 = vst [vmem:[#allocation1 + $0x1] ss:$2 sm:$0xff] %v3598_v54 }
 0x57b   : > { %4044 = vst [vmem:[#allocation1 + $0x30] ss:$2 sm:$0xff] %v3490_v63  ;;  %4324 = vperm.xlu2 %5044, %v4037_v58   ;;  %v3602_v63 = vperm.slane %v7767_v59, %v7403_v28  ;;  %v8908_v54 = vld [vmem:[#allocation28_spill] sm:$0xff] }
 0x57c   : > { %4045 = vst [vmem:[#allocation1 + $0x31] ss:$2 sm:$0xff] %v3494_v26 }
 0x57d   : > { %v4268_v19 = vpop.permute.xlu1 %4267  ;;  %4077 = vst [vmem:[#allocation1 + $0x11] ss:$2 sm:$0xff] %v3574_v11  ;;  %v3630_v11 = vperm.slane %v7819_v8, %v7405_v32 }
 0x57e   : > { %v4562_v13 = vperm.slane %v4268_v19, %v7710_v55  ;;  %v4283_v19 = vpop.permute.xlu0 %4282 }
 0x580   : > { %v4563_v49 = vsel %vm4509_vm5, %v4562_v13, %v4561_v45  ;;  %v4570_v45 = vperm.slane %v4280_v62, %v7796_v16  ;;  %v3558_v13 = vperm.slane %v7659_v61, %v7405_v32 }
 0x581   : > { %v4565_v46 = vsel %vm4513_vm6, %v4564_v60, %v4563_v49  ;;  %4327 = vperm.xlu0 %5042, %v7971_v41   ;;  %v3606_v41 = vperm.slane %v7767_v59, %v7405_v32  ;;  %v3626_v59 = vperm.slane %v7819_v8, %v7403_v28  ;;  %v8084_v1 = vld.sshfl [vmem:[#allocation1] sm:$0xff pattern:$0x75316420]  ;;  %v3634_v60 = vperm.slane %v7917_v51, %v7403_v28 }
 0x582   : > { %4330 = vperm.xlu1 %5043, %v7975_v7   ;;  %v4567_v3 = vsel %vm4517_vm7, %v4566_v50, %v4565_v46  ;;  %v3706_v7 = vperm.slane %v7462_v10, %v7403_v28  ;;  %4099 = vst [vmem:[#allocation1 + $0x1] ss:$2 sm:$0xff] %v3630_v11  ;;  %v4289_v8 = vpop.permute.xlu2 %4288  ;;  %v4572_v50 = vperm.slane %v4283_v19, %v8908_v54  ;;  %v8912_v19 = vld [vmem:[#allocation18_spill] sm:$0xff] }
 0x583   : > { %4333 = vperm.xlu2 %5044, %v7947_v34   ;;  %v4049_v56 = vld.sshfl [vmem:[#allocation1 + $0x30] sm:$0xff pattern:$0x75316420]  ;;  %v3710_v34 = vperm.slane %v7462_v10, %v7405_v32  ;;  %4098 = vst [vmem:[#allocation1] ss:$2 sm:$0xff] %v3626_v59  ;;  %v3554_v10 = vperm.slane %v7659_v61, %v7403_v28  ;;  %v4576_v62 = vperm.slane %v4289_v8, %v7850_v33 }
 0x584   : > { %4056 = vst [vmem:[#allocation1 + $0x30] ss:$2 sm:$0xff] %v3522_v42  ;;  %v8068_v26 = vld.sshfl [vmem:[#allocation1 + $0x10] sm:$0xff pattern:$0x75316420]  ;;  %v8909_v42 = vld [vmem:[#allocation23_spill] sm:$0xff] }
 0x585   : > { %v4277_v20 = vpop.permute.xlu1 %4276  ;;  %4057 = vst [vmem:[#allocation1 + $0x31] ss:$2 sm:$0xff] %v3526_v40  ;;  %v3738_v61 = vperm.slane %v8909_v42, %v7403_v28  ;;  %v3742_v40 = vperm.slane %v8909_v42, %v7405_v32  ;;  %v8914_v42 = vld [vmem:[#allocation41_spill] sm:$0xff] }
 0x586   : > { %v4568_v58 = vperm.slane %v4277_v20, %v7765_v22  ;;  %4088 = vst [vmem:[#allocation1 + $0x10] ss:$2 sm:$0xff] %v3602_v63  ;;  %v8910_v63 = vld [vmem:[#allocation33_spill] sm:$0xff] }
 0x587   : > { %4089 = vst [vmem:[#allocation1 + $0x11] ss:$2 sm:$0xff] %v3606_v41  ;;  %v3658_v41 = vperm.slane %v8910_v63, %v7403_v28 }
 0x588   : > { %v4569_v48 = vsel %vm4521_vm8, %v4568_v58, %v4567_v3  ;;  %4126 = vst [vmem:[#allocation1 + $0x20] ss:$2 sm:$0xff] %v3706_v7  ;;  %v3662_v7 = vperm.slane %v8910_v63, %v7405_v32  ;;  %v4292_v58 = vpop.permute.xlu0 %4291 }
 0x589   : > { %v4571_v37 = vsel %vm4525_vm9, %v4570_v45, %v4569_v48  ;;  %4336 = vperm.xlu0 %5042, %v4049_v56   ;;  %4127 = vst [vmem:[#allocation1 + $0x21] ss:$2 sm:$0xff] %v3710_v34  ;;  %v8911_v45 = vld [vmem:[#allocation65_spill] sm:$0xff] }
 0x58a   : > { %4339 = vperm.xlu1 %5043, %v7995_v0   ;;  %v3638_v0 = vperm.slane %v7917_v51, %v7405_v32  ;;  %v4573_v3 = vsel %vm4529_vm10, %v4572_v50, %v4571_v37  ;;  %v8115_v34 = vld.sshfl [vmem:[#allocation1] sm:$0xff pattern:$0x75316420]  ;;  %v3586_v59 = vperm.slane %v8911_v45, %v7403_v28  ;;  %v3590_v48 = vperm.slane %v8911_v45, %v7405_v32 }
 0x58b   : > { %4342 = vperm.xlu2 %5044, %v8005_v2   ;;  %4110 = vst [vmem:[#allocation1] ss:$2 sm:$0xff] %v3658_v41 }
 0x58c   : > { %v4061_v43 = vld.sshfl [vmem:[#allocation1 + $0x30] sm:$0xff pattern:$0x75316420]  ;;  %4111 = vst [vmem:[#allocation1 + $0x1] ss:$2 sm:$0xff] %v3662_v7 }
 0x58d   : > { %v4286_v49 = vpop.permute.xlu1 %4285  ;;  %4068 = vst [vmem:[#allocation1 + $0x30] ss:$2 sm:$0xff] %v3554_v10  ;;  %v3666_v10 = vperm.slane %v8912_v19, %v7403_v28 }
 0x58e   : > { %v4574_v46 = vperm.slane %v4286_v49, %v7834_v52  ;;  %4069 = vst [vmem:[#allocation1 + $0x31] ss:$2 sm:$0xff] %v3558_v13  ;;  %v8098_v2 = vld.sshfl [vmem:[#allocation1 + $0x10] sm:$0xff pattern:$0x75316420] }
 0x58f   : > { %4100 = vst [vmem:[#allocation1 + $0x10] ss:$2 sm:$0xff] %v3634_v60  ;;  %v8913_v60 = vld [vmem:[#allocation56_spill] sm:$0xff] }
 0x590   : > { %v4575_v56 = vsel %vm8649_vm11, %v4574_v46, %v4573_v3  ;;  %4101 = vst [vmem:[#allocation1 + $0x11] ss:$2 sm:$0xff] %v3638_v0  ;;  %v8107_v51 = vld.sshfl [vmem:[#allocation1 + $0x20] sm:$0xff pattern:$0x75316420]  ;;  %v3770_v50 = vperm.slane %v8913_v60, %v7403_v28  ;;  %v3774_v0 = vperm.slane %v8913_v60, %v7405_v32 }
 0x591   : > { %v4577_v20 = vsel %vm4537_vm12, %v4576_v62, %v4575_v56  ;;  %4345 = vperm.xlu0 %5042, %v7953_v38   ;;  %4138 = vst [vmem:[#allocation1 + $0x20] ss:$2 sm:$0xff] %v3738_v61  ;;  %v4578_v38 = vperm.slane %v4292_v58, %v7857_v29  ;;  %v3690_v61 = vperm.slane %v8914_v42, %v7403_v28  ;;  %v8917_v58 = vld [vmem:[#allocation44_spill] sm:$0xff] }
 0x592   : > { %4348 = vperm.xlu1 %5043, %v4061_v43   ;;  %4139 = vst [vmem:[#allocation1 + $0x21] ss:$2 sm:$0xff] %v3742_v40  ;;  %v3694_v62 = vperm.slane %v8914_v42, %v7405_v32  ;;  %v8915_v40 = vld [vmem:[#allocation78_spill] sm:$0xff]  ;;  %v3802_v45 = vperm.slane %v8917_v58, %v7403_v28  ;;  %v8921_v42 = vld [vmem:[#allocation75_spill] sm:$0xff] }
 0x593   : > { %4351 = vperm.xlu2 %5044, %v8018_v47   ;;  %v3670_v47 = vperm.slane %v8912_v19, %v7405_v32  ;;  %v4579_v8 = vsel %vm4541_vm13, %v4578_v38, %v4577_v20  ;;  %v8146_v3 = vld.sshfl [vmem:[#allocation1] sm:$0xff pattern:$0x75316420]  ;;  %v3622_v56 = vperm.slane %v8915_v40, %v7405_v32  ;;  %v3654_v19 = vperm.slane %v7969_v21, %v7405_v32 }
 0x594   : > { %4122 = vst [vmem:[#allocation1] ss:$2 sm:$0xff] %v3690_v61  ;;  %v3834_v61 = vperm.slane %v8921_v42, %v7403_v28 }
 0x595   : > { %v4295_v11 = vpop.permute.xlu1 %4294  ;;  %v4073_v37 = vld.sshfl [vmem:[#allocation1 + $0x30] sm:$0xff pattern:$0x75316420]  ;;  %4123 = vst [vmem:[#allocation1 + $0x1] ss:$2 sm:$0xff] %v3694_v62 }
 0x596   : > { %v4580_v13 = vperm.slane %v4295_v11, %v7888_v17  ;;  %4080 = vst [vmem:[#allocation1 + $0x30] ss:$2 sm:$0xff] %v3586_v59 }
 0x597   : > { %4081 = vst [vmem:[#allocation1 + $0x31] ss:$2 sm:$0xff] %v3590_v48  ;;  %v8129_v43 = vld.sshfl [vmem:[#allocation1 + $0x10] sm:$0xff pattern:$0x75316420]  ;;  %v8918_v48 = vld [vmem:[#allocation19_spill] sm:$0xff] }
 0x598   : > { %v8134_v49 = vsel %vm4545_vm14, %v4580_v13, %v4579_v8  ;;  %4112 = vst [vmem:[#allocation1 + $0x10] ss:$2 sm:$0xff] %v3666_v10  ;;  %v3722_v38 = vperm.slane %v8918_v48, %v7403_v28  ;;  %v3726_v11 = vperm.slane %v8918_v48, %v7405_v32  ;;  %v4298_v48 = vpop.permute.xlu2 %4297 }
 0x599   : > { %4354 = vperm.xlu0 %5042, %v8039_v14   ;;  %4113 = vst [vmem:[#allocation1 + $0x11] ss:$2 sm:$0xff] %v3670_v47  ;;  %v8139_v46 = vld.sshfl [vmem:[#allocation1 + $0x20] sm:$0xff pattern:$0x75316420]  ;;  %v3618_v14 = vperm.slane %v8915_v40, %v7403_v28 }
 0x59a   : > { %4357 = vperm.xlu1 %5043, %v7961_v35   ;;  %4150 = vst [vmem:[#allocation1 + $0x20] ss:$2 sm:$0xff] %v3770_v50  ;;  %v8916_v35 = vld [vmem:[#allocation20_spill] sm:$0xff] }
 0x59b   : > { %4360 = vperm.xlu2 %5044, %v4073_v37   ;;  %4151 = vst [vmem:[#allocation1 + $0x21] ss:$2 sm:$0xff] %v3774_v0  ;;  %v3698_v41 = vperm.slane %v8916_v35, %v7403_v28  ;;  %v3702_v20 = vperm.slane %v8916_v35, %v7405_v32  ;;  %v3806_v37 = vperm.slane %v8917_v58, %v7405_v32  ;;  %v8924_v58 = vld [vmem:[#allocation47_spill] sm:$0xff] }
 0x59e   : > { %v4085_v63 = vld.sshfl [vmem:[#allocation1 + $0x30] sm:$0xff pattern:$0x75316420] }
 0x59f   : > { %4092 = vst [vmem:[#allocation1 + $0x30] ss:$2 sm:$0xff] %v3618_v14 }
 0x5a0   : > { %4093 = vst [vmem:[#allocation1 + $0x31] ss:$2 sm:$0xff] %v3622_v56  ;;  %v8157_v7 = vld.sshfl [vmem:[#allocation1 + $0x10] sm:$0xff pattern:$0x75316420]  ;;  %v3838_v56 = vperm.slane %v8921_v42, %v7405_v32 }
 0x5a1   : > { %4363 = vperm.xlu0 %5042, %v8053_v57   ;;  %4124 = vst [vmem:[#allocation1 + $0x10] ss:$2 sm:$0xff] %v3698_v41  ;;  %v8169_v57 = vld.sshfl [vmem:[#allocation1] sm:$0xff pattern:$0x75316420] }
 0x5a2   : > { %4366 = vperm.xlu1 %5043, %v8068_v26   ;;  %v8162_v59 = vld.sshfl [vmem:[#allocation1 + $0x20] sm:$0xff pattern:$0x75316420]  ;;  %4125 = vst [vmem:[#allocation1 + $0x11] ss:$2 sm:$0xff] %v3702_v20  ;;  %v3650_v26 = vperm.slane %v7969_v21, %v7403_v28  ;;  %v8920_v21 = vld [vmem:[#allocation24_spill] sm:$0xff] }
 0x5a3   : > { %4369 = vperm.xlu2 %5044, %v7979_v18   ;;  %4162 = vst [vmem:[#allocation1 + $0x20] ss:$2 sm:$0xff] %v3802_v45  ;;  %v8919_v18 = vld [vmem:[#allocation21_spill] sm:$0xff]  ;;  %v3754_v60 = vperm.slane %v8920_v21, %v7403_v28  ;;  %v3758_v50 = vperm.slane %v8920_v21, %v7405_v32  ;;  %v3714_v45 = vperm.slane %v8924_v58, %v7403_v28 }
 0x5a4   : > { %4134 = vst [vmem:[#allocation1] ss:$2 sm:$0xff] %v3722_v38  ;;  %v3730_v13 = vperm.slane %v8919_v18, %v7403_v28  ;;  %v3734_v47 = vperm.slane %v8919_v18, %v7405_v32  ;;  %v8925_v38 = vld [vmem:[#allocation49_spill] sm:$0xff] }
 0x5a5   : > { %4135 = vst [vmem:[#allocation1 + $0x1] ss:$2 sm:$0xff] %v3726_v11  ;;  %v3866_v11 = vperm.slane %v8925_v38, %v7403_v28 }
 0x5a6   : > { %4163 = vst [vmem:[#allocation1 + $0x21] ss:$2 sm:$0xff] %v3806_v37 }
 0x5a7   : > { %v4097_v10 = vld.sshfl [vmem:[#allocation1 + $0x30] sm:$0xff pattern:$0x75316420] }
 0x5a8   : > { %4104 = vst [vmem:[#allocation1 + $0x30] ss:$2 sm:$0xff] %v3650_v26  ;;  %v3870_v26 = vperm.slane %v8925_v38, %v7405_v32 }
 0x5a9   : > { %4372 = vperm.xlu0 %5042, %v4085_v63   ;;  %4105 = vst [vmem:[#allocation1 + $0x31] ss:$2 sm:$0xff] %v3654_v19  ;;  %v8182_v8 = vld.sshfl [vmem:[#allocation1 + $0x10] sm:$0xff pattern:$0x75316420]  ;;  %v8923_v63 = vld [vmem:[#allocation25_spill] sm:$0xff]  ;;  %v4582_v19 = vperm.slane %v4298_v48, %v7926_v25 }
 0x5aa   : > { %4375 = vperm.xlu1 %5043, %v8084_v1   ;;  %4136 = vst [vmem:[#allocation1 + $0x10] ss:$2 sm:$0xff] %v3730_v13  ;;  %v8922_v1 = vld [vmem:[#allocation37_spill] sm:$0xff]  ;;  %v3762_v35 = vperm.slane %v8923_v63, %v7403_v28  ;;  %v3766_v41 = vperm.slane %v8923_v63, %v7405_v32 }
 0x5ab   : > { %4378 = vperm.xlu2 %5044, %v8098_v2   ;;  %4137 = vst [vmem:[#allocation1 + $0x11] ss:$2 sm:$0xff] %v3734_v47  ;;  %v3682_v40 = vperm.slane %v8922_v1, %v7403_v28  ;;  %v3686_v2 = vperm.slane %v8922_v1, %v7405_v32  ;;  %v8927_v47 = vld [vmem:[#allocation35_spill] sm:$0xff] }
 0x5ac   : > { %v8189_v0 = vld.sshfl [vmem:[#allocation1] sm:$0xff pattern:$0x75316420]  ;;  %v3794_v21 = vperm.slane %v8927_v47, %v7403_v28  ;;  %v3798_v1 = vperm.slane %v8927_v47, %v7405_v32 }
 0x5ad   : > { %4146 = vst [vmem:[#allocation1] ss:$2 sm:$0xff] %v3754_v60  ;;  %v8193_v62 = vld.sshfl [vmem:[#allocation1 + $0x20] sm:$0xff pattern:$0x75316420] }
 0x5ae   : > { %4147 = vst [vmem:[#allocation1 + $0x1] ss:$2 sm:$0xff] %v3758_v50  ;;  %v8928_v60 = vld [vmem:[#allocation22_spill] sm:$0xff] }
 0x5af   : > { %4174 = vst [vmem:[#allocation1 + $0x20] ss:$2 sm:$0xff] %v3834_v61  ;;  %v3746_v50 = vperm.slane %v8928_v60, %v7403_v28  ;;  %v3750_v61 = vperm.slane %v8928_v60, %v7405_v32 }
 0x5b0   : > { %v4109_v14 = vld.sshfl [vmem:[#allocation1 + $0x30] sm:$0xff pattern:$0x75316420]  ;;  %4175 = vst [vmem:[#allocation1 + $0x21] ss:$2 sm:$0xff] %v3838_v56 }
 0x5b1   : > { %4381 = vperm.xlu0 %5042, %v8007_v36   ;;  %4116 = vst [vmem:[#allocation1 + $0x30] ss:$2 sm:$0xff] %v3682_v40  ;;  %v3718_v36 = vperm.slane %v8924_v58, %v7405_v32  ;;  %v8244_v40 = vpop.permute.xlu2 %4306 }
 0x5b2   : > { %4384 = vperm.xlu1 %5043, %v4097_v10   ;;  %4117 = vst [vmem:[#allocation1 + $0x31] ss:$2 sm:$0xff] %v3686_v2  ;;  %v8207_v20 = vld.sshfl [vmem:[#allocation1 + $0x10] sm:$0xff pattern:$0x75316420]  ;;  %v8926_v10 = vld [vmem:[#allocation59_spill] sm:$0xff] }
 0x5b3   : > { %4387 = vperm.xlu2 %5044, %v8115_v34   ;;  %4148 = vst [vmem:[#allocation1 + $0x10] ss:$2 sm:$0xff] %v3762_v35  ;;  %v3790_v18 = vperm.slane %v8926_v10, %v7405_v32 }
 0x5b4   : > { %4149 = vst [vmem:[#allocation1 + $0x11] ss:$2 sm:$0xff] %v3766_v41 }
 0x5b5   : > { %v8230_v13 = vld.sshfl [vmem:[#allocation1] sm:$0xff pattern:$0x75316420] }
 0x5b6   : > { %4159 = vst [vmem:[#allocation1 + $0x1] ss:$2 sm:$0xff] %v3790_v18 }
 0x5b7   : > { %v8217_v37 = vld.sshfl [vmem:[#allocation1 + $0x20] sm:$0xff pattern:$0x75316420] }
 0x5b8   : > { %4186 = vst [vmem:[#allocation1 + $0x20] ss:$2 sm:$0xff] %v3866_v11 }
 0x5b9   : > { %4390 = vperm.xlu0 %5042, %v8129_v43   ;;  %v4121_v34 = vld.sshfl [vmem:[#allocation1 + $0x30] sm:$0xff pattern:$0x75316420]  ;;  %v3786_v43 = vperm.slane %v8926_v10, %v7403_v28  ;;  %4187 = vst [vmem:[#allocation1 + $0x21] ss:$2 sm:$0xff] %v3870_v26  ;;  %v8271_v38 = vpop.permute.xlu2 %4315 }
 0x5ba   : > { %4393 = vperm.xlu1 %5043, %v8031_v5   ;;  %4128 = vst [vmem:[#allocation1 + $0x30] ss:$2 sm:$0xff] %v3714_v45  ;;  %v8228_v5 = vsel %vm4549_vm15, %v4582_v19, %v8134_v49  ;;  %v8931_v45 = vld [vmem:[#allocation74_spill] sm:$0xff]  ;;  %v8933_v19 = vld [vmem:[#allocation48_spill] sm:$0xff] }
 0x5bb   : > { %4396 = vperm.xlu2 %5044, %v4109_v14   ;;  %4129 = vst [vmem:[#allocation1 + $0x31] ss:$2 sm:$0xff] %v3718_v36  ;;  %v8237_v42 = vld.sshfl [vmem:[#allocation1 + $0x10] sm:$0xff pattern:$0x75316420]  ;;  %v3902_v14 = vperm.slane %v7957_v15, %v7405_v32  ;;  %v3826_v36 = vperm.slane %v8931_v45, %v7403_v28  ;;  %v3810_v10 = vperm.slane %v8933_v19, %v7403_v28 }
 0x5bc   : > { %4158 = vst [vmem:[#allocation1] ss:$2 sm:$0xff] %v3786_v43  ;;  %v3814_v43 = vperm.slane %v8933_v19, %v7405_v32 }
 0x5bd   : > { %4160 = vst [vmem:[#allocation1 + $0x10] ss:$2 sm:$0xff] %v3794_v21  ;;  %v8934_v21 = vld [vmem:[#allocation52_spill] sm:$0xff] }
 0x5be   : > { %4161 = vst [vmem:[#allocation1 + $0x11] ss:$2 sm:$0xff] %v3798_v1  ;;  %v3858_v60 = vperm.slane %v8934_v21, %v7403_v28  ;;  %v4304_v1 = vpop.permute.xlu1 %4303 }
 0x5c0   : > { %v8249_v2 = vld.sshfl [vmem:[#allocation1 + $0x20] sm:$0xff pattern:$0x75316420] }
 0x5c1   : > { %4399 = vperm.xlu0 %5042, %v8146_v3   ;;  %v3898_v3 = vperm.slane %v7957_v15, %v7403_v28  ;;  %4199 = vst [vmem:[#allocation1 + $0x21] ss:$2 sm:$0xff] %v3902_v14 }
 0x5c2   : > { %4402 = vperm.xlu1 %5043, %v8157_v7   ;;  %v4133_v49 = vld.sshfl [vmem:[#allocation1 + $0x30] sm:$0xff pattern:$0x75316420]  ;;  %v8929_v7 = vld [vmem:[#allocation39_spill] sm:$0xff] }
 0x5c3   : > { %4405 = vperm.xlu2 %5044, %v8073_v12   ;;  %4140 = vst [vmem:[#allocation1 + $0x30] ss:$2 sm:$0xff] %v3746_v50  ;;  %v3818_v56 = vperm.slane %v8929_v7, %v7403_v28  ;;  %v3822_v63 = vperm.slane %v8929_v7, %v7405_v32  ;;  %v8257_v35 = vld.sshfl [vmem:[#allocation1] sm:$0xff pattern:$0x75316420] }
 0x5c4   : > { %4141 = vst [vmem:[#allocation1 + $0x31] ss:$2 sm:$0xff] %v3750_v61  ;;  %v8930_v12 = vld [vmem:[#allocation30_spill] sm:$0xff]  ;;  %v8935_v61 = vld [vmem:[#allocation64_spill] sm:$0xff] }
 0x5c5   : > { %4198 = vst [vmem:[#allocation1 + $0x20] ss:$2 sm:$0xff] %v3898_v3  ;;  %v3778_v41 = vperm.slane %v8930_v12, %v7403_v28  ;;  %v3782_v15 = vperm.slane %v8930_v12, %v7405_v32  ;;  %v8267_v48 = vld.sshfl [vmem:[#allocation1 + $0x10] sm:$0xff pattern:$0x75316420]  ;;  %v3846_v14 = vperm.slane %v8935_v61, %v7405_v32 }
 0x5c6   : > { %4170 = vst [vmem:[#allocation1] ss:$2 sm:$0xff] %v3818_v56 }
 0x5c7   : > { %4171 = vst [vmem:[#allocation1 + $0x1] ss:$2 sm:$0xff] %v3822_v63  ;;  %v3886_v63 = vperm.slane %v7885_v44, %v7405_v32 }
 0x5c8   : > { %4172 = vst [vmem:[#allocation1 + $0x10] ss:$2 sm:$0xff] %v3826_v36 }
 0x5c9   : > { %4408 = vperm.xlu0 %5042, %v4121_v34   ;;  %v3830_v34 = vperm.slane %v8931_v45, %v7405_v32  ;;  %v4586_v45 = vperm.slane %v4304_v1, %v8882_v31 }
 0x5ca   : > { %4411 = vperm.xlu1 %5043, %v8169_v57   ;;  %v8932_v57 = vld [vmem:[#allocation29_spill] sm:$0xff] }
 0x5cb   : > { %4414 = vperm.xlu2 %5044, %v8182_v8   ;;  %v4145_v58 = vld.sshfl [vmem:[#allocation1 + $0x30] sm:$0xff pattern:$0x75316420]  ;;  %v3850_v11 = vperm.slane %v8932_v57, %v7403_v28  ;;  %4173 = vst [vmem:[#allocation1 + $0x11] ss:$2 sm:$0xff] %v3830_v34  ;;  %v3854_v8 = vperm.slane %v8932_v57, %v7405_v32 }
 0x5cc   : > { %4152 = vst [vmem:[#allocation1 + $0x30] ss:$2 sm:$0xff] %v3778_v41  ;;  %v8936_v41 = vld [vmem:[#allocation34_spill] sm:$0xff] }
 0x5cd   : > { %4153 = vst [vmem:[#allocation1 + $0x31] ss:$2 sm:$0xff] %v3782_v15  ;;  %v3890_v15 = vperm.slane %v8936_v41, %v7403_v28 }
 0x5ce   : > { %v8277_v26 = vld.sshfl [vmem:[#allocation1] sm:$0xff pattern:$0x75316420] }
 0x5cf   : > { %4182 = vst [vmem:[#allocation1] ss:$2 sm:$0xff] %v3850_v11  ;;  %v3874_v11 = vperm.slane %v7882_v9, %v7403_v28 }
 0x5d0   : > { %4183 = vst [vmem:[#allocation1 + $0x1] ss:$2 sm:$0xff] %v3854_v8 }
 0x5d1   : > { %4417 = vperm.xlu0 %5042, %v8107_v51   ;;  %v3862_v51 = vperm.slane %v8934_v21, %v7405_v32 }
 0x5d2   : > { %4420 = vperm.xlu1 %5043, %v4133_v49   ;;  %v8291_v50 = vld.sshfl [vmem:[#allocation1 + $0x10] sm:$0xff pattern:$0x75316420]  ;;  %v3842_v49 = vperm.slane %v8935_v61, %v7403_v28 }
 0x5d3   : > { %4423 = vperm.xlu2 %5044, %v8189_v0   ;;  %4184 = vst [vmem:[#allocation1 + $0x10] ss:$2 sm:$0xff] %v3858_v60 }
 0x5d4   : > { %v4157_v18 = vld.sshfl [vmem:[#allocation1 + $0x30] sm:$0xff pattern:$0x75316420]  ;;  %4185 = vst [vmem:[#allocation1 + $0x11] ss:$2 sm:$0xff] %v3862_v51 }
 0x5d5   : > { %v8285_v47 = vpop.permute.xlu2 %4324  ;;  %4164 = vst [vmem:[#allocation1 + $0x30] ss:$2 sm:$0xff] %v3810_v10 }
 0x5d6   : > { %4165 = vst [vmem:[#allocation1 + $0x31] ss:$2 sm:$0xff] %v3814_v43  ;;  %v4593_v43 = vperm.slane %v8271_v38, %v7710_v55 }
 0x5d7   : > { %v8310_v12 = vld.sshfl [vmem:[#allocation1] sm:$0xff pattern:$0x75316420] }
 0x5d8   : > { %4195 = vst [vmem:[#allocation1 + $0x1] ss:$2 sm:$0xff] %v3886_v63 }
 0x5d9   : > { %4426 = vperm.xlu0 %5042, %v8207_v20   ;;  %v3882_v20 = vperm.slane %v7885_v44, %v7403_v28  ;;  %v4587_v44 = vperm.slane %v8244_v40, %v7600_v39 }
 0x5da   : > { %4429 = vperm.xlu1 %5043, %v8139_v46  }
 0x5db   : > { %4432 = vperm.xlu2 %5044, %v4145_v58   ;;  %v4301_v0 = vpop.permute.xlu0 %4300  ;;  %4194 = vst [vmem:[#allocation1] ss:$2 sm:$0xff] %v3882_v20  ;;  %v3894_v58 = vperm.slane %v8936_v41, %v7405_v32 }
 0x5dc   : > { %v4584_v3 = vperm.slane %v4301_v0, %v7929_v23 }
 0x5dd   : > { %v8300_v7 = vpop.permute.xlu2 %4333  ;;  %v4169_v56 = vld.sshfl [vmem:[#allocation1 + $0x30] sm:$0xff pattern:$0x75316420] }
 0x5de   : > { %v8306_v46 = vsel %vm4553_vm0, %v4584_v3, %v8228_v5  ;;  %4176 = vst [vmem:[#allocation1 + $0x30] ss:$2 sm:$0xff] %v3842_v49  ;;  %v8318_v5 = vld.sshfl [vmem:[#allocation1 + $0x10] sm:$0xff pattern:$0x75316420]  ;;  %v3906_v49 = vperm.slane %v7983_v24, %v7403_v28 }
 0x5df   : > { %4177 = vst [vmem:[#allocation1 + $0x31] ss:$2 sm:$0xff] %v3846_v14 }
 0x5e0   : > { %4196 = vst [vmem:[#allocation1 + $0x10] ss:$2 sm:$0xff] %v3890_v15 }
 0x5e1   : > { %4435 = vperm.xlu0 %5042, %v8230_v13   ;;  %4197 = vst [vmem:[#allocation1 + $0x11] ss:$2 sm:$0xff] %v3894_v58  ;;  %v4588_v13 = vsel %vm4497_vm1, %v4587_v44, %v4586_v45 }
 0x5e2   : > { %4438 = vperm.xlu1 %5043, %v8237_v42   ;;  %v3878_v42 = vperm.slane %v7882_v9, %v7405_v32 }
 0x5e3   : > { %4441 = vperm.xlu2 %5044, %v8162_v59   ;;  %v4310_v36 = vpop.permute.xlu0 %4309 }
 0x5e4   : > { %v4313_v34 = vpop.permute.xlu1 %4312  ;;  %v4589_v57 = vperm.slane %v4310_v36, %v7603_v53 }
 0x5e5   : > { %v4591_v8 = vperm.slane %v4313_v34, %v7677_v30  ;;  %v4343_v19 = vpop.permute.xlu2 %4342 }
 0x5e6   : > { %v4590_v40 = vsel %vm4501_vm3, %v4589_v57, %v4588_v13  ;;  %v4181_v10 = vld.sshfl [vmem:[#allocation1 + $0x30] sm:$0xff pattern:$0x75316420]  ;;  %v4611_v45 = vperm.slane %v4343_v19, %v7888_v17 }
 0x5e7   : > { %v4592_v59 = vsel %vm4505_vm4, %v4591_v8, %v4590_v40  ;;  %4188 = vst [vmem:[#allocation1 + $0x30] ss:$2 sm:$0xff] %v3874_v11 }
 0x5e8   : > { %4189 = vst [vmem:[#allocation1 + $0x31] ss:$2 sm:$0xff] %v3878_v42  ;;  %v4594_v61 = vsel %vm4509_vm5, %v4593_v43, %v4592_v59  ;;  %v4202_v42 = vld.sshfl [vmem:[#allocation1] sm:$0xff pattern:$0x75316420] }
 0x5e9   : > { %4444 = vperm.xlu0 %5042, %v4157_v18  }
 0x5ea   : > { %4447 = vperm.xlu1 %5043, %v8257_v35   ;;  %v4599_v35 = vperm.slane %v8285_v47, %v7765_v22 }
 0x5eb   : > { %4450 = vperm.xlu2 %5044, %v8267_v48   ;;  %v4319_v21 = vpop.permute.xlu0 %4318  ;;  %v3910_v48 = vperm.slane %v7983_v24, %v7405_v32  ;;  %v4605_v32 = vperm.slane %v8300_v7, %v7834_v52 }
 0x5ec   : > { %v4322_v60 = vpop.permute.xlu1 %4321  ;;  %v4595_v51 = vperm.slane %v4319_v21, %v7731_v4 }
 0x5ed   : > { %v4597_v9 = vperm.slane %v4322_v60, %v7734_v6  ;;  %v4352_v0 = vpop.permute.xlu2 %4351 }
 0x5ee   : > { %v4596_v18 = vsel %vm4513_vm6, %v4595_v51, %v4594_v61  ;;  %v4204_v51 = vld.sshfl [vmem:[#allocation1 + $0x20] sm:$0xff pattern:$0x75316420] }
 0x5ef   : > { %v4598_v38 = vsel %vm4517_vm7, %v4597_v9, %v4596_v18  ;;  %v4193_v1 = vld.sshfl [vmem:[#allocation1 + $0x30] sm:$0xff pattern:$0x75316420] }
 0x5f0   : > { %v4600_v3 = vsel %vm4521_vm8, %v4599_v35, %v4598_v38  ;;  %4200 = vst [vmem:[#allocation1 + $0x30] ss:$2 sm:$0xff] %v3906_v49 }
 0x5f1   : > { %4453 = vperm.xlu0 %5042, %v8193_v62   ;;  %4201 = vst [vmem:[#allocation1 + $0x31] ss:$2 sm:$0xff] %v3910_v48 }
 0x5f2   : > { %4456 = vperm.xlu1 %5043, %v4169_v56  }
 0x5f3   : > { %4459 = vperm.xlu2 %5044, %v8277_v26   ;;  %v4328_v28 = vpop.permute.xlu0 %4327 }
 0x5f4   : > { %v4331_v14 = vpop.permute.xlu1 %4330  ;;  %v4601_v47 = vperm.slane %v4328_v28, %v7796_v16 }
 0x5f5   : > { %v4603_v20 = vperm.slane %v4331_v14, %v8908_v54  ;;  %v4361_v63 = vpop.permute.xlu2 %4360 }
 0x5f6   : > { %v4602_v24 = vsel %vm4525_vm9, %v4601_v47, %v4600_v3  ;;  %v4622_v43 = vperm.slane %v4361_v63, %v7677_v30 }
 0x5f7   : > { %v4604_v41 = vsel %vm4529_vm10, %v4603_v20, %v4602_v24 }
 0x5f8   : > { %v4606_v62 = vsel %vm8649_vm11, %v4605_v32, %v4604_v41  ;;  %v4205_v61 = vld.sshfl [vmem:[#allocation1 + $0x30] sm:$0xff pattern:$0x75316420] }
 0x5f9   : > { %4462 = vperm.xlu0 %5042, %v8291_v50  }
 0x5fa   : > { %4465 = vperm.xlu1 %5043, %v8217_v37  }
 0x5fb   : > { %4468 = vperm.xlu2 %5044, %v4181_v10   ;;  %v4337_v26 = vpop.permute.xlu0 %4336 }
 0x5fc   : > { %v4340_v56 = vpop.permute.xlu1 %4339  ;;  %v4607_v15 = vperm.slane %v4337_v26, %v7850_v33 }
 0x5fd   : > { %v4609_v58 = vperm.slane %v4340_v56, %v7857_v29  ;;  %v4370_v7 = vpop.permute.xlu2 %4369 }
 0x5fe   : > { %v4608_v44 = vsel %vm4537_vm12, %v4607_v15, %v4606_v62  ;;  %v4628_v38 = vperm.slane %v4370_v7, %v7734_v6 }
 0x5ff   : > { %v4610_v36 = vsel %vm4541_vm13, %v4609_v58, %v4608_v44 }
 0x600   : > { %v4612_v34 = vsel %vm4545_vm14, %v4611_v45, %v4610_v36 }
 0x601   : > { %4471 = vperm.xlu0 %5042, %v8310_v12   ;;  %v4203_v12 = vld.sshfl [vmem:[#allocation1 + $0x10] sm:$0xff pattern:$0x75316420] }
 0x602   : > { %4474 = vperm.xlu1 %5043, %v8318_v5  }
 0x603   : > { %4477 = vperm.xlu2 %5044, %v8249_v2   ;;  %v4346_v37 = vpop.permute.xlu0 %4345  ;;  %v4617_v2 = vperm.slane %v4352_v0, %v8882_v31 }
 0x604   : > { %v4349_v50 = vpop.permute.xlu1 %4348  ;;  %v4613_v57 = vperm.slane %v4346_v37, %v7926_v25 }
 0x605   : > { %v4615_v11 = vperm.slane %v4349_v50, %v7929_v23  ;;  %v4379_v19 = vpop.permute.xlu2 %4378 }
 0x606   : > { %v4614_v13 = vsel %vm4549_vm15, %v4613_v57, %v4612_v34  ;;  %v4634_v24 = vperm.slane %v4379_v19, %v8908_v54 }
 0x607   : > { %v8373_v8 = vsel %vm4553_vm0, %v4615_v11, %v4614_v13 }
 0x609   : > { %4480 = vperm.xlu0 %5042, %v4193_v1  }
 0x60a   : > { %4483 = vperm.xlu1 %5043, %v4202_v42  }
 0x60b   : > { %4486 = vperm.xlu2 %5044, %v4203_v12   ;;  %v4355_v5 = vpop.permute.xlu0 %4354 }
 0x60c   : > { %v4358_v40 = vpop.permute.xlu1 %4357  ;;  %v4618_v10 = vperm.slane %v4355_v5, %v7600_v39 }
 0x60d   : > { %v4620_v59 = vperm.slane %v4358_v40, %v7603_v53  ;;  %v4388_v49 = vpop.permute.xlu2 %4387 }
 0x60e   : > { %v4619_v21 = vsel %vm4497_vm1, %v4618_v10, %v4617_v2  ;;  %v4640_v7 = vperm.slane %v4388_v49, %v7857_v29 }
 0x60f   : > { %v4621_v60 = vsel %vm4501_vm3, %v4620_v59, %v4619_v21 }
 0x610   : > { %v4623_v9 = vsel %vm4505_vm4, %v4622_v43, %v4621_v60 }
 0x611   : > { %4489 = vperm.xlu0 %5042, %v4204_v51  }
 0x612   : > { %4492 = vperm.xlu1 %5043, %v4205_v61  }
 0x613   : > { %v4364_v35 = vpop.permute.xlu0 %4363 }
 0x614   : > { %v4367_v0 = vpop.permute.xlu1 %4366  ;;  %v4624_v18 = vperm.slane %v4364_v35, %v7710_v55  ;;  %v4711_v35 = vsel %vm4710_vm2, %v8373_v8, %v7941_v27 }
 0x615   : > { %v4626_v48 = vperm.slane %v4367_v0, %v7731_v4  ;;  %v4397_v47 = vpop.permute.xlu2 %4396 }
 0x616   : > { %v4625_v1 = vsel %vm4509_vm5, %v4624_v18, %v4623_v9  ;;  %v4646_v19 = vperm.slane %v4397_v47, %v7929_v23 }
 0x617   : > { %v4627_v3 = vsel %vm4513_vm6, %v4626_v48, %v4625_v1 }
 0x618   : > { %v4629_v28 = vsel %vm4517_vm7, %v4628_v38, %v4627_v3 }
 0x61b   : > { %v4373_v14 = vpop.permute.xlu0 %4372 }
 0x61c   : > { %v4376_v20 = vpop.permute.xlu1 %4375  ;;  %v4630_v63 = vperm.slane %v4373_v14, %v7765_v22 }
 0x61d   : > { %v4632_v32 = vperm.slane %v4376_v20, %v7796_v16  ;;  %v4406_v44 = vpop.permute.xlu2 %4405 }
 0x61e   : > { %v4631_v41 = vsel %vm4521_vm8, %v4630_v63, %v4629_v28  ;;  %v4651_v49 = vperm.slane %v4406_v44, %v7603_v53 }
 0x61f   : > { %v4633_v62 = vsel %vm4525_vm9, %v4632_v32, %v4631_v41 }
 0x620   : > { %v4635_v26 = vsel %vm4529_vm10, %v4634_v24, %v4633_v62 }
 0x623   : > { %v4382_v56 = vpop.permute.xlu0 %4381 }
 0x624   : > { %v4385_v15 = vpop.permute.xlu1 %4384  ;;  %v4636_v58 = vperm.slane %v4382_v56, %v7834_v52 }
 0x625   : > { %v4638_v45 = vperm.slane %v4385_v15, %v7850_v33  ;;  %v4415_v5 = vpop.permute.xlu2 %4414 }
 0x626   : > { %v4637_v36 = vsel %vm8649_vm11, %v4636_v58, %v4635_v26  ;;  %v4657_v47 = vperm.slane %v4415_v5, %v7731_v4 }
 0x627   : > { %v4639_v34 = vsel %vm4537_vm12, %v4638_v45, %v4637_v36 }
 0x628   : > { %v4641_v37 = vsel %vm4541_vm13, %v4640_v7, %v4639_v34 }
 0x62b   : > { %v4391_v50 = vpop.permute.xlu0 %4390 }
 0x62c   : > { %v4394_v57 = vpop.permute.xlu1 %4393  ;;  %v4642_v11 = vperm.slane %v4391_v50, %v7888_v17 }
 0x62d   : > { %v4644_v13 = vperm.slane %v4394_v57, %v7926_v25  ;;  %v4424_v60 = vpop.permute.xlu2 %4423 }
 0x62e   : > { %v4643_v42 = vsel %vm4545_vm14, %v4642_v11, %v4641_v37  ;;  %v4663_v62 = vperm.slane %v4424_v60, %v7796_v16 }
 0x62f   : > { %v4645_v12 = vsel %vm4549_vm15, %v4644_v13, %v4643_v42 }
 0x630   : > { %v4647_v2 = vsel %vm4553_vm0, %v4646_v19, %v4645_v12 }
 0x633   : > { %v4400_v40 = vpop.permute.xlu0 %4399 }
 0x634   : > { %v4403_v10 = vpop.permute.xlu1 %4402  ;;  %v4648_v59 = vperm.slane %v4400_v40, %v8882_v31 }
 0x635   : > { %v4649_v43 = vperm.slane %v4403_v10, %v7600_v39  ;;  %v4433_v1 = vpop.permute.xlu2 %4432 }
 0x636   : > { %v4669_v44 = vperm.slane %v4433_v1, %v7850_v33 }
 0x637   : > { %v4650_v21 = vsel %vm4497_vm1, %v4649_v43, %v4648_v59 }
 0x638   : > { %v4652_v18 = vsel %vm4501_vm3, %v4651_v49, %v4650_v21 }
 0x63b   : > { %v4409_v51 = vpop.permute.xlu0 %4408 }
 0x63c   : > { %v4412_v9 = vpop.permute.xlu1 %4411  ;;  %v4653_v61 = vperm.slane %v4409_v51, %v7677_v30 }
 0x63d   : > { %v4655_v0 = vperm.slane %v4412_v9, %v7710_v55  ;;  %v4442_v26 = vpop.permute.xlu2 %4441  ;;  %v4714_v9 = vsel %vm4710_vm2, %v4647_v2, %v8306_v46 }
 0x63e   : > { %v4654_v48 = vsel %vm4505_vm4, %v4653_v61, %v4652_v18  ;;  %v4675_v19 = vperm.slane %v4442_v26, %v7926_v25 }
 0x63f   : > { %v4656_v28 = vsel %vm4509_vm5, %v4655_v0, %v4654_v48 }
 0x640   : > { %v4658_v63 = vsel %vm4513_vm6, %v4657_v47, %v4656_v28 }
 0x643   : > { %v4418_v38 = vpop.permute.xlu0 %4417 }
 0x644   : > { %v4421_v3 = vpop.permute.xlu1 %4420  ;;  %v4659_v14 = vperm.slane %v4418_v38, %v7734_v6 }
 0x645   : > { %v4661_v20 = vperm.slane %v4421_v3, %v7765_v22  ;;  %v4451_v11 = vpop.permute.xlu2 %4450 }
 0x646   : > { %v4660_v27 = vsel %vm4517_vm7, %v4659_v14, %v4658_v63  ;;  %v4680_v49 = vperm.slane %v4451_v11, %v7600_v39 }
 0x647   : > { %v4662_v32 = vsel %vm4521_vm8, %v4661_v20, %v4660_v27 }
 0x648   : > { %v4664_v15 = vsel %vm4525_vm9, %v4663_v62, %v4662_v32 }
 0x64b   : > { %v4427_v8 = vpop.permute.xlu0 %4426 }
 0x64c   : > { %v4430_v24 = vpop.permute.xlu1 %4429  ;;  %v4665_v41 = vperm.slane %v4427_v8, %v8908_v54 }
 0x64d   : > { %v4667_v56 = vperm.slane %v4430_v24, %v7834_v52  ;;  %v4460_v43 = vpop.permute.xlu2 %4459 }
 0x64e   : > { %v4666_v58 = vsel %vm4529_vm10, %v4665_v41, %v4664_v15  ;;  %v4686_v28 = vperm.slane %v4460_v43, %v7710_v55 }
 0x64f   : > { %v4668_v45 = vsel %vm8649_vm11, %v4667_v56, %v4666_v58  ;;  %vm4712_vm11 = vcmask 1042434  }
 0x650   : > { %v4670_v50 = vsel %vm4537_vm12, %v4669_v44, %v4668_v45 }
 0x653   : > { %v4436_v7 = vpop.permute.xlu0 %4435 }
 0x654   : > { %v4439_v36 = vpop.permute.xlu1 %4438  ;;  %v4671_v34 = vperm.slane %v4436_v7, %v7857_v29 }
 0x655   : > { %v4673_v37 = vperm.slane %v4439_v36, %v7888_v17 }
 0x656   : > { %v4672_v57 = vsel %vm4541_vm13, %v4671_v34, %v4670_v50 }
 0x657   : > { %v4674_v13 = vsel %vm4545_vm14, %v4673_v37, %v4672_v57 }
 0x658   : > { %v4676_v40 = vsel %vm4549_vm15, %v4675_v19, %v4674_v13 }
 0x65b   : > { %v4445_v42 = vpop.permute.xlu0 %4444 }
 0x65c   : > { %v4448_v12 = vpop.permute.xlu1 %4447  ;;  %v4677_v5 = vperm.slane %v4445_v42, %v7929_v23 }
 0x65d   : > { %v4679_v51 = vperm.slane %v4448_v12, %v8882_v31 }
 0x65e   : > { %v4678_v10 = vsel %vm4553_vm0, %v4677_v5, %v4676_v40 }
 0x65f   : > { %v4713_v59 = vsel %vm4712_vm11, %v4678_v10, %v4711_v35  ;;  %v4681_v0 = vsel %vm4497_vm1, %v4680_v49, %v4679_v51  ;;  %v4469_v35 = vpop.permute.xlu2 %4468  ;;  %vm8937_vm1 = vcmask 720512  }
 0x660   : > { %v4692_v20 = vperm.slane %v4469_v35, %v7765_v22 }
 0x663   : > { %v4454_v21 = vpop.permute.xlu0 %4453 }
 0x664   : > { %v4457_v60 = vpop.permute.xlu1 %4456  ;;  %v4682_v61 = vperm.slane %v4454_v21, %v7603_v53 }
 0x665   : > { %v4684_v18 = vperm.slane %v4457_v60, %v7677_v30 }
 0x666   : > { %v4683_v48 = vsel %vm4501_vm3, %v4682_v61, %v4681_v0  ;;  %vm4717_vm3 = vcmask 1043456  }
 0x667   : > { %v4685_v3 = vsel %vm4505_vm4, %v4684_v18, %v4683_v48  ;;  %v4478_v63 = vpop.permute.xlu2 %4477 }
 0x668   : > { %v4687_v53 = vsel %vm4509_vm5, %v4686_v28, %v4685_v3  ;;  %v4698_v32 = vperm.slane %v4478_v63, %v7834_v52 }
 0x66b   : > { %v4463_v38 = vpop.permute.xlu0 %4462 }
 0x66c   : > { %v4466_v1 = vpop.permute.xlu1 %4465  ;;  %v4688_v31 = vperm.slane %v4463_v38, %v7731_v4 }
 0x66d   : > { %v4690_v46 = vperm.slane %v4466_v1, %v7734_v6 }
 0x66e   : > { %v4689_v39 = vsel %vm4513_vm6, %v4688_v31, %v4687_v53 }
 0x66f   : > { %v4691_v30 = vsel %vm4517_vm7, %v4690_v46, %v4689_v39  ;;  %v4487_v26 = vpop.permute.xlu2 %4486 }
 0x670   : > { %v4693_v55 = vsel %vm4521_vm8, %v4692_v20, %v4691_v30  ;;  %v4704_v56 = vperm.slane %v4487_v26, %v7888_v17 }
 0x673   : > { %v4472_v2 = vpop.permute.xlu0 %4471 }
 0x674   : > { %v4475_v14 = vpop.permute.xlu1 %4474  ;;  %v4694_v47 = vperm.slane %v4472_v2, %v7796_v16 }
 0x675   : > { %v4696_v4 = vperm.slane %v4475_v14, %v8908_v54 }
 0x676   : > { %v4695_v6 = vsel %vm4525_vm9, %v4694_v47, %v4693_v55 }
 0x677   : > { %v4697_v27 = vsel %vm4529_vm10, %v4696_v4, %v4695_v6 }
 0x678   : > { %v4699_v62 = vsel %vm8937_vm1, %v4698_v32, %v4697_v27 }
 0x67b   : > { %v4481_v8 = vpop.permute.xlu0 %4480 }
 0x67c   : > { %v4484_v24 = vpop.permute.xlu1 %4483  ;;  %v4700_v41 = vperm.slane %v4481_v8, %v7850_v33 }
 0x67d   : > { %v4702_v16 = vperm.slane %v4484_v24, %v7857_v29 }
 0x67e   : > { %v4701_v22 = vsel %vm4537_vm12, %v4700_v41, %v4699_v62 }
 0x67f   : > { %v4703_v54 = vsel %vm4541_vm13, %v4702_v16, %v4701_v22 }
 0x680   : > { %v4705_v29 = vsel %vm4545_vm14, %v4704_v56, %v4703_v54 }
 0x683   : > { %v4490_v15 = vpop.permute.xlu0 %4489 }
 0x684   : > { %v4493_v58 = vpop.permute.xlu1 %4492  ;;  %v4706_v52 = vperm.slane %v4490_v15, %v7926_v25 }
 0x685   : > { %v4708_v33 = vperm.slane %v4493_v58, %v7929_v23 }
 0x686   : > { %v4707_v45 = vsel %vm4549_vm15, %v4706_v52, %v4705_v29 }
 0x687   : > { %v4709_v7 = vsel %vm4553_vm0, %v4708_v33, %v4707_v45 }
 0x688   : > { %v4715_v17 = vsel %vm4712_vm11, %v4709_v7, %v4714_v9 }
 0x689   : > { %v4716_v25 = vrot.slane %v4715_v17, 4 }
 0x68b   : > { %v4718_v44 = vsel %vm4717_vm3, %v4713_v59, %v4716_v25 }
 0x68c   : > { %4720 = vst [vmem:[%s296_s16] sm:$0x77] %v4718_v44 }
 0x68d   : > { %5320 = shalt.err (!%p5317_p13)
}
 0x68e   : > { %4988 = dma.vmem_to_hbm [thread:$0]  (%p5448_p9), %s4736_s7, 128, %s4738_s8, %s4722_s21  }
 0x68f PF: > { %p4994_p0 = scmp.ge.s32.totalorder %s5363_s15, 2  ;;  %s4749_s28 = sand.u32 1, %s5351_s12  }
 0x690   : > { %s4750_s29 = scalar_lea.sflag [#allocation4], %s4749_s28 }
 0x691   : > { %p4991_p1 = pnand %p4994_p0, %p5452_p10 }
 0x693   : > { %p4992_p2 = pneg %p4991_p1 }
 0x695   : > { %5346 = dma.done.wait (%p4992_p2), %s4750_s29, 128  }
 0x696   : > { %5348 = vsyncadd (%p4992_p2), %s4750_s29, 4294967168  ;;  %s8938_s23 = sld [smem:[#allocation15_spill]]  ;;  %p19_p3 = scmp.ge.s32.totalorder %s5425_s18, 6  }
 0x697   : > { %s8939_s14 = sld [smem:[#allocation16_spill]]  ;;  %s8940_s12 = smov %s5355_s13 }
 0x698   : > { %s8942_s15 = smov %s5425_s18  ;;  %21 = sbr.rel (!%p19_p3) target bundleno = 7 (0x7), region = 113 }
 0x69c   : > { %s8941_s13 = smov %s8938_s23 }
 0x69d   :  { %4756 = vsyncpa [#allocation3], 1 }
 0x69e   :  { %4758 = vsyncpa [#allocation3 + $0x1], 1 }
 0x69f   :  { %4759 = vsyncpa [#allocation6], 1 }
 0x6a0   :  { %4761 = vsyncpa [#allocation6 + $0x1], 1 }
 0x6a1   :  { %4762 = vsyncpa [#allocation4], 1 }
 0x6a2   :  { %4764 = vsyncpa [#allocation4 + $0x1], 1 }

</bundles_post_ra>
